<compile_context>
chip_gen: v5e
topology: v5e:2x2
jax: 0.10.0
libtpu: 0.0.40
codegen_flags: <defaults>
</compile_context>

<pallas_src>
import functools

import jax
import jax.numpy as jnp
from jax import lax
from jax.experimental import pallas as pl
from jax.experimental.pallas import tpu as pltpu


def _ceil_to(n, m):
    return ((n + m - 1) // m) * m


def _pad_axis_to(a, axis, size):
    if a.shape[axis] == size:
        return a
    cfg = [(0, 0)] * a.ndim
    cfg[axis] = (0, size - a.shape[axis])
    return jnp.pad(a, cfg)


# ----------------------------------------------------------------------------
# Fused GPRB kernel (TB lane-stacked images per grid step)
# ----------------------------------------------------------------------------
def _gprb_kernel(mask_ref, x_ref, wf_ref, w2_ref, t_ref, o_ref, *,
                 shifts, c1, cp):
    mask = mask_ref[...]            # (1, Ltot): 1.0 on interior pixels
    xb = x_ref[0]                   # (Cp, Ltot) f32, padded-flat, lane-stacked
    t = t_ref[...]                  # (c1 + cp, 1) f32 per-channel shifts

    def taps(a):
        # k*k static lane rolls (XLU slot).  Tap offsets are tiny relative to
        # each image's L-lane segment, so for interior pixels a roll never
        # crosses into a neighbouring image's segment.
        return [a if s == 0 else pltpu.roll(a, shift=s, axis=1) for s in shifts]

    # ---- Stage 1: GrConv1+bn1 and conv1+bn3 share input x -> ONE stacked MXU
    # contraction.  BN scales are folded into the weight rows, so the epilogue
    # is just "+ shift".  The concat is built in f32 (8-row aligned blocks)
    # and cast once to the matmul dtype (bf16 by default).
    col_x = jnp.concatenate(taps(xb), axis=0).astype(wf_ref.dtype)
    yz = jnp.dot(wf_ref[...], col_x, preferred_element_type=jnp.float32)
    # ReLU, then halo re-zeroing: required because this result feeds another
    # rolled im2col (its taps must read genuine zeros on the padding ring).
    yz = jnp.maximum(yz + t[:c1], 0.0) * mask          # (Cp + Cm, Ltot)

    # ---- Stage 2: GrConv2+bn2 and conv2+bn4 merged into ONE K = k*k*(Cp+Cm)
    # contraction (their outputs are summed by the residual; no ReLU between).
    col_2 = jnp.concatenate(taps(yz[:cp]) + taps(yz[cp:]),
                            axis=0).astype(w2_ref.dtype)
    yz2 = jnp.dot(w2_ref[...], col_2, preferred_element_type=jnp.float32)

    # Residual + ReLU.  Halo / lane-padding positions hold garbage here (no
    # mask multiply): the wrapper crops the interior, nothing downstream sees
    # the padded form of this output.
    o_ref[0] = jnp.maximum(xb + yz2 + t[c1:], 0.0).astype(o_ref.dtype)


# ----------------------------------------------------------------------------
# Wrapper
# ----------------------------------------------------------------------------
def gprb_forward(x, params, *, k, pad, images_per_step=None,
                 matmul_dtype=jnp.bfloat16):
    """x: (B, Cin, H, W) NCHW.  params: 4x (HWIO weight, bn scale, bn shift).

    The conv bias is folded together with the inference-mode BatchNorm into
    (scale, shift), exactly as in the PyTorch module's eval-mode math.
    """
    B, Cin, H, W = x.shape
    (wg1, s1, t1), (wg2, s2, t2), (wc1, s3, t3), (wc2, s4, t4) = params
    Cmid = wc1.shape[-1]

    # The roll-based im2col assumes 'same' zero padding, stride 1, no dilation.
    assert k % 2 == 1 and pad == k // 2, "GPRB kernel requires pad == k // 2"

    Hp, Wp = H + 2 * pad, W + 2 * pad
    P = Hp * Wp
    L = _ceil_to(P, 128)            # lane extent of one image (lane-dense)
    Cp = _ceil_to(Cin, 8)           # sublane-aligned channel counts
    Cm = _ceil_to(Cmid, 8)

    # Images per grid step: pack the whole batch into one step on single-TC
    # chips (v5e/v6e) to kill per-step overhead; split into two parallel steps
    # on v7x so both TensorCores get work.
    if images_per_step is None:
        try:
            kind = jax.devices()[0].device_kind.lower()
            two_tc = ("v7" in kind) or ("tpu7" in kind)
        except Exception:
            two_tc = False
        images_per_step = (B + 1) // 2 if (two_tc and B >= 2) else B
    TB = max(1, min(images_per_step, B))
    nsteps = pl.cdiv(B, TB)
    Bp = nsteps * TB
    Ltot = TB * L

    def flat_w(w, scale, cin_pad, cout_pad):
        # Fold the BN scale into each Cout row, pad channels (padded rows are
        # exactly zero), flatten HWIO -> (Cout_pad, k*k*Cin_pad) with
        # tap-major (kh, kw, cin) columns.
        w = w * scale.reshape(1, 1, 1, -1)
        w = _pad_axis_to(_pad_axis_to(w, 2, cin_pad), 3, cout_pad)
        return jnp.transpose(w, (3, 0, 1, 2)).reshape(cout_pad, k * k * cin_pad)

    def col_vec(v, cpad):
        return _pad_axis_to(v, 0, cpad).reshape(cpad, 1)

    # Stage 1: GrConv1+bn1 and conv1+bn3 stacked along Cout (shared input x).
    wf = jnp.concatenate([flat_w(wg1, s1, Cp, Cp),
                          flat_w(wc1, s3, Cp, Cm)], axis=0).astype(matmul_dtype)
    # Stage 2: GrConv2+bn2 and conv2+bn4 merged along K (one contraction).
    w2 = jnp.concatenate([flat_w(wg2, s2, Cp, Cp),
                          flat_w(wc2, s4, Cm, Cp)], axis=1).astype(matmul_dtype)
    # All per-channel shifts in one stacked (C, 1) ref: stage-1 [t1; t3],
    # then the merged stage-2 shift (t2 + t4).  Padded rows stay exactly zero
    # so padded channels never leak into the next im2col.
    tvec = jnp.concatenate([col_vec(t1, Cp), col_vec(t3, Cm),
                            col_vec(t2, Cp) + col_vec(t4, Cp)], axis=0)

    # Padded-flat, channel-padded, lane-stacked input: (nsteps, Cp, TB*L).
    xp = jnp.pad(x, ((0, Bp - B), (0, 0), (pad, pad), (pad, pad)))
    xp = xp.reshape(Bp, Cin, P)
    xp = _pad_axis_to(_pad_axis_to(xp, 2, L), 1, Cp)            # (Bp, Cp, L)
    xp = xp.reshape(nsteps, TB, Cp, L).transpose(0, 2, 1, 3).reshape(
        nsteps, Cp, Ltot)

    # Interior mask over the lane-stacked flattened padded spatial axis.
    idx = jnp.arange(L)
    r, c = idx // Wp, idx % Wp
    interior = (idx < P) & (r >= pad) & (r < pad + H) & (c >= pad) & (c < pad + W)
    mask = jnp.tile(interior.astype(jnp.float32), TB).reshape(1, Ltot)

    # Lane-roll amount per conv tap in padded-flat coordinates:
    # rolled[p] == activation[p + (kh-pad)*Wp + (kw-pad)]  (per image segment).
    shifts = tuple(
        (-((kh - pad) * Wp + (kw - pad))) % Ltot
        for kh in range(k) for kw in range(k))

    kern = functools.partial(_gprb_kernel, shifts=shifts, c1=Cp + Cm, cp=Cp)
    out_pf = pl.pallas_call(
        kern,
        out_shape=jax.ShapeDtypeStruct((nsteps, Cp, Ltot), x.dtype),
        grid=(nsteps,),
        in_specs=[
            pl.BlockSpec((1, Ltot), lambda b: (0, 0)),                # mask
            pl.BlockSpec((1, Cp, Ltot), lambda b: (b, 0, 0)),         # x
            pl.BlockSpec((Cp + Cm, k * k * Cp), lambda b: (0, 0)),    # stage-1 W
            pl.BlockSpec((Cp, k * k * (Cp + Cm)), lambda b: (0, 0)),  # stage-2 W
            pl.BlockSpec((Cp + Cm + Cp, 1), lambda b: (0, 0)),        # shifts
        ],
        out_specs=pl.BlockSpec((1, Cp, Ltot), lambda b: (b, 0, 0)),
        compiler_params=pltpu.CompilerParams(
            dimension_semantics=("parallel",)),
    )(mask, xp, wf, w2, tvec)

    # Un-stack the lane axis, drop channel / lane / batch padding, crop the
    # spatial interior -> NCHW.
    out = out_pf.reshape(nsteps, Cp, TB, L).transpose(0, 2, 1, 3).reshape(
        Bp, Cp, L)
    out = out[:B, :Cin, :P].reshape(B, Cin, Hp, Wp)
    return out[:, :, pad:pad + H, pad:pad + W]


# ----------------------------------------------------------------------------
# Pure-JAX reference (lax conv) for validation
# ----------------------------------------------------------------------------
def gprb_reference(x, params, *, k, pad):
    def conv(inp, w, s, t, relu):
        o = lax.conv_general_dilated(
            inp, w, window_strides=(1, 1),
            padding=[(pad, pad), (pad, pad)],
            dimension_numbers=("NCHW", "HWIO", "NCHW"))
        o = o * s.reshape(1, -1, 1, 1) + t.reshape(1, -1, 1, 1)
        return jnp.maximum(o, 0.0) if relu else o

    (wg1, s1, t1), (wg2, s2, t2), (wc1, s3, t3), (wc2, s4, t4) = params
    y = conv(x, wg1, s1, t1, True)
    y = conv(y, wg2, s2, t2, False)
    z = conv(x, wc1, s3, t3, True)
    z = conv(z, wc2, s4, t4, False)
    return jnp.maximum(x + y + z, 0.0)


# ----------------------------------------------------------------------------
# Parameter construction (deterministic, synthetic)
# ----------------------------------------------------------------------------
def _dense_weight(key, cin, cout, k):
    return 0.1 * jax.random.normal(key, (k, k, cin, cout), jnp.float32)


def _grouped_dense_weight(key, cin, cout, k, groups):
    """Block-diagonal dense weight, exactly equivalent to a grouped conv."""
    gs_in, gs_out = cin // groups, cout // groups
    w = jnp.zeros((k, k, cin, cout), jnp.float32)
    for g in range(groups):
        key, sub = jax.random.split(key)
        blk = 0.1 * jax.random.normal(sub, (k, k, gs_in, gs_out), jnp.float32)
        w = w.at[:, :, g * gs_in:(g + 1) * gs_in,
                 g * gs_out:(g + 1) * gs_out].set(blk)
    return w


def _bn_fold(key, c, bias, eps=1e-5):
    """Inference-mode BatchNorm folded with the conv bias -> (scale, shift)."""
    k1, k2, k3, k4 = jax.random.split(key, 4)
    gamma = 1.0 + 0.1 * jax.random.normal(k1, (c,), jnp.float32)
    beta = 0.1 * jax.random.normal(k2, (c,), jnp.float32)
    mean = 0.1 * jax.random.normal(k3, (c,), jnp.float32)
    var = 1.0 + 0.1 * jax.random.uniform(k4, (c,), jnp.float32)
    scale = gamma * lax.rsqrt(var + eps)
    shift = beta - mean * scale + bias * scale
    return scale, shift


# ----------------------------------------------------------------------------
if __name__ == "__main__":
    B, Cin, H, W = 2, 4, 16, 16            # x: NCHW (2, 4, 16, 16)
    k_sz, pad, groups = 3, 1, 2
    Cmid = 32

    key = jax.random.PRNGKey(0)
    keys = jax.random.split(key, 16)

    x = jax.random.normal(keys[0], (B, Cin, H, W), jnp.float32)

    # GrConv1 + bn1
    wg1 = _grouped_dense_weight(keys[1], Cin, Cin, k_sz, groups)
    bg1 = 0.05 * jax.random.normal(keys[2], (Cin,), jnp.float32)
    s1, t1 = _bn_fold(keys[3], Cin, bg1)
    # GrConv2 + bn2
    wg2 = _grouped_dense_weight(keys[4], Cin, Cin, k_sz, groups)
    bg2 = 0.05 * jax.random.normal(keys[5], (Cin,), jnp.float32)
    s2, t2 = _bn_fold(keys[6], Cin, bg2)
    # conv1 (Cin -> 32) + bn3
    wc1 = _dense_weight(keys[7], Cin, Cmid, k_sz)
    bc1 = 0.05 * jax.random.normal(keys[8], (Cmid,), jnp.float32)
    s3, t3 = _bn_fold(keys[9], Cmid, bc1)
    # conv2 (32 -> Cin) + bn4
    wc2 = _dense_weight(keys[10], Cmid, Cin, k_sz)
    bc2 = 0.05 * jax.random.normal(keys[11], (Cin,), jnp.float32)
    s4, t4 = _bn_fold(keys[12], Cin, bc2)

    params = ((wg1, s1, t1), (wg2, s2, t2), (wc1, s3, t3), (wc2, s4, t4))

    ref = gprb_reference(x, params, k=k_sz, pad=pad)

    # Exact-semantics check: f32 MXU operands (tight tolerance).
    out_f32 = gprb_forward(x, params, k=k_sz, pad=pad,
                           matmul_dtype=jnp.float32)
    out_f32 = jax.block_until_ready(out_f32)
    assert out_f32.shape == (B, Cin, H, W)
    assert bool(jnp.allclose(out_f32, ref, atol=1e-4, rtol=1e-4)), \
        "f32 kernel mismatch vs reference"

    # Default fast path: bf16 MXU operands, f32 accumulate / epilogue / residual
    # (tolerance relaxed accordingly).
    out = gprb_forward(x, params, k=k_sz, pad=pad)
    out = jax.block_until_ready(out)
    assert out.shape == (B, Cin, H, W)
    assert bool(jnp.allclose(out, ref, atol=5e-2, rtol=5e-2)), \
        "bf16 kernel mismatch vs reference"

    print("KERNEL_OK")
</pallas_src>

<mosaic_0001>
module attributes {stable_mosaic.version = 11 : i64} {
  func.func @_gprb_kernel(%arg0: i32, %arg1: memref<1x768xf32, #tpu.memory_space<vmem>>, %arg2: memref<1x8x768xf32, #tpu.memory_space<vmem>>, %arg3: memref<40x72xf32, #tpu.memory_space<vmem>>, %arg4: memref<8x360xf32, #tpu.memory_space<vmem>>, %arg5: memref<48x1xf32, #tpu.memory_space<vmem>>, %arg6: memref<1x8x768xf32, #tpu.memory_space<vmem>>) attributes {dimension_semantics = [#tpu.dimension_semantics<parallel>], iteration_bounds = array<i64: 1>, scalar_prefetch = 0 : i64, scratch_operands = 0 : i64, tpu.core_type = #tpu.core_type<tc>, window_params = [{pipeline_mode = #tpu.pipeline_mode<synchronous>, transform_indices = @transform_0, window_bounds = array<i64: 1, 768>}, {transform_indices = @transform_1, window_bounds = array<i64: 1, 8, 768>}, {pipeline_mode = #tpu.pipeline_mode<synchronous>, transform_indices = @transform_2, window_bounds = array<i64: 40, 72>}, {pipeline_mode = #tpu.pipeline_mode<synchronous>, transform_indices = @transform_3, window_bounds = array<i64: 8, 360>}, {pipeline_mode = #tpu.pipeline_mode<synchronous>, transform_indices = @transform_4, window_bounds = array<i64: 48, 1>}, {transform_indices = @transform_5, window_bounds = array<i64: 1, 8, 768>}]} {
    %c0 = arith.constant 0 : index
    %c0_0 = arith.constant 0 : index
    %0 = vector.load %arg1[%c0, %c0_0] : memref<1x768xf32, #tpu.memory_space<vmem>>, vector<1x768xf32>
    %c0_1 = arith.constant 0 : index
    %c0_2 = arith.constant 0 : index
    %c0_3 = arith.constant 0 : index
    %1 = vector.load %arg2[%c0_1, %c0_2, %c0_3] : memref<1x8x768xf32, #tpu.memory_space<vmem>>, vector<1x8x768xf32>
    %2 = vector.shape_cast %1 : vector<1x8x768xf32> to vector<8x768xf32>
    %c0_4 = arith.constant 0 : index
    %c0_5 = arith.constant 0 : index
    %3 = vector.load %arg5[%c0_4, %c0_5] : memref<48x1xf32, #tpu.memory_space<vmem>>, vector<48x1xf32>
    %c19_i32 = arith.constant 19 : i32
    %4 = tpu.dynamic_rotate %2 by %c19_i32 dim 1 : vector<8x768xf32>, i32 -> vector<8x768xf32>
    %c18_i32 = arith.constant 18 : i32
    %5 = tpu.dynamic_rotate %2 by %c18_i32 dim 1 : vector<8x768xf32>, i32 -> vector<8x768xf32>
    %c17_i32 = arith.constant 17 : i32
    %6 = tpu.dynamic_rotate %2 by %c17_i32 dim 1 : vector<8x768xf32>, i32 -> vector<8x768xf32>
    %c1_i32 = arith.constant 1 : i32
    %7 = tpu.dynamic_rotate %2 by %c1_i32 dim 1 : vector<8x768xf32>, i32 -> vector<8x768xf32>
    %c767_i32 = arith.constant 767 : i32
    %8 = tpu.dynamic_rotate %2 by %c767_i32 dim 1 : vector<8x768xf32>, i32 -> vector<8x768xf32>
    %c751_i32 = arith.constant 751 : i32
    %9 = tpu.dynamic_rotate %2 by %c751_i32 dim 1 : vector<8x768xf32>, i32 -> vector<8x768xf32>
    %c750_i32 = arith.constant 750 : i32
    %10 = tpu.dynamic_rotate %2 by %c750_i32 dim 1 : vector<8x768xf32>, i32 -> vector<8x768xf32>
    %c749_i32 = arith.constant 749 : i32
    %11 = tpu.dynamic_rotate %2 by %c749_i32 dim 1 : vector<8x768xf32>, i32 -> vector<8x768xf32>
    %12 = tpu.concatenate %4, %5, %6, %7, %2, %8, %9, %10, %11 in 0 : vector<8x768xf32>, vector<8x768xf32>, vector<8x768xf32>, vector<8x768xf32>, vector<8x768xf32>, vector<8x768xf32>, vector<8x768xf32>, vector<8x768xf32>, vector<8x768xf32> -> vector<72x768xf32>
    %c0_6 = arith.constant 0 : index
    %c0_7 = arith.constant 0 : index
    %13 = vector.load %arg3[%c0_6, %c0_7] : memref<40x72xf32, #tpu.memory_space<vmem>>, vector<40x72xf32>
    %cst = arith.constant dense<0.000000e+00> : vector<40x768xf32>
    %14 = tpu.matmul %13, %12, %cst {dimension_numbers = #tpu.dot_dimension_numbers<[1], [0], [0], [1], [0, 0, 1, 1], [], []>} : vector<40x72xf32>, vector<72x768xf32>, vector<40x768xf32> -> vector<40x768xf32>
    %15 = vector.extract_strided_slice %3 {offsets = [0, 0], sizes = [40, 1], strides = [1, 1]} : vector<48x1xf32> to vector<40x1xf32>
    %16 = vector.broadcast %15 : vector<40x1xf32> to vector<40x768xf32>
    %17 = arith.addf %14, %16 : vector<40x768xf32>
    %cst_8 = arith.constant 0.000000e+00 : f32
    %18 = vector.broadcast %cst_8 : f32 to vector<40x768xf32>
    %19 = arith.maximumf %17, %18 : vector<40x768xf32>
    %20 = vector.broadcast %0 : vector<1x768xf32> to vector<40x768xf32>
    %21 = arith.mulf %19, %20 : vector<40x768xf32>
    %22 = vector.extract_strided_slice %21 {offsets = [0, 0], sizes = [8, 768], strides = [1, 1]} : vector<40x768xf32> to vector<8x768xf32>
    %c19_i32_9 = arith.constant 19 : i32
    %23 = tpu.dynamic_rotate %22 by %c19_i32_9 dim 1 : vector<8x768xf32>, i32 -> vector<8x768xf32>
    %c18_i32_10 = arith.constant 18 : i32
    %24 = tpu.dynamic_rotate %22 by %c18_i32_10 dim 1 : vector<8x768xf32>, i32 -> vector<8x768xf32>
    %c17_i32_11 = arith.constant 17 : i32
    %25 = tpu.dynamic_rotate %22 by %c17_i32_11 dim 1 : vector<8x768xf32>, i32 -> vector<8x768xf32>
    %c1_i32_12 = arith.constant 1 : i32
    %26 = tpu.dynamic_rotate %22 by %c1_i32_12 dim 1 : vector<8x768xf32>, i32 -> vector<8x768xf32>
    %c767_i32_13 = arith.constant 767 : i32
    %27 = tpu.dynamic_rotate %22 by %c767_i32_13 dim 1 : vector<8x768xf32>, i32 -> vector<8x768xf32>
    %c751_i32_14 = arith.constant 751 : i32
    %28 = tpu.dynamic_rotate %22 by %c751_i32_14 dim 1 : vector<8x768xf32>, i32 -> vector<8x768xf32>
    %c750_i32_15 = arith.constant 750 : i32
    %29 = tpu.dynamic_rotate %22 by %c750_i32_15 dim 1 : vector<8x768xf32>, i32 -> vector<8x768xf32>
    %c749_i32_16 = arith.constant 749 : i32
    %30 = tpu.dynamic_rotate %22 by %c749_i32_16 dim 1 : vector<8x768xf32>, i32 -> vector<8x768xf32>
    %31 = vector.extract_strided_slice %21 {offsets = [8, 0], sizes = [32, 768], strides = [1, 1]} : vector<40x768xf32> to vector<32x768xf32>
    %c19_i32_17 = arith.constant 19 : i32
    %32 = tpu.dynamic_rotate %31 by %c19_i32_17 dim 1 : vector<32x768xf32>, i32 -> vector<32x768xf32>
    %c18_i32_18 = arith.constant 18 : i32
    %33 = tpu.dynamic_rotate %31 by %c18_i32_18 dim 1 : vector<32x768xf32>, i32 -> vector<32x768xf32>
    %c17_i32_19 = arith.constant 17 : i32
    %34 = tpu.dynamic_rotate %31 by %c17_i32_19 dim 1 : vector<32x768xf32>, i32 -> vector<32x768xf32>
    %c1_i32_20 = arith.constant 1 : i32
    %35 = tpu.dynamic_rotate %31 by %c1_i32_20 dim 1 : vector<32x768xf32>, i32 -> vector<32x768xf32>
    %c767_i32_21 = arith.constant 767 : i32
    %36 = tpu.dynamic_rotate %31 by %c767_i32_21 dim 1 : vector<32x768xf32>, i32 -> vector<32x768xf32>
    %c751_i32_22 = arith.constant 751 : i32
    %37 = tpu.dynamic_rotate %31 by %c751_i32_22 dim 1 : vector<32x768xf32>, i32 -> vector<32x768xf32>
    %c750_i32_23 = arith.constant 750 : i32
    %38 = tpu.dynamic_rotate %31 by %c750_i32_23 dim 1 : vector<32x768xf32>, i32 -> vector<32x768xf32>
    %c749_i32_24 = arith.constant 749 : i32
    %39 = tpu.dynamic_rotate %31 by %c749_i32_24 dim 1 : vector<32x768xf32>, i32 -> vector<32x768xf32>
    %40 = tpu.concatenate %23, %24, %25, %26, %22, %27, %28, %29, %30, %32, %33, %34, %35, %31, %36, %37 in 0 : vector<8x768xf32>, vector<8x768xf32>, vector<8x768xf32>, vector<8x768xf32>, vector<8x768xf32>, vector<8x768xf32>, vector<8x768xf32>, vector<8x768xf32>, vector<8x768xf32>, vector<32x768xf32>, vector<32x768xf32>, vector<32x768xf32>, vector<32x768xf32>, vector<32x768xf32>, vector<32x768xf32>, vector<32x768xf32> -> vector<296x768xf32>
    %41 = tpu.concatenate %38, %39 in 0 : vector<32x768xf32>, vector<32x768xf32> -> vector<64x768xf32>
    %42 = tpu.concatenate %40, %41 in 0 : vector<296x768xf32>, vector<64x768xf32> -> vector<360x768xf32>
    %c0_25 = arith.constant 0 : index
    %c0_26 = arith.constant 0 : index
    %43 = vector.load %arg4[%c0_25, %c0_26] : memref<8x360xf32, #tpu.memory_space<vmem>>, vector<8x360xf32>
    %cst_27 = arith.constant dense<0.000000e+00> : vector<8x768xf32>
    %44 = tpu.matmul %43, %42, %cst_27 {dimension_numbers = #tpu.dot_dimension_numbers<[1], [0], [0], [1], [0, 0, 1, 1], [], []>} : vector<8x360xf32>, vector<360x768xf32>, vector<8x768xf32> -> vector<8x768xf32>
    %45 = arith.addf %2, %44 : vector<8x768xf32>
    %46 = vector.extract_strided_slice %3 {offsets = [40, 0], sizes = [8, 1], strides = [1, 1]} : vector<48x1xf32> to vector<8x1xf32>
    %47 = vector.broadcast %46 : vector<8x1xf32> to vector<8x768xf32>
    %48 = arith.addf %45, %47 : vector<8x768xf32>
    %cst_28 = arith.constant 0.000000e+00 : f32
    %49 = vector.broadcast %cst_28 : f32 to vector<8x768xf32>
    %50 = arith.maximumf %48, %49 : vector<8x768xf32>
    %c0_29 = arith.constant 0 : index
    %c0_30 = arith.constant 0 : index
    %c0_31 = arith.constant 0 : index
    %51 = vector.load %arg6[%c0_29, %c0_30, %c0_31] : memref<1x8x768xf32, #tpu.memory_space<vmem>>, vector<1x8x768xf32>
    %52 = vector.shape_cast %51 : vector<1x8x768xf32> to vector<8x768xf32>
    %53 = vector.shape_cast %50 : vector<8x768xf32> to vector<1x8x768xf32>
    tpu.vector_store %arg6[%c0_29, %c0_30, %c0_31], %53 {strides = array<i32>} : memref<1x8x768xf32, #tpu.memory_space<vmem>>, vector<1x8x768xf32>,
    return
  }
  func.func @transform_0(%arg0: i32) -> (i32, i32) {
    %c0_i32 = arith.constant 0 : i32
    %c0_i32_0 = arith.constant 0 : i32
    %c0_i32_1 = arith.constant 0 : i32
    return %c0_i32, %c0_i32_0 : i32, i32
  }
  func.func @transform_1(%arg0: i32) -> (i32, i32, i32) {
    %c0_i32 = arith.constant 0 : i32
    %c0_i32_0 = arith.constant 0 : i32
    %c0_i32_1 = arith.constant 0 : i32
    return %arg0, %c0_i32, %c0_i32_0 : i32, i32, i32
  }
  func.func @transform_2(%arg0: i32) -> (i32, i32) {
    %c0_i32 = arith.constant 0 : i32
    %c0_i32_0 = arith.constant 0 : i32
    %c0_i32_1 = arith.constant 0 : i32
    return %c0_i32, %c0_i32_0 : i32, i32
  }
  func.func @transform_3(%arg0: i32) -> (i32, i32) {
    %c0_i32 = arith.constant 0 : i32
    %c0_i32_0 = arith.constant 0 : i32
    %c0_i32_1 = arith.constant 0 : i32
    return %c0_i32, %c0_i32_0 : i32, i32
  }
  func.func @transform_4(%arg0: i32) -> (i32, i32) {
    %c0_i32 = arith.constant 0 : i32
    %c0_i32_0 = arith.constant 0 : i32
    %c0_i32_1 = arith.constant 0 : i32
    return %c0_i32, %c0_i32_0 : i32, i32
  }
  func.func @transform_5(%arg0: i32) -> (i32, i32, i32) {
    %c0_i32 = arith.constant 0 : i32
    %c0_i32_0 = arith.constant 0 : i32
    %c0_i32_1 = arith.constant 0 : i32
    return %arg0, %c0_i32, %c0_i32_0 : i32, i32, i32
  }
}

</mosaic_0001>

<bundles_post_ra>
// kernel: tpu_custom_call.1
= control target key start
LH: loop header
LB: loop body
LE: loop exit
PB: predicated region body
PF: predicated region fallthrough
CT: control target
= control target key end

     0   :  { %10 = vsyncpa [#allocation3], 0  ;;  %s5421_s0 = inlined_call_operand.hbm [shape: f32[1,768], index: 0, kind: input, shape index: {}]   ;;  %s5422_s1 = inlined_call_operand.vmem [shape: f32[1,8,768], index: 1, kind: input, shape index: {}]   ;;  %s5423_s2 = inlined_call_operand.hbm [shape: f32[40,72], index: 2, kind: input, shape index: {}]   ;;  %s5424_s3 = inlined_call_operand.hbm [shape: f32[8,360], index: 3, kind: input, shape index: {}]   ;;  %s5425_s4 = inlined_call_operand.vmem [shape: f32[48,1], index: 4, kind: input, shape index: {}]   ;;  %s5426_s5 = inlined_call_operand.hbm [shape: f32[1,8,768], index: 5, kind: output, shape index: {}]  }
   0x1   :  { %11 = vsyncpa [#allocation6], 0  ;;  %s30_s20 = sshll.u32 %s5423_s2, 4  ;;  %s31_s20 = int_to_ptr.hbm [resolvable:$true] %s30_s20 }
   0x2   :  { %12 = vsyncpa [#allocation4], 0  ;;  %s2553_s21 = smov [#allocation5]   ;;  %s18_s25 = sshll.u32 %s5421_s0, 4  ;;  %s19_s25 = int_to_ptr.hbm [resolvable:$true] %s18_s25 }
   0x3   :  { %s32_s22 = sshll.u32 %s2553_s21, 4  ;;  %s2554_s26 = smov 128   ;;  %s33_s22 = int_to_ptr.vmem [resolvable:$true] %s32_s22 }
   0x4   :  { %s2555_s27 = smov 8   ;;  %s2556_s28 = smov [#allocation2]  }
   0x5   :  { %38 = dma.hbm_to_vmem [thread:$0]  %s31_s20, 640, %s33_s22, [#allocation6], %s2554_s26, %s2554_s26, %s2555_s27  }
   0x6   :  { %s20_s29 = sshll.u32 %s2556_s28, 4  ;;  %s44_s7 = sshll.u32 %s5424_s3, 4  ;;  %s21_s29 = int_to_ptr.vmem [resolvable:$true] %s20_s29  ;;  %s45_s7 = int_to_ptr.hbm [resolvable:$true] %s44_s7 }
   0x7   :  { %23 = dma.hbm_to_vmem [thread:$0]  %s19_s25, 96, %s21_s29, [#allocation3]  }
   0x8   :  { %s2557_s2 = smov [#allocation7]  }
   0x9   :  { %s46_s8 = sshll.u32 %s2557_s2, 4  ;;  %s47_s8 = int_to_ptr.vmem [resolvable:$true] %s46_s8 }
   0xa   :  { %49 = dma.hbm_to_vmem [thread:$0]  %s45_s7, 384, %s47_s8, [#allocation6]  }
   0xb   :  { %2547 = dma.done.wait [#allocation3], 96  }
   0xc   :  { %2548 = vsyncadd [#allocation3], 4294967200 }
   0xd   :  { %2549 = dma.done.wait [#allocation6], 1024  }
   0xe   :  { %2550 = vsyncadd [#allocation6], 4294966272  ;;  %v2610_v0 = vld [vmem:[%s5422_s1 + $0x20] sm:$0xff]  ;;  %v2615_v1 = vld [vmem:[%s5422_s1 + $0x28] sm:$0xff]  ;;  %s2558_s19 = smov 19   ;;  %s2559_s20 = smov 18   ;;  %v89_v30 = vlaneseq }
   0xf   :  { %v2620_v2 = vld [vmem:[%s5422_s1] sm:$0xff]  ;;  %v1737_v3 = vpack.i.bf16 %v2615_v1, %v2610_v0  ;;  %v2627_v4 = vld [vmem:[%s5422_s1 + $0x8] sm:$0xff]  ;;  %v2632_v5 = vld [vmem:[%s5422_s1 + $0x10] sm:$0xff]  ;;  %s2560_s21 = smov 17   ;;  %s2561_s22 = smov 1   ;;  %v2566_v48 = vmov 0  }
  0x10   :  { %v2637_v6 = vld [vmem:[%s5422_s1 + $0x18] sm:$0xff]  ;;  %v1727_v7 = vpack.i.bf16 %v2627_v4, %v2620_v2  ;;  %s2562_s23 = smov 127   ;;  %s2563_s24 = smov 111   ;;  %v2707_v32 = vand.u32 127, %v89_v30  ;;  %1847 = vset.pattern.permute.xlu0 %v2566_v48  ;;  %1848 = vset.pattern.permute.xlu1 %v2566_v48  ;;  %vm261_vm8 = vcmask 588800   ;;  %vm1265_vm9 = vcmask 850944  }
  0x11   :  { %v1747_v8 = vpack.i.bf16 %v2637_v6, %v2632_v5  ;;  %1738 = vrot.lane.b32.xlu1 %v1737_v3, %s2558_s19  ;;  %s2564_s25 = smov 110   ;;  %s2565_s26 = smov 109   ;;  %1849 = vset.pattern.permute.xlu2 %v2566_v48 }
  0x12   :  { %1728 = vrot.lane.b32.xlu0 %v1727_v7, %s2558_s19  ;;  %vm205_vm0 = vcmp.lt.s32.totalorder %v2707_v32, 110  ;;  %vm186_vm1 = vcmp.lt.s32.totalorder %v2707_v32, 111  ;;  %vm224_vm2 = vcmp.lt.s32.totalorder %v2707_v32, 109  ;;  %vm167_vm3 = vcmp.lt.s32.totalorder %v2707_v32, 127 }
  0x13   :  { %1748 = vrot.lane.b32.xlu2 %v1747_v8, %s2559_s20  ;;  %vm148_vm4 = vcmp.lt.s32.totalorder %v2707_v32, 1  ;;  %vm110_vm5 = vcmp.lt.s32.totalorder %v2707_v32, 18  ;;  %vm129_vm6 = vcmp.lt.s32.totalorder %v2707_v32, 17  ;;  %vm91_vm7 = vcmp.lt.s32.totalorder %v2707_v32, 19 }
  0x19   :  { %1743 = vrot.lane.b32.xlu1 %v1727_v7, %s2559_s20 }
  0x1a   :  { %1733 = vrot.lane.b32.xlu0 %v1747_v8, %s2558_s19 }
  0x1b   :  { %1753 = vrot.lane.b32.xlu2 %v1737_v3, %s2559_s20 }
  0x21   :  { %1763 = vrot.lane.b32.xlu1 %v1747_v8, %s2560_s21 }
  0x22   :  { %1758 = vrot.lane.b32.xlu0 %v1727_v7, %s2560_s21 }
  0x23   :  { %1768 = vrot.lane.b32.xlu2 %v1737_v3, %s2560_s21 }
  0x29   :  { %1778 = vrot.lane.b32.xlu1 %v1747_v8, %s2561_s22 }
  0x2a   :  { %1773 = vrot.lane.b32.xlu0 %v1727_v7, %s2561_s22 }
  0x2b   :  { %1783 = vrot.lane.b32.xlu2 %v1737_v3, %s2561_s22 }
  0x31   :  { %1793 = vrot.lane.b32.xlu1 %v1747_v8, %s2562_s23 }
  0x32   :  { %1788 = vrot.lane.b32.xlu0 %v1727_v7, %s2562_s23 }
  0x33   :  { %1798 = vrot.lane.b32.xlu2 %v1737_v3, %s2562_s23 }
  0x39   :  { %1808 = vrot.lane.b32.xlu1 %v1747_v8, %s2563_s24 }
  0x3a   :  { %1803 = vrot.lane.b32.xlu0 %v1727_v7, %s2563_s24 }
  0x3b   :  { %1813 = vrot.lane.b32.xlu2 %v1737_v3, %s2563_s24 }
  0x41   :  { %1823 = vrot.lane.b32.xlu1 %v1747_v8, %s2564_s25 }
  0x42   :  { %1818 = vrot.lane.b32.xlu0 %v1727_v7, %s2564_s25 }
  0x43   :  { %1828 = vrot.lane.b32.xlu2 %v1737_v3, %s2564_s25 }
  0x49   :  { %1838 = vrot.lane.b32.xlu1 %v1747_v8, %s2565_s26 }
  0x4a   :  { %1833 = vrot.lane.b32.xlu0 %v1727_v7, %s2565_s26 }
  0x4b   :  { %1843 = vrot.lane.b32.xlu2 %v1737_v3, %s2565_s26 }
  0x6d   :  { %v2667_v9 = vpop.permute.xlu2 %1748 }
  0x75   :  { %v2669_v10 = vpop.permute.xlu2 %1753 }
  0x7d   :  { %v2675_v13 = vpop.permute.xlu2 %1768 }
  0x83   :  { %v2671_v11 = vpop.permute.xlu1 %1738 }
  0x84   :  { %v2673_v12 = vpop.permute.xlu0 %1728 }
  0x85   :  { %v2681_v16 = vpop.permute.xlu2 %1783 }
  0x8b   :  { %v2677_v14 = vpop.permute.xlu1 %1743 }
  0x8c   :  { %v2679_v15 = vpop.permute.xlu0 %1733 }
  0x8d   :  { %v2687_v19 = vpop.permute.xlu2 %1798 }
  0x8e   :  { %v1800_v33 = vunpack.i.l.bf16 %v2687_v19 }
  0x93   :  { %v2683_v17 = vpop.permute.xlu1 %1763 }
  0x94   :  { %v2685_v18 = vpop.permute.xlu0 %1758 }
  0x95   :  { %v2695_v23 = vpop.permute.xlu2 %1813  ;;  %v1761_v48 = vunpack.i.h.bf16 %v2685_v18 }
  0x96   :  { %v1815_v34 = vunpack.i.l.bf16 %v2695_v23 }
  0x9b   :  { %v2689_v20 = vpop.permute.xlu1 %1778 }
  0x9c   :  { %v2691_v21 = vpop.permute.xlu0 %1773  ;;  %v1781_v8 = vunpack.i.h.bf16 %v2689_v20 }
  0x9d   :  { %v2701_v27 = vpop.permute.xlu2 %1828  ;;  %v1776_v30 = vunpack.i.h.bf16 %v2691_v21 }
  0x9e   :  { %v1830_v37 = vunpack.i.l.bf16 %v2701_v27 }
  0xa3   :  { %v2693_v22 = vpop.permute.xlu1 %1793 }
  0xa4   :  { %v2697_v24 = vpop.permute.xlu0 %1788  ;;  %v1796_v57 = vunpack.i.h.bf16 %v2693_v22  ;;  %v1795_v58 = vunpack.i.l.bf16 %v2693_v22 }
  0xa5   :  { %v2705_v31 = vpop.permute.xlu2 %1843  ;;  %v1791_v61 = vunpack.i.h.bf16 %v2697_v24  ;;  %v1790_v22 = vunpack.i.l.bf16 %v2697_v24  ;;  %v1755_v24 = vunpack.i.l.bf16 %v2669_v10 }
  0xa6   :  { %v1845_v35 = vunpack.i.l.bf16 %v2705_v31 }
  0xab   :  { %v1809_v25 = vpop.permute.xlu1 %1808 }
  0xac   :  { %v2699_v26 = vpop.permute.xlu0 %1803  ;;  %v1811_v36 = vunpack.i.h.bf16 %v1809_v25  ;;  %v1810_v49 = vunpack.i.l.bf16 %v1809_v25 }
  0xad   :  { %v1806_v50 = vunpack.i.h.bf16 %v2699_v26  ;;  %v1805_v53 = vunpack.i.l.bf16 %v2699_v26  ;;  %v1770_v26 = vunpack.i.l.bf16 %v2675_v13 }
  0xae   :  { %v189_v3 = vsel %vm186_vm1, %v1810_v49, %v1811_v36  ;;  %v188_v7 = vsel %vm186_vm1, %v1811_v36, %v1815_v34  ;;  %v170_v36 = vsel %vm167_vm3, %v1795_v58, %v1796_v57 }
  0xaf   :  { %v191_v63 = vsel %vm186_vm1, %v1805_v53, %v1806_v50  ;;  %v190_v25 = vsel %vm186_vm1, %v1806_v50, %v1810_v49  ;;  %v1771_v49 = vunpack.i.h.bf16 %v2675_v13  ;;  %v1760_v50 = vunpack.i.l.bf16 %v2685_v18  ;;  %v73_v13 = vld [vmem:[%s5425_s4 + $0x10] sm:$0xff] }
  0xb0   :  { %v1745_v18 = vunpack.i.l.bf16 %v2677_v14  ;;  %248 = vperm.xlu2 %1849, %v73_v13  }
  0xb3   :  { %v1824_v28 = vpop.permute.xlu1 %1823 }
  0xb4   :  { %v2703_v29 = vpop.permute.xlu0 %1818  ;;  %v1826_v38 = vunpack.i.h.bf16 %v1824_v28  ;;  %v1825_v40 = vunpack.i.l.bf16 %v1824_v28  ;;  %v1780_v28 = vunpack.i.l.bf16 %v2689_v20  ;;  %v1740_v20 = vunpack.i.l.bf16 %v2671_v11 }
  0xb5   :  { %v1821_v44 = vunpack.i.h.bf16 %v2703_v29  ;;  %v1820_v45 = vunpack.i.l.bf16 %v2703_v29  ;;  %v232_v29 = vld [vmem:[#allocation5 + $0x8] sm:$0xff] }
  0xb6   :  { %v208_v59 = vsel %vm205_vm0, %v1825_v40, %v1826_v38  ;;  %v207_v60 = vsel %vm205_vm0, %v1826_v38, %v1830_v37  ;;  %v169_v38 = vsel %vm167_vm3, %v1796_v57, %v1800_v33 }
  0xb7   :  { %v210_v56 = vsel %vm205_vm0, %v1820_v45, %v1821_v44  ;;  %v209_v62 = vsel %vm205_vm0, %v1821_v44, %v1825_v40  ;;  %v1775_v40 = vunpack.i.l.bf16 %v2691_v21  ;;  %v1766_v44 = vunpack.i.h.bf16 %v2683_v17 }
  0xb8   :  { %v1751_v21 = vunpack.i.h.bf16 %v2667_v9 }
  0xbb   :  { %v1839_v39 = vpop.permute.xlu1 %1838 }
  0xbc   :  { %v1841_v41 = vunpack.i.h.bf16 %v1839_v39  ;;  %v1840_v42 = vunpack.i.l.bf16 %v1839_v39  ;;  %v2716_v43 = vpop.permute.xlu0 %1833  ;;  %v1786_v39 = vunpack.i.h.bf16 %v2681_v16 }
  0xbd   :  { %v1836_v46 = vunpack.i.h.bf16 %v2716_v43  ;;  %v1835_v47 = vunpack.i.l.bf16 %v2716_v43 }
  0xbe   :  { %v227_v51 = vsel %vm224_vm2, %v1840_v42, %v1841_v41  ;;  %v226_v52 = vsel %vm224_vm2, %v1841_v41, %v1845_v35  ;;  %v172_v41 = vsel %vm167_vm3, %v1790_v22, %v1791_v61 }
  0xbf   :  { %v229_v54 = vsel %vm224_vm2, %v1835_v47, %v1836_v46  ;;  %v228_v55 = vsel %vm224_vm2, %v1836_v46, %v1840_v42  ;;  %348 = vmatpush.msra.mxu2 %v227_v51  ;;  %380 = vmatpush.msra.mxu3 %v226_v52  ;;  %v171_v42 = vsel %vm167_vm3, %v1791_v61, %v1795_v58  ;;  %v1765_v46 = vunpack.i.l.bf16 %v2683_v17 }
  0xc0   :  { %284 = vmatpush.msra.mxu0 %v229_v54  ;;  %316 = vmatpush.msra.mxu1 %v228_v55  ;;  %v1750_v51 = vunpack.i.l.bf16 %v2667_v9  ;;  %v1746_v52 = vunpack.i.h.bf16 %v2677_v14  ;;  %v152_v54 = vsel %vm148_vm4, %v1776_v30, %v1780_v28  ;;  %v154_v55 = vsel %vm148_vm4, %v1786_v39, %v1775_v40 }
  0xc1   :  { %349 = vmatpush.msra.mxu2 %v208_v59  ;;  %381 = vmatpush.msra.mxu3 %v207_v60  ;;  %v133_v57 = vsel %vm129_vm6, %v1761_v48, %v1765_v46  ;;  %v132_v14 = vsel %vm129_vm6, %v1765_v46, %v1766_v44  ;;  %v1741_v58 = vunpack.i.h.bf16 %v2671_v11  ;;  %v1730_v59 = vunpack.i.l.bf16 %v2673_v12  ;;  %v72_v46 = vld [vmem:[%s5425_s4 + $0x8] sm:$0xff]  ;;  %v75_v11 = vld [vmem:[%s5425_s4 + $0x20] sm:$0xff] }
  0xc2   :  { %285 = vmatpush.msra.mxu0 %v210_v56  ;;  %317 = vmatpush.msra.mxu1 %v209_v62  ;;  %v1735_v56 = vunpack.i.l.bf16 %v2679_v15  ;;  %v135_v60 = vsel %vm129_vm6, %v1771_v49, %v1760_v50  ;;  %v134_v61 = vsel %vm129_vm6, %v1760_v50, %v1761_v48  ;;  %v1736_v62 = vunpack.i.h.bf16 %v2679_v15  ;;  %v235_v15 = vld [vmem:[#allocation5 + $0x20] sm:$0xff] }
  0xc3   :  { %350 = vmatpush.msra.mxu2 %v189_v3  ;;  %382 = vmatpush.msra.mxu3 %v188_v7  ;;  %v115_v7 = vsel %vm110_vm5, %v1745_v18, %v1746_v52  ;;  %v1816_v48 = vunpack.i.h.bf16 %v2695_v23 }
  0xc4   :  { %286 = vmatpush.msra.mxu0 %v191_v63  ;;  %318 = vmatpush.msra.mxu1 %v190_v25  ;;  %v114_v63 = vsel %vm110_vm5, %v1746_v52, %v1750_v51  ;;  %v1846_v25 = vunpack.i.h.bf16 %v2705_v31  ;;  %v1801_v52 = vunpack.i.h.bf16 %v2687_v19  ;;  %v74_v19 = vld [vmem:[%s5425_s4 + $0x18] sm:$0xff]  ;;  %v93_v9 = vsel %vm91_vm7, %v1736_v62, %v1740_v20 }
  0xc5   :  { %351 = vmatpush.msra.mxu2 %v170_v36  ;;  %383 = vmatpush.msra.mxu3 %v169_v38  ;;  %v2848_v36 = vld [vmem:[#allocation5] sm:$0xff]  ;;  %v97_v38 = vsel %vm91_vm7, %v1741_v58, %v1730_v59 }
  0xc6   :  { %287 = vmatpush.msra.mxu0 %v172_v41  ;;  %319 = vmatpush.msra.mxu1 %v171_v42  ;;  %v1831_v41 = vunpack.i.h.bf16 %v2701_v27  ;;  %v71_v42 = vld [vmem:[%s5425_s4] sm:$0xff]  ;;  %v225_v50 = vsel %vm224_vm2, %v1845_v35, %v1846_v25  ;;  %v187_v35 = vsel %vm186_vm1, %v1815_v34, %v1816_v48  ;;  %v192_v27 = vsel %vm186_vm1, %v1816_v48, %v1805_v53 }
  0xc7   :  { %352 = vmatpush.msra.mxu2 %v2632_v5  ;;  %384 = vmatpush.msra.mxu3 %v2637_v6  ;;  %v151_v5 = vsel %vm148_vm4, %v1780_v28, %v1781_v8  ;;  %v1756_v6 = vunpack.i.h.bf16 %v2669_v10  ;;  %v173_v23 = vsel %vm167_vm3, %v1801_v52, %v1790_v22  ;;  %v1785_v34 = vunpack.i.l.bf16 %v2681_v16  ;;  %v233_v16 = vld [vmem:[#allocation5 + $0x10] sm:$0xff] }
  0xc8   :  { %288 = vmatpush.msra.mxu0 %v2620_v2  ;;  %320 = vmatpush.msra.mxu1 %v2627_v4  ;;  %v153_v2 = vsel %vm148_vm4, %v1775_v40, %v1776_v30  ;;  %v1731_v4 = vunpack.i.h.bf16 %v2673_v12  ;;  %v113_v12 = vsel %vm110_vm5, %v1750_v51, %v1751_v21  ;;  %v94_v30 = vsel %vm91_vm7, %v1735_v56, %v1736_v62 }
  0xc9   :  { %353 = vmatpush.msra.mxu2 %v152_v54  ;;  %385 = vmatpush.msra.mxu3 %v151_v5  ;;  %v116_v3 = vsel %vm110_vm5, %v1756_v6, %v1745_v18  ;;  %v230_v51 = vsel %vm224_vm2, %v1846_v25, %v1835_v47  ;;  %v206_v54 = vsel %vm205_vm0, %v1830_v37, %v1831_v41  ;;  %v234_v47 = vld [vmem:[#allocation5 + $0x18] sm:$0xff] }
  0xca   :  { %289 = vmatpush.msra.mxu0 %v154_v55  ;;  %321 = vmatpush.msra.mxu1 %v153_v2  ;;  %v95_v28 = vsel %vm91_vm7, %v1731_v4, %v1735_v56  ;;  %v96_v40 = vsel %vm91_vm7, %v1730_v59, %v1731_v4  ;;  %v211_v31 = vsel %vm205_vm0, %v1831_v41, %v1820_v45 }
  0xcb   :  { %354 = vmatpush.msra.mxu2 %v133_v57  ;;  %386 = vmatpush.msra.mxu3 %v132_v14  ;;  %v168_v37 = vsel %vm167_vm3, %v1800_v33, %v1801_v52  ;;  %v150_v33 = vsel %vm148_vm4, %v1781_v8, %v1785_v34  ;;  %v149_v43 = vsel %vm148_vm4, %v1785_v34, %v1786_v39  ;;  %v2982_v8 = vld [vmem:[#allocation2] sm:$0x3f] }
  0xcc   :  { %290 = vmatpush.msra.mxu0 %v135_v60  ;;  %322 = vmatpush.msra.mxu1 %v134_v61  ;;  %v112_v45 = vsel %vm110_vm5, %v1751_v21, %v1755_v24  ;;  %v111_v17 = vsel %vm110_vm5, %v1755_v24, %v1756_v6  ;;  %v92_v10 = vsel %vm91_vm7, %v1740_v20, %v1741_v58  ;;  %v2986_v21 = vperm.slane %v2982_v8, 0 }
  0xcd   :  { %355 = vmatpush.msra.mxu2 %v114_v63  ;;  %387 = vmatpush.msra.mxu3 %v113_v12  ;;  %v2990_v5 = vperm.slane %v2982_v8, 1  ;;  %v3006_v59 = vperm.slane %v2982_v8, 2  ;;  %v3010_v61 = vperm.slane %v2982_v8, 3 }
  0xce   :  { %291 = vmatpush.msra.mxu0 %v116_v3  ;;  %323 = vmatpush.msra.mxu1 %v115_v7 }
  0xcf   :  { %356 = vmatpush.msra.mxu2 %v95_v28  ;;  %388 = vmatpush.msra.mxu3 %v94_v30 }
  0xd0   :  { %292 = vmatpush.msra.mxu0 %v97_v38  ;;  %324 = vmatpush.msra.mxu1 %v96_v40 }
  0xd1   :  { %1676 = vmatmul.msk.f32.vlgmr.msra.gmra.mxu0 %vm261_vm8, %v2848_v36  ;;  %1681 = vmatmul.msk.f32.vlgmr.msra.gmra.mxu1 %vm261_vm8, %v2848_v36 }
  0xd2   :  { %1686 = vmatmul.msk.f32.vlgmr.msra.gmra.mxu2 %vm261_vm8, %v2848_v36  ;;  %1691 = vmatmul.msk.f32.vlgmr.msra.gmra.mxu3 %vm261_vm8, %v2848_v36 }
  0xd3   :  { %412 = vmatpush.msrb.mxu0 %v225_v50  ;;  %444 = vmatpush.msrb.mxu1 %v230_v51 }
  0xd4   :  { %238 = vperm.xlu0 %1847, %v71_v42   ;;  %243 = vperm.xlu1 %1848, %v72_v46  }
  0xd5   :  { %413 = vmatpush.msrb.mxu0 %v206_v54  ;;  %445 = vmatpush.msrb.mxu1 %v211_v31 }
  0xd6   :  { %258 = vperm.xlu2 %1849, %v75_v11  }
  0xd7   :  { %414 = vmatpush.msrb.mxu0 %v187_v35  ;;  %446 = vmatpush.msrb.mxu1 %v192_v27 }
  0xd9   :  { %415 = vmatpush.msrb.mxu0 %v168_v37  ;;  %447 = vmatpush.msrb.mxu1 %v173_v23 }
  0xda   :  { %1677 = vmatmul.msk.f32.gmra.mxu0 %vm261_vm8, %v232_v29  ;;  %1682 = vmatmul.msk.f32.gmra.mxu1 %vm261_vm8, %v232_v29 }
  0xdb   :  { %1687 = vmatmul.msk.f32.gmra.mxu2 %vm261_vm8, %v232_v29  ;;  %1692 = vmatmul.msk.f32.gmra.mxu3 %vm261_vm8, %v232_v29 }
  0xdc   :  { %416 = vmatpush.msrb.mxu0 %v2610_v0  ;;  %448 = vmatpush.msrb.mxu1 %v2615_v1  ;;  %v131_v0 = vsel %vm129_vm6, %v1766_v44, %v1770_v26  ;;  %v130_v1 = vsel %vm129_vm6, %v1770_v26, %v1771_v49 }
  0xdd   :  { %253 = vperm.xlu1 %1848, %v74_v19  }
  0xde   :  { %417 = vmatpush.msrb.mxu0 %v150_v33  ;;  %449 = vmatpush.msrb.mxu1 %v149_v43 }
  0xe0   :  { %418 = vmatpush.msrb.mxu0 %v131_v0  ;;  %450 = vmatpush.msrb.mxu1 %v130_v1 }
  0xe2   :  { %419 = vmatpush.msrb.mxu0 %v112_v45  ;;  %451 = vmatpush.msrb.mxu1 %v111_v17 }
  0xe3   :  { %1678 = vmatmul.msk.f32.gmra.mxu0 %vm261_vm8, %v233_v16  ;;  %1683 = vmatmul.msk.f32.gmra.mxu1 %vm261_vm8, %v233_v16 }
  0xe4   :  { %1688 = vmatmul.msk.f32.gmra.mxu2 %vm261_vm8, %v233_v16  ;;  %1693 = vmatmul.msk.f32.gmra.mxu3 %vm261_vm8, %v233_v16 }
  0xe5   :  { %420 = vmatpush.msrb.mxu0 %v93_v9  ;;  %452 = vmatpush.msrb.mxu1 %v92_v10 }
  0xeb   :  { %1679 = vmatmul.msk.f32.gmra.mxu0 %vm261_vm8, %v234_v47  ;;  %1684 = vmatmul.msk.f32.gmra.mxu1 %vm261_vm8, %v234_v47 }
  0xec   :  { %1689 = vmatmul.msk.f32.gmra.mxu2 %vm261_vm8, %v234_v47  ;;  %1694 = vmatmul.msk.f32.gmra.mxu3 %vm261_vm8, %v234_v47 }
  0xf3   :  { %1680 = vmatmul.msk.f32.gmra.mxu0 %vm261_vm8, %v235_v15  ;;  %1685 = vmatmul.msk.f32.gmra.mxu1 %vm261_vm8, %v235_v15 }
  0xf4   :  { %1690 = vmatmul.msk.f32.gmra.mxu2 %vm261_vm8, %v235_v15  ;;  %1695 = vmatmul.msk.f32.gmra.mxu3 %vm261_vm8, %v235_v15 }
  0xfb   :  { %1696 = vmatmul.msk.f32.vlgmr.msrb.gmra.mxu0 %vm261_vm8, %v2848_v36  ;;  %1701 = vmatmul.msk.f32.vlgmr.msrb.gmra.mxu1 %vm261_vm8, %v2848_v36 }
 0x103   :  { %1697 = vmatmul.msk.f32.gmra.mxu0 %vm261_vm8, %v232_v29  ;;  %1702 = vmatmul.msk.f32.gmra.mxu1 %vm261_vm8, %v232_v29 }
 0x10a   :  { %v3032_v46 = vpop.permute.xlu2 %248 }
 0x10b   :  { %1698 = vmatmul.msk.f32.gmra.mxu0 %vm261_vm8, %v233_v16  ;;  %1703 = vmatmul.msk.f32.gmra.mxu1 %vm261_vm8, %v233_v16 }
 0x113   :  { %1699 = vmatmul.msk.f32.gmra.mxu0 %vm261_vm8, %v234_v47  ;;  %1704 = vmatmul.msk.f32.gmra.mxu1 %vm261_vm8, %v234_v47 }
 0x11b   :  { %1700 = vmatmul.msk.f32.gmra.mxu0 %vm261_vm8, %v235_v15  ;;  %1705 = vmatmul.msk.f32.gmra.mxu1 %vm261_vm8, %v235_v15 }
 0x146   :  { %v2980_v53 = vpop.permute.xlu0 %238  ;;  %v2998_v4 = vpop.permute.xlu1 %243 }
 0x14e   :  { %v294_v22 = vpop.f32.mrf.mxu0  ;;  %v326_v39 = vpop.f32.mrf.mxu1 }
 0x14f   :  { %v295_v44 = vadd.f32 %v294_v22, %v2980_v53  ;;  %v327_v49 = vadd.f32 %v326_v39, %v2980_v53  ;;  %v3089_v22 = vpop.permute.xlu1 %253 }
 0x151   :  { %v469_v6 = vmax.f32 %v295_v44, 0.0  ;;  %v470_v18 = vmax.f32 %v327_v49, 0.0 }
 0x153   :  { %v2993_v55 = vmul.f32 %v2986_v21, %v469_v6  ;;  %v2996_v2 = vmul.f32 %v2990_v5, %v470_v18  ;;  %v3097_v18 = vperm.slane %v2982_v8, 4 }
 0x155   :  { %5610 = vst [vmem:[#allocation12_spill] sm:$0xff] %v2993_v55  ;;  %v358_v56 = vpop.f32.mrf.mxu2  ;;  %v390_v57 = vpop.f32.mrf.mxu3  ;;  %v3002_v14 = vpack.i.bf16 %v2996_v2, %v2993_v55 }
 0x156   :  { %5611 = vst [vmem:[#allocation13_spill] sm:$0xff] %v2996_v2  ;;  %v359_v58 = vadd.f32 %v358_v56, %v2980_v53  ;;  %v391_v60 = vadd.f32 %v390_v57, %v2980_v53  ;;  %v3100_v56 = vperm.slane %v2982_v8, 5 }
 0x157   :  { %v297_v62 = vpop.f32.mrf.mxu0  ;;  %v329_v63 = vpop.f32.mrf.mxu1  ;;  %1851 = vrot.lane.b32.xlu0 %v3002_v14, %s2558_s19 }
 0x158   :  { %v471_v12 = vmax.f32 %v359_v58, 0.0  ;;  %v472_v3 = vmax.f32 %v391_v60, 0.0  ;;  %v298_v7 = vadd.f32 %v297_v62, %v2998_v4  ;;  %v330_v25 = vadd.f32 %v329_v63, %v2998_v4 }
 0x15a   :  { %v3017_v28 = vmul.f32 %v3006_v59, %v471_v12  ;;  %v3020_v30 = vmul.f32 %v3010_v61, %v472_v3  ;;  %v475_v36 = vmax.f32 %v298_v7, 0.0  ;;  %v476_v38 = vmax.f32 %v330_v25, 0.0 }
 0x15c   :  { %5612 = vst [vmem:[#allocation14_spill] sm:$0xff] %v3017_v28  ;;  %v3023_v40 = vmul.f32 %v2986_v21, %v475_v36  ;;  %v3026_v41 = vmul.f32 %v2990_v5, %v476_v38  ;;  %v3030_v42 = vpack.i.bf16 %v3020_v30, %v3017_v28 }
 0x15d   :  { %5613 = vst [vmem:[#allocation15_spill] sm:$0xff] %v3020_v30 }
 0x15e   :  { %5614 = vst [vmem:[#allocation16_spill] sm:$0xff] %v3023_v40  ;;  %v361_v48 = vpop.f32.mrf.mxu2  ;;  %v393_v50 = vpop.f32.mrf.mxu3  ;;  %1891 = vrot.lane.b32.xlu1 %v3030_v42, %s2558_s19  ;;  %v3038_v51 = vpack.i.bf16 %v3026_v41, %v3023_v40 }
 0x15f   :  { %5615 = vst [vmem:[#allocation17_spill] sm:$0xff] %v3026_v41  ;;  %v362_v52 = vadd.f32 %v361_v48, %v2998_v4  ;;  %v394_v54 = vadd.f32 %v393_v50, %v2998_v4  ;;  %1856 = vrot.lane.b32.xlu0 %v3002_v14, %s2559_s20  ;;  %v3117_v48 = vpop.permute.xlu2 %258 }
 0x160   :  { %v3044_v31 = vpop.f32.mrf.mxu0  ;;  %v332_v35 = vpop.f32.mrf.mxu1  ;;  %1931 = vrot.lane.b32.xlu2 %v3038_v51, %s2565_s26 }
 0x161   :  { %v477_v27 = vmax.f32 %v362_v52, 0.0  ;;  %v478_v29 = vmax.f32 %v394_v54, 0.0  ;;  %v333_v37 = vadd.f32 %v332_v35, %v3032_v46 }
 0x163   :  { %v3050_v23 = vmul.f32 %v3006_v59, %v477_v27  ;;  %v3053_v34 = vmul.f32 %v3010_v61, %v478_v29  ;;  %v482_v26 = vmax.f32 %v333_v37, 0.0 }
 0x165   :  { %5616 = vst [vmem:[#allocation18_spill] sm:$0xff] %v3050_v23  ;;  %v3056_v19 = vmul.f32 %v2990_v5, %v482_v26 }
 0x166   :  { %5617 = vst [vmem:[#allocation19_spill] sm:$0xff] %v3053_v34  ;;  %1896 = vrot.lane.b32.xlu1 %v3030_v42, %s2559_s20 }
 0x167   :  { %5618 = vst [vmem:[#allocation20_spill] sm:$0xff] %v3056_v19  ;;  %v364_v24 = vpop.f32.mrf.mxu2  ;;  %v396_v33 = vpop.f32.mrf.mxu3  ;;  %v1945_v43 = vpack.i.bf16 %v3056_v19, %v3026_v41  ;;  %1861 = vrot.lane.b32.xlu0 %v3002_v14, %s2560_s21 }
 0x168   :  { %v365_v0 = vadd.f32 %v364_v24, %v3032_v46  ;;  %v397_v1 = vadd.f32 %v396_v33, %v3032_v46  ;;  %v303_v20 = vpop.f32.mrf.mxu0  ;;  %v335_v16 = vpop.f32.mrf.mxu1 }
 0x169   :  { %1946 = vrot.lane.b32.xlu2 %v1945_v43, %s2558_s19  ;;  %v304_v57 = vadd.f32 %v303_v20, %v3089_v22  ;;  %v336_v58 = vadd.f32 %v335_v16, %v3089_v22 }
 0x16a   :  { %v483_v45 = vmax.f32 %v365_v0, 0.0  ;;  %v484_v17 = vmax.f32 %v397_v1, 0.0 }
 0x16b   :  { %v487_v3 = vmax.f32 %v304_v57, 0.0  ;;  %v488_v7 = vmax.f32 %v336_v58, 0.0 }
 0x16c   :  { %v3068_v13 = vmul.f32 %v3006_v59, %v483_v45  ;;  %v3071_v9 = vmul.f32 %v3010_v61, %v484_v17 }
 0x16d   :  { %v3120_v50 = vmul.f32 %v2986_v21, %v487_v3  ;;  %v3123_v52 = vmul.f32 %v2990_v5, %v488_v7 }
 0x16e   :  { %5619 = vst [vmem:[#allocation21_spill] sm:$0xff] %v3068_v13  ;;  %1901 = vrot.lane.b32.xlu1 %v3030_v42, %s2560_s21 }
 0x16f   :  { %5620 = vst [vmem:[#allocation22_spill] sm:$0xff] %v3071_v9  ;;  %1866 = vrot.lane.b32.xlu0 %v3002_v14, %s2561_s22  ;;  %v3137_v24 = vpack.i.bf16 %v3123_v52, %v3120_v50 }
 0x170   :  { %v306_v10 = vpop.f32.mrf.mxu0  ;;  %v338_v47 = vpop.f32.mrf.mxu1  ;;  %5623 = vst [vmem:[#allocation25_spill] sm:$0xff] %v3120_v50 }
 0x171   :  { %1956 = vrot.lane.b32.xlu2 %v1945_v43, %s2559_s20  ;;  %5624 = vst [vmem:[#allocation26_spill] sm:$0xff] %v3123_v52  ;;  %v307_v27 = vadd.f32 %v306_v10, %v3117_v48  ;;  %v339_v29 = vadd.f32 %v338_v47, %v3117_v48 }
 0x173   :  { %v493_v0 = vmax.f32 %v307_v27, 0.0  ;;  %v494_v1 = vmax.f32 %v339_v29, 0.0 }
 0x175   :  { %v3147_v45 = vmul.f32 %v2986_v21, %v493_v0  ;;  %v3150_v17 = vmul.f32 %v2990_v5, %v494_v1 }
 0x176   :  { %1906 = vrot.lane.b32.xlu1 %v3030_v42, %s2561_s22 }
 0x177   :  { %1871 = vrot.lane.b32.xlu0 %v3002_v14, %s2562_s23 }
 0x178   :  { %v3082_v15 = vpop.f32.mrf.mxu0  ;;  %v3084_v11 = vpop.f32.mrf.mxu1 }
 0x179   :  { %1966 = vrot.lane.b32.xlu2 %v1945_v43, %s2560_s21  ;;  %v423_v7 = vadd.f32 %v3082_v15, %v2980_v53 }
 0x17e   :  { %1911 = vrot.lane.b32.xlu1 %v3030_v42, %s2562_s23 }
 0x17f   :  { %1876 = vrot.lane.b32.xlu0 %v3002_v14, %s2563_s24 }
 0x180   :  { %v425_v39 = vpop.f32.mrf.mxu0  ;;  %v457_v44 = vpop.f32.mrf.mxu1 }
 0x181   :  { %v426_v49 = vadd.f32 %v425_v39, %v2998_v4  ;;  %v458_v6 = vadd.f32 %v457_v44, %v2998_v4  ;;  %1976 = vrot.lane.b32.xlu2 %v1945_v43, %s2561_s22  ;;  %v367_v4 = vpop.f32.mrf.mxu2 }
 0x183   :  { %v479_v60 = vmax.f32 %v426_v49, 0.0  ;;  %v480_v62 = vmax.f32 %v458_v6, 0.0  ;;  %v399_v49 = vpop.f32.mrf.mxu3 }
 0x185   :  { %v3105_v63 = vmul.f32 %v3097_v18, %v479_v60  ;;  %v3108_v12 = vmul.f32 %v3100_v56, %v480_v62  ;;  %v400_v60 = vadd.f32 %v399_v49, %v3089_v22 }
 0x186   :  { %1916 = vrot.lane.b32.xlu1 %v3030_v42, %s2563_s24 }
 0x187   :  { %5621 = vst [vmem:[#allocation23_spill] sm:$0xff] %v3105_v63  ;;  %1881 = vrot.lane.b32.xlu0 %v3002_v14, %s2564_s25 }
 0x188   :  { %5622 = vst [vmem:[#allocation24_spill] sm:$0xff] %v3108_v12  ;;  %v428_v8 = vpop.f32.mrf.mxu0  ;;  %v460_v25 = vpop.f32.mrf.mxu1 }
 0x189   :  { %v429_v36 = vadd.f32 %v428_v8, %v3032_v46  ;;  %v461_v38 = vadd.f32 %v460_v25, %v3032_v46  ;;  %1986 = vrot.lane.b32.xlu2 %v1945_v43, %s2562_s23  ;;  %v370_v33 = vpop.f32.mrf.mxu2  ;;  %v301_v43 = vadd.f32 %v3044_v31, %v3032_v46  ;;  %v3157_v31 = vpack.i.bf16 %v3150_v17, %v3147_v45 }
 0x18a   :  { %v371_v20 = vadd.f32 %v370_v33, %v3117_v48  ;;  %v455_v8 = vadd.f32 %v3084_v11, %v2980_v53 }
 0x18b   :  { %v485_v54 = vmax.f32 %v429_v36, 0.0  ;;  %v486_v35 = vmax.f32 %v461_v38, 0.0  ;;  %v481_v16 = vmax.f32 %v301_v43, 0.0  ;;  %v402_v6 = vpop.f32.mrf.mxu3  ;;  %v2005_v38 = vpack.i.bf16 %v3071_v9, %v3053_v34 }
 0x18c   :  { %v495_v46 = vmax.f32 %v371_v20, 0.0  ;;  %v403_v58 = vadd.f32 %v402_v6, %v3117_v48 }
 0x18d   :  { %v3128_v37 = vmul.f32 %v3097_v18, %v485_v54  ;;  %v3131_v26 = vmul.f32 %v3100_v56, %v486_v35  ;;  %v3162_v10 = vmul.f32 %v2986_v21, %v481_v16  ;;  %v473_v54 = vmax.f32 %v423_v7, 0.0 }
 0x18e   :  { %1921 = vrot.lane.b32.xlu1 %v3030_v42, %s2564_s25  ;;  %v3167_v5 = vmul.f32 %v3006_v59, %v495_v46  ;;  %v496_v62 = vmax.f32 %v403_v58, 0.0  ;;  %v474_v35 = vmax.f32 %v455_v8, 0.0 }
 0x18f   :  { %5625 = vst [vmem:[#allocation27_spill] sm:$0xff] %v3128_v37  ;;  %1886 = vrot.lane.b32.xlu0 %v3002_v14, %s2565_s26  ;;  %v368_v14 = vadd.f32 %v367_v4, %v3089_v22  ;;  %v1940_v44 = vpack.i.bf16 %v3162_v10, %v3023_v40  ;;  %v490_v4 = vmax.f32 %v400_v60, 0.0 }
 0x190   :  { %5626 = vst [vmem:[#allocation28_spill] sm:$0xff] %v3131_v26  ;;  %v3204_v3 = vmul.f32 %v3010_v61, %v496_v62  ;;  %v3231_v15 = vmul.f32 %v3100_v56, %v474_v35 }
 0x191   :  { %2061 = vrot.lane.b32.xlu2 %v3137_v24, %s2564_s25  ;;  %5627 = vst [vmem:[#allocation29_spill] sm:$0xff] %v3162_v10  ;;  %v489_v47 = vmax.f32 %v368_v14, 0.0  ;;  %v3213_v36 = vmul.f32 %v3010_v61, %v490_v4  ;;  %v3228_v61 = vmul.f32 %v3097_v18, %v473_v54  ;;  %v2065_v14 = vpack.i.bf16 %v3147_v45, %v3120_v50 }
 0x192   :  { %5628 = vst [vmem:[#allocation30_spill] sm:$0xff] %v3167_v5 }
 0x193   :  { %v3174_v39 = vmul.f32 %v3006_v59, %v489_v47  ;;  %v2000_v59 = vpack.i.bf16 %v3068_v13, %v3050_v23  ;;  %5631 = vst [vmem:[#allocation33_spill] sm:$0xff] %v3204_v3  ;;  %v3220_v27 = vpack.i.bf16 %v3213_v36, %v3204_v3  ;;  %v3239_v33 = vpack.i.bf16 %v3231_v15, %v3228_v61 }
 0x194   :  { %5632 = vst [vmem:[#allocation34_spill] sm:$0xff] %v3213_v36  ;;  %v3392_v30 = vpack.i.bf16 %v3204_v3, %v3213_v36  ;;  %v2230_v3 = vpack.i.bf16 %v3128_v37, %v3105_v63 }
 0x195   :  { %5629 = vst [vmem:[#allocation31_spill] sm:$0xff] %v3174_v39  ;;  %v2125_v21 = vpack.i.bf16 %v3167_v5, %v3174_v39 }
 0x196   :  { %1926 = vrot.lane.b32.xlu1 %v3030_v42, %s2565_s26  ;;  %v3171_v42 = vpack.i.bf16 %v3056_v19, %v3162_v10  ;;  %5634 = vst [vmem:[#allocation36_spill] sm:$0xff] %v3228_v61 }
 0x197   :  { %1936 = vrot.lane.b32.xlu0 %v3038_v51, %s2564_s25  ;;  %5635 = vst [vmem:[#allocation37_spill] sm:$0xff] %v3231_v15 }
 0x199   :  { %2116 = vrot.lane.b32.xlu2 %v3157_v31, %s2565_s26 }
 0x19e   :  { %1991 = vrot.lane.b32.xlu1 %v3171_v42, %s2565_s26 }
 0x19f   :  { %1941 = vrot.lane.b32.xlu0 %v1940_v44, %s2558_s19 }
 0x1a1   :  { %2126 = vrot.lane.b32.xlu2 %v2125_v21, %s2558_s19 }
 0x1a6   :  { %1996 = vrot.lane.b32.xlu1 %v3171_v42, %s2564_s25 }
 0x1a7   :  { %1951 = vrot.lane.b32.xlu0 %v1940_v44, %s2559_s20 }
 0x1a9   :  { %2136 = vrot.lane.b32.xlu2 %v2125_v21, %s2559_s20 }
 0x1ae   :  { %2001 = vrot.lane.b32.xlu1 %v2000_v59, %s2558_s19 }
 0x1af   :  { %1961 = vrot.lane.b32.xlu0 %v1940_v44, %s2560_s21 }
 0x1b1   :  { %2146 = vrot.lane.b32.xlu2 %v2125_v21, %s2560_s21 }
 0x1b6   :  { %2011 = vrot.lane.b32.xlu1 %v2000_v59, %s2559_s20 }
 0x1b7   :  { %1971 = vrot.lane.b32.xlu0 %v1940_v44, %s2561_s22 }
 0x1b9   :  { %2156 = vrot.lane.b32.xlu2 %v2125_v21, %s2561_s22 }
 0x1ba   :  { %v3196_v57 = vpop.permute.xlu2 %1931 }
 0x1bb   :  { %5630 = vst [vmem:[#allocation32_spill] sm:$0xff] %v3196_v57 }
 0x1be   :  { %2021 = vrot.lane.b32.xlu1 %v2000_v59, %s2560_s21 }
 0x1bf   :  { %1981 = vrot.lane.b32.xlu0 %v1940_v44, %s2562_s23 }
 0x1c1   :  { %2166 = vrot.lane.b32.xlu2 %v2125_v21, %s2562_s23 }
 0x1c3   :  { %v3210_v25 = vpop.permute.xlu2 %1946 }
 0x1c4   :  { %v1949_v55 = vunpack.i.h.bf16 %v3210_v25 }
 0x1c6   :  { %2031 = vrot.lane.b32.xlu1 %v2000_v59, %s2561_s22 }
 0x1c7   :  { %2006 = vrot.lane.b32.xlu0 %v2005_v38, %s2558_s19 }
 0x1c9   :  { %2181 = vrot.lane.b32.xlu2 %v3220_v27, %s2565_s26  ;;  %v3225_v53 = vpop.permute.xlu0 %1851 }
 0x1ca   :  { %5633 = vst [vmem:[#allocation35_spill] sm:$0xff] %v3225_v53  ;;  %v5430_v29 = vunpack.i.h.bf16 %v3225_v53 }
 0x1cb   :  { %v3233_v11 = vpop.permute.xlu2 %1956 }
 0x1ce   :  { %2041 = vrot.lane.b32.xlu1 %v2000_v59, %s2562_s23 }
 0x1cf   :  { %2016 = vrot.lane.b32.xlu0 %v2005_v38, %s2559_s20 }
 0x1d0   :  { %v3242_v43 = vpop.permute.xlu1 %1891 }
 0x1d1   :  { %5636 = vst [vmem:[#allocation38_spill] sm:$0xff] %v3242_v43  ;;  %v5427_v0 = vunpack.i.l.bf16 %v3242_v43  ;;  %2191 = vrot.lane.b32.xlu2 %v3239_v33, %s2558_s19  ;;  %v3247_v1 = vpop.permute.xlu0 %1856 }
 0x1d2   :  { %5637 = vst [vmem:[#allocation39_spill] sm:$0xff] %v3247_v1  ;;  %v5431_v47 = vunpack.i.h.bf16 %v3247_v1 }
 0x1d3   :  { %v3249_v20 = vpop.permute.xlu2 %1966  ;;  %v3257_v16 = vsel %vm91_vm7, %v5430_v29, %v5427_v0 }
 0x1d4   :  { %5638 = vst [vmem:[#allocation40_spill] sm:$0xff] %v3257_v16  ;;  %v1969_v57 = vunpack.i.h.bf16 %v3249_v20 }
 0x1d6   :  { %2066 = vrot.lane.b32.xlu1 %v2065_v14, %s2558_s19 }
 0x1d7   :  { %2026 = vrot.lane.b32.xlu0 %v2005_v38, %s2560_s21 }
 0x1d8   :  { %v3263_v46 = vpop.permute.xlu1 %1896 }
 0x1d9   :  { %5639 = vst [vmem:[#allocation41_spill] sm:$0xff] %v3263_v46  ;;  %v5428_v44 = vunpack.i.l.bf16 %v3263_v46  ;;  %2196 = vrot.lane.b32.xlu2 %v3239_v33, %s2559_s20  ;;  %v3269_v21 = vpop.permute.xlu0 %1861 }
 0x1da   :  { %5640 = vst [vmem:[#allocation42_spill] sm:$0xff] %v3269_v21  ;;  %v5432_v58 = vunpack.i.h.bf16 %v3269_v21 }
 0x1db   :  { %v3271_v59 = vpop.permute.xlu2 %1976  ;;  %v3279_v49 = vsel %vm110_vm5, %v5431_v47, %v5428_v44 }
 0x1dc   :  { %5641 = vst [vmem:[#allocation43_spill] sm:$0xff] %v3279_v49 }
 0x1de   :  { %2076 = vrot.lane.b32.xlu1 %v2065_v14, %s2559_s20 }
 0x1df   :  { %2036 = vrot.lane.b32.xlu0 %v2005_v38, %s2561_s22 }
 0x1e0   :  { %v3283_v6 = vpop.permute.xlu1 %1901 }
 0x1e1   :  { %5642 = vst [vmem:[#allocation44_spill] sm:$0xff] %v3283_v6  ;;  %v5429_v60 = vunpack.i.l.bf16 %v3283_v6  ;;  %2201 = vrot.lane.b32.xlu2 %v3239_v33, %s2560_s21  ;;  %v3289_v62 = vpop.permute.xlu0 %1866 }
 0x1e2   :  { %v5434_v54 = vunpack.i.h.bf16 %v3289_v62 }
 0x1e3   :  { %v3291_v4 = vpop.permute.xlu2 %1986  ;;  %v3299_v7 = vsel %vm129_vm6, %v5432_v58, %v5429_v60  ;;  %v3323_v60 = vpack.i.bf16 %v3050_v23, %v3068_v13 }
 0x1e4   :  { %5643 = vst [vmem:[#allocation45_spill] sm:$0xff] %v3299_v7 }
 0x1e6   :  { %2086 = vrot.lane.b32.xlu1 %v2065_v14, %s2560_s21 }
 0x1e7   :  { %2046 = vrot.lane.b32.xlu0 %v2005_v38, %s2562_s23 }
 0x1e8   :  { %v3303_v8 = vpop.permute.xlu1 %1906 }
 0x1e9   :  { %5644 = vst [vmem:[#allocation46_spill] sm:$0xff] %v3303_v8  ;;  %v5433_v35 = vunpack.i.l.bf16 %v3303_v8  ;;  %2206 = vrot.lane.b32.xlu2 %v3239_v33, %s2561_s22  ;;  %v3309_v0 = vpop.permute.xlu0 %1871 }
 0x1ea   :  { %5645 = vst [vmem:[#allocation47_spill] sm:$0xff] %v3309_v0  ;;  %v5438_v47 = vunpack.i.h.bf16 %v3309_v0  ;;  %v1948_v0 = vunpack.i.l.bf16 %v3210_v25 }
 0x1eb   :  { %v3311_v44 = vpop.permute.xlu2 %2061  ;;  %v3319_v38 = vsel %vm148_vm4, %v5434_v54, %v5433_v35 }
 0x1ec   :  { %5646 = vst [vmem:[#allocation48_spill] sm:$0xff] %v3311_v44 }
 0x1ed   :  { %5647 = vst [vmem:[#allocation49_spill] sm:$0xff] %v3319_v38 }
 0x1ee   :  { %2096 = vrot.lane.b32.xlu1 %v2065_v14, %s2561_s22 }
 0x1ef   :  { %2051 = vrot.lane.b32.xlu0 %v3323_v60, %s2565_s26 }
 0x1f0   :  { %v3328_v29 = vpop.permute.xlu1 %1911 }
 0x1f1   :  { %5648 = vst [vmem:[#allocation50_spill] sm:$0xff] %v3328_v29  ;;  %v5437_v58 = vunpack.i.l.bf16 %v3328_v29  ;;  %2211 = vrot.lane.b32.xlu2 %v3239_v33, %s2562_s23  ;;  %v3334_v35 = vpop.permute.xlu0 %1876 }
 0x1f2   :  { %5649 = vst [vmem:[#allocation51_spill] sm:$0xff] %v3334_v35  ;;  %v5443_v61 = vunpack.i.h.bf16 %v3334_v35  ;;  %v431_v35 = vpop.f32.mrf.mxu0 }
 0x1f3   :  { %v3336_v54 = vpop.permute.xlu2 %2116  ;;  %v3344_v15 = vsel %vm167_vm3, %v5438_v47, %v5437_v58  ;;  %v2070_v58 = vpack.i.bf16 %v3150_v17, %v3123_v52  ;;  %v432_v19 = vadd.f32 %v431_v35, %v3089_v22 }
 0x1f4   :  { %5650 = vst [vmem:[#allocation52_spill] sm:$0xff] %v3344_v15 }
 0x1f6   :  { %2106 = vrot.lane.b32.xlu1 %v2065_v14, %s2562_s23 }
 0x1f7   :  { %2056 = vrot.lane.b32.xlu0 %v3137_v24, %s2565_s26 }
 0x1f8   :  { %v3349_v16 = vpop.permute.xlu1 %1916 }
 0x1f9   :  { %5651 = vst [vmem:[#allocation53_spill] sm:$0xff] %v3349_v16  ;;  %v5442_v49 = vunpack.i.l.bf16 %v3349_v16  ;;  %2216 = vrot.lane.b32.xlu2 %v3239_v33, %s2563_s24  ;;  %v3355_v7 = vpop.permute.xlu0 %1881 }
 0x1fa   :  { %5652 = vst [vmem:[#allocation54_spill] sm:$0xff] %v3355_v7  ;;  %v5447_v28 = vunpack.i.h.bf16 %v3355_v7  ;;  %v463_v7 = vpop.f32.mrf.mxu1  ;;  %v434_v40 = vpop.f32.mrf.mxu0 }
 0x1fb   :  { %v3357_v38 = vpop.permute.xlu2 %2126  ;;  %v3365_v14 = vsel %vm186_vm1, %v5443_v61, %v5442_v49 }
 0x1fc   :  { %5653 = vst [vmem:[#allocation55_spill] sm:$0xff] %v3365_v14 }
 0x1fe   :  { %2121 = vrot.lane.b32.xlu1 %v3157_v31, %s2564_s25 }
 0x1ff   :  { %2071 = vrot.lane.b32.xlu0 %v2070_v58, %s2558_s19 }
 0x200   :  { %v3372_v47 = vpop.permute.xlu1 %1921 }
 0x201   :  { %5654 = vst [vmem:[#allocation56_spill] sm:$0xff] %v3372_v47  ;;  %v5446_v23 = vunpack.i.l.bf16 %v3372_v47  ;;  %2221 = vrot.lane.b32.xlu2 %v3239_v33, %s2564_s25  ;;  %v3378_v13 = vpop.permute.xlu0 %1886 }
 0x202   :  { %5655 = vst [vmem:[#allocation57_spill] sm:$0xff] %v3378_v13  ;;  %v5454_v15 = vunpack.i.h.bf16 %v3378_v13 }
 0x203   :  { %v3380_v49 = vpop.permute.xlu2 %2136  ;;  %v3388_v61 = vsel %vm205_vm0, %v5447_v28, %v5446_v23 }
 0x204   :  { %5656 = vst [vmem:[#allocation58_spill] sm:$0xff] %v3388_v61 }
 0x206   :  { %2131 = vrot.lane.b32.xlu1 %v3392_v30, %s2558_s19 }
 0x207   :  { %2081 = vrot.lane.b32.xlu0 %v2070_v58, %s2559_s20 }
 0x208   :  { %v3397_v2 = vpop.permute.xlu1 %1926 }
 0x209   :  { %5657 = vst [vmem:[#allocation59_spill] sm:$0xff] %v3397_v2  ;;  %v5453_v14 = vunpack.i.l.bf16 %v3397_v2  ;;  %2226 = vrot.lane.b32.xlu2 %v3239_v33, %s2565_s26  ;;  %v3403_v23 = vpop.permute.xlu0 %1936 }
 0x20a   :  { %5658 = vst [vmem:[#allocation60_spill] sm:$0xff] %v3403_v23 }
 0x20b   :  { %v3405_v28 = vpop.permute.xlu2 %2146  ;;  %v3413_v36 = vsel %vm224_vm2, %v5454_v15, %v5453_v14 }
 0x20c   :  { %5659 = vst [vmem:[#allocation61_spill] sm:$0xff] %v3413_v36 }
 0x20e   :  { %2141 = vrot.lane.b32.xlu1 %v3392_v30, %s2559_s20 }
 0x20f   :  { %2091 = vrot.lane.b32.xlu0 %v2070_v58, %s2560_s21 }
 0x210   :  { %v3420_v33 = vpop.permute.xlu1 %1991 }
 0x211   :  { %2231 = vrot.lane.b32.xlu2 %v2230_v3, %s2558_s19  ;;  %v3423_v61 = vpop.permute.xlu0 %1941 }
 0x212   :  { %5660 = vst [vmem:[#allocation62_spill] sm:$0xff] %v3423_v61  ;;  %v5463_v14 = vunpack.i.h.bf16 %v3423_v61  ;;  %v5466_v15 = vunpack.i.l.bf16 %v3423_v61 }
 0x213   :  { %v3429_v36 = vpop.permute.xlu2 %2156 }
 0x214   :  { %v3435_v13 = vsel %vm91_vm7, %v5463_v14, %v1949_v55  ;;  %v3441_v23 = vsel %vm91_vm7, %v5466_v15, %v1948_v0  ;;  %v1959_v14 = vunpack.i.h.bf16 %v3233_v11 }
 0x215   :  { %5661 = vst [vmem:[#allocation63_spill] sm:$0xff] %v3435_v13  ;;  %v1958_v13 = vunpack.i.l.bf16 %v3233_v11  ;;  %v466_v11 = vpop.f32.mrf.mxu1 }
 0x216   :  { %5662 = vst [vmem:[#allocation64_spill] sm:$0xff] %v3441_v23  ;;  %2151 = vrot.lane.b32.xlu1 %v3392_v30, %s2560_s21 }
 0x217   :  { %2101 = vrot.lane.b32.xlu0 %v2070_v58, %s2561_s22 }
 0x218   :  { %v3446_v25 = vpop.permute.xlu1 %1996 }
 0x219   :  { %5663 = vst [vmem:[#allocation65_spill] sm:$0xff] %v3446_v25  ;;  %2241 = vrot.lane.b32.xlu2 %v2230_v3, %s2559_s20  ;;  %v3449_v44 = vpop.permute.xlu0 %1951 }
 0x21a   :  { %5664 = vst [vmem:[#allocation66_spill] sm:$0xff] %v3449_v44  ;;  %v5472_v61 = vunpack.i.h.bf16 %v3449_v44  ;;  %v5475_v15 = vunpack.i.l.bf16 %v3449_v44 }
 0x21b   :  { %v3455_v23 = vpop.permute.xlu2 %2166 }
 0x21c   :  { %v3461_v41 = vsel %vm110_vm5, %v5472_v61, %v1959_v14  ;;  %v3467_v25 = vsel %vm110_vm5, %v5475_v15, %v1958_v13  ;;  %v435_v61 = vadd.f32 %v434_v40, %v3117_v48 }
 0x21d   :  { %5665 = vst [vmem:[#allocation67_spill] sm:$0xff] %v3461_v41  ;;  %v467_v41 = vadd.f32 %v466_v11, %v3117_v48  ;;  %v491_v11 = vmax.f32 %v432_v19, 0.0 }
 0x21e   :  { %5666 = vst [vmem:[#allocation68_spill] sm:$0xff] %v3467_v25  ;;  %2161 = vrot.lane.b32.xlu1 %v3392_v30, %s2561_s22 }
 0x21f   :  { %2111 = vrot.lane.b32.xlu0 %v2070_v58, %s2562_s23  ;;  %v1968_v58 = vunpack.i.l.bf16 %v3249_v20  ;;  %v464_v20 = vadd.f32 %v463_v7, %v3089_v22  ;;  %v3522_v19 = vmul.f32 %v3097_v18, %v491_v11  ;;  %v1979_v11 = vunpack.i.h.bf16 %v3271_v59 }
 0x220   :  { %v3473_v10 = vpop.permute.xlu1 %2001 }
 0x221   :  { %v5480_v44 = vunpack.i.h.bf16 %v3473_v10  ;;  %v5482_v15 = vunpack.i.l.bf16 %v3473_v10  ;;  %2251 = vrot.lane.b32.xlu2 %v2230_v3, %s2560_s21  ;;  %v3480_v25 = vpop.permute.xlu0 %1961  ;;  %5671 = vst [vmem:[#allocation72_spill] sm:$0xff] %v3522_v19  ;;  %v492_v22 = vmax.f32 %v464_v20, 0.0  ;;  %v1978_v20 = vunpack.i.l.bf16 %v3271_v59 }
 0x222   :  { %v5481_v35 = vunpack.i.h.bf16 %v3480_v25 }
 0x223   :  { %v3486_v50 = vpop.permute.xlu2 %2181  ;;  %v3492_v40 = vsel %vm91_vm7, %v1949_v55, %v5480_v44  ;;  %v3498_v48 = vsel %vm91_vm7, %v1948_v0, %v5482_v15  ;;  %v497_v44 = vmax.f32 %v435_v61, 0.0  ;;  %v3515_v0 = vpack.i.bf16 %v3174_v39, %v3167_v5 }
 0x224   :  { %5667 = vst [vmem:[#allocation69_spill] sm:$0xff] %v3486_v50  ;;  %v3505_v52 = vsel %vm129_vm6, %v5481_v35, %v1969_v57  ;;  %v5670_v50 = vunpack.i.l.bf16 %v3480_v25 }
 0x225   :  { %5668 = vst [vmem:[#allocation70_spill] sm:$0xff] %v3492_v40  ;;  %v498_v40 = vmax.f32 %v467_v41, 0.0 }
 0x226   :  { %5669 = vst [vmem:[#allocation71_spill] sm:$0xff] %v3498_v48  ;;  %v3511_v55 = vsel %vm129_vm6, %v5670_v50, %v1968_v58  ;;  %2171 = vrot.lane.b32.xlu1 %v3392_v30, %s2562_s23  ;;  %v3527_v50 = vmul.f32 %v3097_v18, %v497_v44 }
 0x227   :  { %2176 = vrot.lane.b32.xlu0 %v3515_v0, %s2565_s26  ;;  %v3530_v41 = vmul.f32 %v3100_v56, %v498_v40 }
 0x228   :  { %v3524_v7 = vpop.permute.xlu1 %2011  ;;  %5672 = vst [vmem:[#allocation73_spill] sm:$0xff] %v3527_v50 }
 0x229   :  { %5673 = vst [vmem:[#allocation74_spill] sm:$0xff] %v3530_v41  ;;  %v5485_v61 = vunpack.i.h.bf16 %v3524_v7  ;;  %v5486_v35 = vunpack.i.l.bf16 %v3524_v7  ;;  %2261 = vrot.lane.b32.xlu2 %v2230_v3, %s2561_s22  ;;  %v3535_v30 = vpop.permute.xlu0 %1971 }
 0x22a   :  { %v5676_v18 = vunpack.i.h.bf16 %v3535_v30  ;;  %v5677_v44 = vunpack.i.l.bf16 %v3535_v30 }
 0x22b   :  { %v2192_v39 = vpop.permute.xlu2 %2191  ;;  %v3547_v3 = vsel %vm110_vm5, %v1959_v14, %v5485_v61  ;;  %v3553_v59 = vsel %vm110_vm5, %v1958_v13, %v5486_v35  ;;  %v3568_v61 = vmul.f32 %v3100_v56, %v492_v22  ;;  %v3572_v13 = vpack.i.bf16 %v3527_v50, %v3522_v19 }
 0x22c   :  { %5674 = vst [vmem:[#allocation75_spill] sm:$0xff] %v3547_v3  ;;  %v2194_v15 = vunpack.i.h.bf16 %v2192_v39  ;;  %v2193_v5 = vunpack.i.l.bf16 %v2192_v39  ;;  %v3559_v40 = vsel %vm148_vm4, %v5676_v18, %v1979_v11  ;;  %v3565_v14 = vsel %vm148_vm4, %v5677_v44, %v1978_v20 }
 0x22d   :  { %5675 = vst [vmem:[#allocation76_spill] sm:$0xff] %v3553_v59  ;;  %v5679_v39 = vunpack.i.l.bf16 %v3225_v53  ;;  %v5681_v35 = vunpack.i.h.bf16 %v3242_v43  ;;  %v3594_v22 = vpack.i.bf16 %v3530_v41, %v3568_v61  ;;  %v5493_v59 = vunpack.i.l.bf16 %v3247_v1 }
 0x22e   :  { %5678 = vst [vmem:[#allocation77_spill] sm:$0xff] %v3568_v61  ;;  %2186 = vrot.lane.b32.xlu1 %v3515_v0, %s2564_s25  ;;  %v3590_v56 = vsel %vm91_vm7, %v2193_v5, %v2194_v15  ;;  %v5494_v53 = vunpack.i.h.bf16 %v3263_v46 }
 0x22f   :  { %v3580_v18 = vsel %vm91_vm7, %v2194_v15, %v5679_v39  ;;  %v3586_v44 = vsel %vm91_vm7, %v5681_v35, %v2193_v5  ;;  %5683 = vst [vmem:[#allocation80_spill] sm:$0xff] %v3590_v56  ;;  %2271 = vrot.lane.b32.xlu0 %v3572_v13, %s2558_s19  ;;  %v3608_v15 = vpack.i.bf16 %v3131_v26, %v3108_v12 }
 0x230   :  { %5680 = vst [vmem:[#allocation78_spill] sm:$0xff] %v3580_v18  ;;  %v3598_v48 = vpop.permute.xlu1 %2021 }
 0x231   :  { %5682 = vst [vmem:[#allocation79_spill] sm:$0xff] %v3586_v44  ;;  %v5492_v39 = vunpack.i.h.bf16 %v3598_v48  ;;  %v5491_v43 = vunpack.i.l.bf16 %v3598_v48  ;;  %2276 = vrot.lane.b32.xlu2 %v3594_v22, %s2558_s19  ;;  %v3604_v35 = vpop.permute.xlu0 %1981 }
 0x232   :  { %5684 = vst [vmem:[#allocation81_spill] sm:$0xff] %v3604_v35 }
 0x233   :  { %v2197_v5 = vpop.permute.xlu2 %2196  ;;  %v3614_v56 = vsel %vm129_vm6, %v1969_v57, %v5492_v39  ;;  %v3620_v44 = vsel %vm129_vm6, %v1968_v58, %v5491_v43 }
 0x234   :  { %5685 = vst [vmem:[#allocation82_spill] sm:$0xff] %v3614_v56  ;;  %v2199_v3 = vunpack.i.h.bf16 %v2197_v5  ;;  %v2198_v18 = vunpack.i.l.bf16 %v2197_v5 }
 0x235   :  { %5686 = vst [vmem:[#allocation83_spill] sm:$0xff] %v3620_v44 }
 0x236   :  { %2236 = vrot.lane.b32.xlu1 %v3608_v15, %s2558_s19  ;;  %v3630_v57 = vsel %vm110_vm5, %v2199_v3, %v5493_v59  ;;  %v3636_v58 = vsel %vm110_vm5, %v5494_v53, %v2198_v18  ;;  %v3640_v43 = vsel %vm110_vm5, %v2198_v18, %v2199_v3  ;;  %v5693_v3 = vunpack.i.h.bf16 %v3473_v10 }
 0x237   :  { %5687 = vst [vmem:[#allocation84_spill] sm:$0xff] %v3630_v57  ;;  %2281 = vrot.lane.b32.xlu0 %v3572_v13, %s2559_s20 }
 0x238   :  { %5688 = vst [vmem:[#allocation85_spill] sm:$0xff] %v3636_v58  ;;  %v3644_v5 = vpop.permute.xlu1 %2031 }
 0x239   :  { %5689 = vst [vmem:[#allocation86_spill] sm:$0xff] %v3640_v43  ;;  %v5499_v39 = vunpack.i.h.bf16 %v3644_v5  ;;  %v5500_v59 = vunpack.i.l.bf16 %v3644_v5  ;;  %2286 = vrot.lane.b32.xlu2 %v3594_v22, %s2559_s20  ;;  %v3650_v44 = vpop.permute.xlu0 %2006 }
 0x23a   :  { %v5692_v58 = vunpack.i.h.bf16 %v3650_v44  ;;  %v5695_v57 = vunpack.i.l.bf16 %v3650_v44 }
 0x23b   :  { %v2202_v43 = vpop.permute.xlu2 %2201  ;;  %v3660_v56 = vsel %vm148_vm4, %v1979_v11, %v5499_v39  ;;  %v3666_v46 = vsel %vm148_vm4, %v1978_v20, %v5500_v59  ;;  %v5696_v11 = vunpack.i.l.bf16 %v3473_v10 }
 0x23c   :  { %5690 = vst [vmem:[#allocation87_spill] sm:$0xff] %v3660_v56  ;;  %v2204_v53 = vunpack.i.h.bf16 %v2202_v43  ;;  %v2203_v1 = vunpack.i.l.bf16 %v2202_v43  ;;  %v3674_v18 = vsel %vm91_vm7, %v5693_v3, %v5692_v58  ;;  %v5698_v43 = vunpack.i.l.bf16 %v3269_v21 }
 0x23d   :  { %5691 = vst [vmem:[#allocation88_spill] sm:$0xff] %v3666_v46  ;;  %v3682_v39 = vsel %vm91_vm7, %v5696_v11, %v5695_v57  ;;  %v5699_v58 = vunpack.i.h.bf16 %v3283_v6  ;;  %v5503_v11 = vunpack.i.h.bf16 %v3291_v4 }
 0x23e   :  { %5694 = vst [vmem:[#allocation89_spill] sm:$0xff] %v3674_v18  ;;  %2246 = vrot.lane.b32.xlu1 %v3608_v15, %s2559_s20  ;;  %v3690_v20 = vsel %vm129_vm6, %v2204_v53, %v5698_v43  ;;  %v3700_v10 = vsel %vm129_vm6, %v2203_v1, %v2204_v53 }
 0x23f   :  { %5697 = vst [vmem:[#allocation90_spill] sm:$0xff] %v3682_v39  ;;  %v3696_v3 = vsel %vm129_vm6, %v5699_v58, %v2203_v1  ;;  %2291 = vrot.lane.b32.xlu0 %v3572_v13, %s2560_s21  ;;  %v5704_v1 = vunpack.i.h.bf16 %v3524_v7 }
 0x240   :  { %5700 = vst [vmem:[#allocation91_spill] sm:$0xff] %v3696_v3  ;;  %v2042_v57 = vpop.permute.xlu1 %2041 }
 0x241   :  { %5701 = vst [vmem:[#allocation92_spill] sm:$0xff] %v3700_v10  ;;  %v2044_v43 = vunpack.i.h.bf16 %v2042_v57  ;;  %v2043_v46 = vunpack.i.l.bf16 %v2042_v57  ;;  %2296 = vrot.lane.b32.xlu2 %v3594_v22, %s2560_s21  ;;  %v3708_v56 = vpop.permute.xlu0 %2016  ;;  %v5702_v57 = vunpack.i.l.bf16 %v3291_v4 }
 0x242   :  { %v5703_v53 = vunpack.i.h.bf16 %v3708_v56  ;;  %v5705_v18 = vunpack.i.l.bf16 %v3708_v56 }
 0x243   :  { %v2207_v3 = vpop.permute.xlu2 %2206  ;;  %v3718_v59 = vsel %vm167_vm3, %v5503_v11, %v2044_v43  ;;  %v3724_v6 = vsel %vm167_vm3, %v5702_v57, %v2043_v46  ;;  %v5706_v11 = vunpack.i.l.bf16 %v3524_v7 }
 0x244   :  { %v2209_v58 = vunpack.i.h.bf16 %v2207_v3  ;;  %v2208_v39 = vunpack.i.l.bf16 %v2207_v3  ;;  %v3732_v10 = vsel %vm110_vm5, %v5704_v1, %v5703_v53  ;;  %v5707_v3 = vunpack.i.l.bf16 %v3289_v62 }
 0x245   :  { %v3740_v21 = vsel %vm110_vm5, %v5706_v11, %v5705_v18  ;;  %v5708_v53 = vunpack.i.h.bf16 %v3303_v8 }
 0x246   :  { %2256 = vrot.lane.b32.xlu1 %v3608_v15, %s2560_s21  ;;  %v3748_v57 = vsel %vm148_vm4, %v2209_v58, %v5707_v3  ;;  %v3758_v7 = vsel %vm148_vm4, %v2208_v39, %v2209_v58 }
 0x247   :  { %v3754_v1 = vsel %vm148_vm4, %v5708_v53, %v2208_v39  ;;  %5710 = vst [vmem:[#allocation94_spill] sm:$0xff] %v3758_v7  ;;  %2301 = vrot.lane.b32.xlu0 %v3572_v13, %s2561_s22  ;;  %v5712_v13 = vunpack.i.h.bf16 %v3598_v48 }
 0x248   :  { %5709 = vst [vmem:[#allocation93_spill] sm:$0xff] %v3754_v1  ;;  %v3762_v18 = vpop.permute.xlu1 %2066  ;;  %v3792_v1 = vpack.i.bf16 %v3053_v34, %v3071_v9 }
 0x249   :  { %2306 = vrot.lane.b32.xlu2 %v3594_v22, %s2561_s22  ;;  %v3766_v11 = vpop.permute.xlu0 %2026  ;;  %v5714_v22 = vunpack.i.l.bf16 %v3598_v48 }
 0x24a   :  { %v5508_v3 = vunpack.i.h.bf16 %v3766_v11  ;;  %v5509_v8 = vunpack.i.l.bf16 %v3766_v11 }
 0x24b   :  { %v3770_v53 = vpop.permute.xlu2 %2211 }
 0x24c   :  { %5711 = vst [vmem:[#allocation95_spill] sm:$0xff] %v3770_v53  ;;  %v5510_v39 = vunpack.i.l.bf16 %v3770_v53  ;;  %v3780_v58 = vsel %vm129_vm6, %v5712_v13, %v5508_v3  ;;  %v3788_v7 = vsel %vm129_vm6, %v5714_v22, %v5509_v8  ;;  %v5716_v13 = vunpack.i.h.bf16 %v3328_v29 }
 0x24d   :  { %5713 = vst [vmem:[#allocation96_spill] sm:$0xff] %v3780_v58  ;;  %v5518_v58 = vunpack.i.h.bf16 %v3349_v16  ;;  %v5543_v16 = vunpack.i.l.bf16 %v3762_v18 }
 0x24e   :  { %5715 = vst [vmem:[#allocation97_spill] sm:$0xff] %v3788_v7  ;;  %2266 = vrot.lane.b32.xlu1 %v3608_v15, %s2561_s22  ;;  %v3802_v3 = vsel %vm167_vm3, %v5716_v13, %v5510_v39  ;;  %v5719_v39 = vunpack.i.h.bf16 %v3644_v5  ;;  %s2567_s22 = smov [#allocation8]  }
 0x24f   :  { %5717 = vst [vmem:[#allocation98_spill] sm:$0xff] %v3802_v3  ;;  %2316 = vrot.lane.b32.xlu0 %v3792_v1, %s2565_s26  ;;  %v2138_v3 = vunpack.i.l.bf16 %v3380_v49 }
 0x250   :  { %v3806_v48 = vpop.permute.xlu1 %2076 }
 0x251   :  { %2311 = vrot.lane.b32.xlu2 %v3157_v31, %s2563_s24  ;;  %v3810_v22 = vpop.permute.xlu0 %2036  ;;  %v5721_v31 = vunpack.i.l.bf16 %v3644_v5 }
 0x252   :  { %v5516_v15 = vunpack.i.h.bf16 %v3810_v22  ;;  %v5515_v8 = vunpack.i.l.bf16 %v3810_v22 }
 0x253   :  { %v3814_v7 = vpop.permute.xlu2 %2216 }
 0x254   :  { %5718 = vst [vmem:[#allocation99_spill] sm:$0xff] %v3814_v7  ;;  %v5517_v13 = vunpack.i.l.bf16 %v3814_v7  ;;  %v3824_v34 = vsel %vm148_vm4, %v5719_v39, %v5516_v15  ;;  %v3832_v9 = vsel %vm148_vm4, %v5721_v31, %v5515_v8  ;;  %v5522_v15 = vunpack.i.h.bf16 %v3372_v47 }
 0x255   :  { %5720 = vst [vmem:[#allocation100_spill] sm:$0xff] %v3824_v34 }
 0x256   :  { %5722 = vst [vmem:[#allocation101_spill] sm:$0xff] %v3832_v9  ;;  %2321 = vrot.lane.b32.xlu1 %v3137_v24, %s2563_s24  ;;  %v3842_v53 = vsel %vm186_vm1, %v5518_v58, %v5517_v13 }
 0x257   :  { %5723 = vst [vmem:[#allocation102_spill] sm:$0xff] %v3842_v53  ;;  %2331 = vrot.lane.b32.xlu0 %v3171_v42, %s2563_s24 }
 0x258   :  { %v3846_v39 = vpop.permute.xlu1 %2086 }
 0x259   :  { %2326 = vrot.lane.b32.xlu2 %v3323_v60, %s2564_s25  ;;  %v3850_v5 = vpop.permute.xlu0 %2046 }
 0x25a   :  { %5724 = vst [vmem:[#allocation103_spill] sm:$0xff] %v3850_v5  ;;  %v5520_v24 = vunpack.i.h.bf16 %v3850_v5  ;;  %v5519_v31 = vunpack.i.l.bf16 %v3850_v5 }
 0x25b   :  { %v3854_v8 = vpop.permute.xlu2 %2221 }
 0x25c   :  { %5725 = vst [vmem:[#allocation104_spill] sm:$0xff] %v3854_v8  ;;  %v5521_v13 = vunpack.i.l.bf16 %v3854_v8  ;;  %v3862_v42 = vsel %vm167_vm3, %v2044_v43, %v5520_v24  ;;  %v3868_v58 = vsel %vm167_vm3, %v2043_v46, %v5519_v31  ;;  %v5530_v24 = vunpack.i.h.bf16 %v3397_v2 }
 0x25d   :  { %5726 = vst [vmem:[#allocation105_spill] sm:$0xff] %v3862_v42 }
 0x25e   :  { %5727 = vst [vmem:[#allocation106_spill] sm:$0xff] %v3868_v58  ;;  %2336 = vrot.lane.b32.xlu1 %v3220_v27, %s2564_s25  ;;  %v3878_v9 = vsel %vm205_vm0, %v5522_v15, %v5521_v13 }
 0x25f   :  { %5728 = vst [vmem:[#allocation107_spill] sm:$0xff] %v3878_v9  ;;  %2346 = vrot.lane.b32.xlu0 %v3515_v0, %s2563_s24 }
 0x260   :  { %v3882_v43 = vpop.permute.xlu1 %2096 }
 0x261   :  { %2341 = vrot.lane.b32.xlu2 %v3038_v51, %s2563_s24  ;;  %v3886_v46 = vpop.permute.xlu0 %2051  ;;  %v2355_v51 = vpack.i.bf16 %v3128_v37, %v3522_v19 }
 0x263   :  { %v3888_v31 = vpop.permute.xlu2 %2226 }
 0x264   :  { %5729 = vst [vmem:[#allocation108_spill] sm:$0xff] %v3888_v31  ;;  %v5529_v34 = vunpack.i.l.bf16 %v3888_v31 }
 0x266   :  { %2351 = vrot.lane.b32.xlu1 %v3792_v1, %s2564_s25  ;;  %v3900_v0 = vsel %vm224_vm2, %v5530_v24, %v5529_v34  ;;  %v3917_v34 = vpack.i.bf16 %v3522_v19, %v3527_v50  ;;  %v5733_v24 = vunpack.i.l.bf16 %v3650_v44  ;;  %v2370_v19 = vpack.i.bf16 %v3568_v61, %v3105_v63 }
 0x267   :  { %5730 = vst [vmem:[#allocation109_spill] sm:$0xff] %v3900_v0  ;;  %2361 = vrot.lane.b32.xlu0 %v3323_v60, %s2563_s24  ;;  %v5731_v60 = vunpack.i.h.bf16 %v3650_v44 }
 0x268   :  { %v3906_v13 = vpop.permute.xlu1 %2106 }
 0x269   :  { %2356 = vrot.lane.b32.xlu2 %v2355_v51, %s2562_s23  ;;  %v3909_v15 = vpop.permute.xlu0 %2056 }
 0x26b   :  { %v3911_v5 = vpop.permute.xlu2 %2231 }
 0x26c   :  { %v5534_v7 = vunpack.i.h.bf16 %v3911_v5  ;;  %v5537_v29 = vunpack.i.l.bf16 %v3911_v5 }
 0x26e   :  { %2366 = vrot.lane.b32.xlu1 %v3220_v27, %s2563_s24  ;;  %v3927_v51 = vsel %vm91_vm7, %v5731_v60, %v5534_v7  ;;  %v3935_v8 = vsel %vm91_vm7, %v5733_v24, %v5537_v29  ;;  %v5542_v7 = vunpack.i.h.bf16 %v3762_v18  ;;  %v2129_v24 = vunpack.i.h.bf16 %v3357_v38 }
 0x26f   :  { %5732 = vst [vmem:[#allocation110_spill] sm:$0xff] %v3927_v51  ;;  %2376 = vrot.lane.b32.xlu0 %v3917_v34, %s2565_s26  ;;  %v2128_v29 = vunpack.i.l.bf16 %v3357_v38  ;;  %v3966_v38 = vpack.i.bf16 %v3105_v63, %v3128_v37 }
 0x270   :  { %5734 = vst [vmem:[#allocation111_spill] sm:$0xff] %v3935_v8  ;;  %v3941_v27 = vpop.permute.xlu1 %2121 }
 0x271   :  { %2371 = vrot.lane.b32.xlu2 %v2370_v19, %s2562_s23  ;;  %v2072_v60 = vpop.permute.xlu0 %2071 }
 0x272   :  { %v2074_v44 = vunpack.i.h.bf16 %v2072_v60  ;;  %v2073_v51 = vunpack.i.l.bf16 %v2072_v60 }
 0x273   :  { %v3948_v8 = vpop.permute.xlu2 %2241 }
 0x274   :  { %v3956_v19 = vsel %vm91_vm7, %v5542_v7, %v2074_v44  ;;  %v3962_v60 = vsel %vm91_vm7, %v5543_v16, %v2073_v51  ;;  %v3970_v31 = vsel %vm91_vm7, %v2074_v44, %v2129_v24  ;;  %v3974_v47 = vsel %vm91_vm7, %v2073_v51, %v2128_v29 }
 0x275   :  { %5735 = vst [vmem:[#allocation112_spill] sm:$0xff] %v3970_v31  ;;  %v5737_v7 = vunpack.i.h.bf16 %v3948_v8  ;;  %v5738_v16 = vunpack.i.h.bf16 %v3708_v56  ;;  %v5740_v63 = vunpack.i.l.bf16 %v3948_v8  ;;  %v5741_v44 = vunpack.i.l.bf16 %v3708_v56 }
 0x276   :  { %5736 = vst [vmem:[#allocation113_spill] sm:$0xff] %v3974_v47  ;;  %2381 = vrot.lane.b32.xlu1 %v3792_v1, %s2563_s24  ;;  %v3996_v51 = vpack.i.bf16 %v3108_v12, %v3131_v26  ;;  %v2139_v26 = vunpack.i.h.bf16 %v3380_v49  ;;  %v5745_v49 = vunpack.i.l.bf16 %v3806_v48 }
 0x277   :  { %v3984_v2 = vsel %vm110_vm5, %v5738_v16, %v5737_v7  ;;  %v3992_v37 = vsel %vm110_vm5, %v5741_v44, %v5740_v63  ;;  %2391 = vrot.lane.b32.xlu0 %v3966_v38, %s2565_s26 }
 0x278   :  { %5739 = vst [vmem:[#allocation114_spill] sm:$0xff] %v3984_v2  ;;  %v4000_v1 = vpop.permute.xlu1 %2131 }
 0x279   :  { %5742 = vst [vmem:[#allocation115_spill] sm:$0xff] %v3992_v37  ;;  %v5550_v16 = vunpack.i.h.bf16 %v4000_v1  ;;  %2386 = vrot.lane.b32.xlu2 %v3996_v51, %s2562_s23  ;;  %v4006_v56 = vpop.permute.xlu0 %2081  ;;  %v5743_v53 = vunpack.i.l.bf16 %v4000_v1 }
 0x27a   :  { %v2083_v12 = vunpack.i.l.bf16 %v4006_v56 }
 0x27b   :  { %v4013_v37 = vpop.permute.xlu2 %2251  ;;  %v4019_v7 = vsel %vm91_vm7, %v2129_v24, %v5550_v16  ;;  %v4025_v63 = vsel %vm91_vm7, %v2128_v29, %v5743_v53  ;;  %v5747_v16 = vunpack.i.h.bf16 %v4006_v56  ;;  %v5749_v53 = vunpack.i.h.bf16 %v3766_v11 }
 0x27c   :  { %5744 = vst [vmem:[#allocation116_spill] sm:$0xff] %v4025_v63  ;;  %v5551_v44 = vunpack.i.h.bf16 %v4013_v37  ;;  %v5552_v58 = vunpack.i.l.bf16 %v4013_v37  ;;  %v4033_v2 = vsel %vm110_vm5, %v5745_v49, %v2083_v12  ;;  %v4037_v24 = vsel %vm110_vm5, %v2083_v12, %v2138_v3 }
 0x27d   :  { %5746 = vst [vmem:[#allocation117_spill] sm:$0xff] %v4037_v24  ;;  %v4043_v29 = vsel %vm110_vm5, %v5747_v16, %v2139_v26  ;;  %v5751_v12 = vunpack.i.l.bf16 %v3766_v11  ;;  %v2400_v16 = vpack.i.bf16 %v3568_v61, %v3530_v41  ;;  %v5561_v24 = vunpack.i.l.bf16 %v3604_v35 }
 0x27e   :  { %5748 = vst [vmem:[#allocation118_spill] sm:$0xff] %v4043_v29  ;;  %2396 = vrot.lane.b32.xlu1 %v3917_v34, %s2564_s25  ;;  %v4053_v49 = vsel %vm129_vm6, %v5749_v53, %v5551_v44 }
 0x27f   :  { %5750 = vst [vmem:[#allocation119_spill] sm:$0xff] %v4053_v49  ;;  %v4061_v9 = vsel %vm129_vm6, %v5751_v12, %v5552_v58  ;;  %2406 = vrot.lane.b32.xlu0 %v3966_v38, %s2564_s25  ;;  %v2149_v58 = vunpack.i.h.bf16 %v3405_v28 }
 0x280   :  { %5752 = vst [vmem:[#allocation120_spill] sm:$0xff] %v4061_v9  ;;  %v4067_v29 = vpop.permute.xlu1 %2141  ;;  %v2148_v9 = vunpack.i.l.bf16 %v3405_v28 }
 0x281   :  { %v5554_v53 = vunpack.i.l.bf16 %v4067_v29  ;;  %2401 = vrot.lane.b32.xlu2 %v2400_v16, %s2565_s26  ;;  %v4072_v44 = vpop.permute.xlu0 %2091  ;;  %v5753_v61 = vunpack.i.h.bf16 %v4067_v29 }
 0x282   :  { %v5755_v28 = vunpack.i.h.bf16 %v4072_v44  ;;  %v5757_v31 = vunpack.i.l.bf16 %v4072_v44 }
 0x283   :  { %v4078_v49 = vpop.permute.xlu2 %2261  ;;  %v4084_v42 = vsel %vm110_vm5, %v2138_v3, %v5554_v53  ;;  %v4090_v47 = vsel %vm110_vm5, %v2139_v26, %v5753_v61  ;;  %v5759_v26 = vunpack.i.h.bf16 %v3810_v22 }
 0x284   :  { %5754 = vst [vmem:[#allocation121_spill] sm:$0xff] %v4090_v47  ;;  %v5555_v12 = vunpack.i.h.bf16 %v4078_v49  ;;  %v5556_v11 = vunpack.i.l.bf16 %v4078_v49  ;;  %v4098_v0 = vsel %vm129_vm6, %v5755_v28, %v2149_v58  ;;  %v4104_v3 = vsel %vm129_vm6, %v5757_v31, %v2148_v9 }
 0x285   :  { %5756 = vst [vmem:[#allocation122_spill] sm:$0xff] %v4098_v0  ;;  %v5761_v28 = vunpack.i.l.bf16 %v3810_v22 }
 0x286   :  { %5758 = vst [vmem:[#allocation123_spill] sm:$0xff] %v4104_v3  ;;  %2411 = vrot.lane.b32.xlu1 %v3996_v51, %s2565_s26  ;;  %v4114_v61 = vsel %vm148_vm4, %v5759_v26, %v5555_v12  ;;  %s1665_s26 = sshll.u32 %s5426_s5, 4  ;;  %s1666_s26 = int_to_ptr.hbm [resolvable:$true] %s1665_s26 }
 0x287   :  { %5760 = vst [vmem:[#allocation124_spill] sm:$0xff] %v4114_v61  ;;  %v4122_v53 = vsel %vm148_vm4, %v5761_v28, %v5556_v11  ;;  %2421 = vrot.lane.b32.xlu0 %v2400_v16, %s2564_s25  ;;  %v2159_v28 = vunpack.i.h.bf16 %v3429_v36  ;;  %v2158_v11 = vunpack.i.l.bf16 %v3429_v36 }
 0x288   :  { %5762 = vst [vmem:[#allocation125_spill] sm:$0xff] %v4122_v53  ;;  %v4125_v31 = vpop.permute.xlu1 %2151 }
 0x289   :  { %v5557_v47 = vunpack.i.h.bf16 %v4125_v31  ;;  %2416 = vrot.lane.b32.xlu2 %v3917_v34, %s2563_s24  ;;  %v4131_v26 = vpop.permute.xlu0 %2101  ;;  %v5764_v34 = vunpack.i.l.bf16 %v4125_v31 }
 0x28a   :  { %v5558_v12 = vunpack.i.h.bf16 %v4131_v26  ;;  %v5767_v36 = vunpack.i.l.bf16 %v4131_v26 }
 0x28b   :  { %v4137_v53 = vpop.permute.xlu2 %2276  ;;  %v4143_v3 = vsel %vm129_vm6, %v2149_v58, %v5557_v47  ;;  %v4149_v61 = vsel %vm129_vm6, %v2148_v9, %v5764_v34 }
 0x28c   :  { %5763 = vst [vmem:[#allocation126_spill] sm:$0xff] %v4143_v3  ;;  %v4155_v22 = vsel %vm148_vm4, %v5558_v12, %v2159_v28  ;;  %v4161_v0 = vsel %vm148_vm4, %v5767_v36, %v2158_v11  ;;  %v2168_v36 = vunpack.i.l.bf16 %v3455_v23  ;;  %v2169_v3 = vunpack.i.h.bf16 %v3455_v23 }
 0x28d   :  { %5765 = vst [vmem:[#allocation127_spill] sm:$0xff] %v4149_v61  ;;  %v5773_v23 = vunpack.i.l.bf16 %v3906_v13 }
 0x28e   :  { %5766 = vst [vmem:[#allocation128_spill] sm:$0xff] %v4155_v22  ;;  %2426 = vrot.lane.b32.xlu1 %v3966_v38, %s2563_s24 }
 0x28f   :  { %5768 = vst [vmem:[#allocation129_spill] sm:$0xff] %v4161_v0  ;;  %1012 = vrot.lane.b32.xlu0 %v3527_v50, %s2562_s23 }
 0x290   :  { %v4167_v9 = vpop.permute.xlu1 %2161 }
 0x291   :  { %2431 = vrot.lane.b32.xlu2 %v3996_v51, %s2564_s25  ;;  %v4173_v47 = vpop.permute.xlu0 %2111  ;;  %v5769_v34 = vunpack.i.h.bf16 %v4167_v9  ;;  %v5771_v22 = vunpack.i.l.bf16 %v4167_v9 }
 0x292   :  { %v2113_v61 = vunpack.i.l.bf16 %v4173_v47 }
 0x293   :  { %v4181_v58 = vpop.permute.xlu2 %2286  ;;  %v4187_v0 = vsel %vm148_vm4, %v2159_v28, %v5769_v34  ;;  %v4193_v12 = vsel %vm148_vm4, %v2158_v11, %v5771_v22  ;;  %v5774_v28 = vunpack.i.h.bf16 %v4173_v47  ;;  %v5775_v22 = vunpack.i.l.bf16 %v3806_v48 }
 0x294   :  { %5770 = vst [vmem:[#allocation130_spill] sm:$0xff] %v4187_v0  ;;  %v5560_v38 = vunpack.i.l.bf16 %v4181_v58  ;;  %v1040_v50 = vsel %vm167_vm3, %v5773_v23, %v2113_v61  ;;  %v1036_v63 = vsel %vm167_vm3, %v2113_v61, %v2168_v36  ;;  %v5785_v0 = vld [vmem:[#allocation16_spill] sm:$0xff] }
 0x295   :  { %5772 = vst [vmem:[#allocation131_spill] sm:$0xff] %v4193_v12  ;;  %1289 = vmatpush.msrb.mxu3 %v1040_v50  ;;  %1349 = vmatpush.msra.mxu0 %v1036_v63  ;;  %v4207_v11 = vsel %vm167_vm3, %v5774_v28, %v2169_v3  ;;  %v5776_v50 = vunpack.i.h.bf16 %v3291_v4  ;;  %v5777_v63 = vunpack.i.h.bf16 %v3604_v35  ;;  %v5794_v35 = vld [vmem:[#allocation48_spill] sm:$0xff] }
 0x296   :  { %2436 = vrot.lane.b32.xlu1 %v2400_v16, %s2563_s24  ;;  %v828_v34 = vsel %vm110_vm5, %v5560_v38, %v5775_v22 }
 0x297   :  { %1269 = vmatpush.msrb.mxu2 %v828_v34  ;;  %1020 = vrot.lane.b32.xlu0 %v3530_v41, %s2562_s23  ;;  %v1039_v61 = vsel %vm167_vm3, %v5777_v63, %v5776_v50  ;;  %v5779_v34 = vunpack.i.l.bf16 %v3291_v4  ;;  %v5564_v63 = vunpack.i.h.bf16 %v3336_v54  ;;  %v76_v4 = vld [vmem:[%s5425_s4 + $0x28] sm:$0xff]  ;;  %v5791_v41 = vunpack.i.h.bf16 %v3941_v27  ;;  %s1663_s23 = sshll.u32 %s2567_s22, 4  ;;  %s1664_s23 = int_to_ptr.vmem [resolvable:$true] %s1663_s23 }
 0x298   :  { %v4224_v23 = vpop.permute.xlu1 %2171  ;;  %1290 = vmatpush.msrb.mxu3 %v1039_v61  ;;  %1350 = vmatpush.msra.mxu0 %v3718_v59 }
 0x299   :  { %5778 = vst [vmem:[#allocation132_spill] sm:$0xff] %v4224_v23  ;;  %v5562_v16 = vunpack.i.h.bf16 %v4224_v23  ;;  %v5563_v28 = vunpack.i.l.bf16 %v4224_v23  ;;  %2441 = vrot.lane.b32.xlu2 %v3996_v51, %s2563_s24  ;;  %v4231_v22 = vpop.permute.xlu0 %2176  ;;  %v1038_v50 = vsel %vm167_vm3, %v5561_v24, %v5779_v34  ;;  %v5568_v24 = vunpack.i.h.bf16 %v3420_v33 }
 0x29a   :  { %v5567_v59 = vunpack.i.h.bf16 %v4231_v22  ;;  %v5565_v61 = vunpack.i.l.bf16 %v4231_v22  ;;  %1291 = vmatpush.msrb.mxu3 %v1038_v50  ;;  %1351 = vmatpush.msra.mxu0 %v3724_v6  ;;  %v5569_v6 = vunpack.i.l.bf16 %v3886_v46  ;;  %v5566_v50 = vunpack.i.h.bf16 %v3909_v15 }
 0x29b   :  { %v4243_v38 = vpop.permute.xlu2 %2296  ;;  %v4252_v51 = vsel %vm167_vm3, %v2168_v36, %v5563_v28  ;;  %v4258_v34 = vsel %vm167_vm3, %v2169_v3, %v5562_v16  ;;  %v5780_v16 = vld [vmem:[#allocation25_spill] sm:$0xff]  ;;  %v5782_v28 = vld [vmem:[#allocation32_spill] sm:$0xff]  ;;  %v5575_v23 = vunpack.i.h.bf16 %v5794_v35 }
 0x29c   :  { %1292 = vmatpush.msrb.mxu3 %v3147_v45  ;;  %1352 = vmatpush.msra.mxu0 %v3150_v17  ;;  %v1253_v36 = vsel %vm224_vm2, %v5564_v63, %v5565_v61  ;;  %v1252_v45 = vsel %vm224_vm2, %v5566_v50, %v5567_v59  ;;  %v5781_v17 = vld [vmem:[#allocation26_spill] sm:$0xff]  ;;  %v5783_v61 = vld [vmem:[#allocation29_spill] sm:$0xff]  ;;  %v2098_v50 = vunpack.i.l.bf16 %v3882_v43  ;;  %v5784_v59 = vld [vmem:[#allocation20_spill] sm:$0xff] }
 0x29d   :  { %1372 = vmatpush.msra.mxu1 %v1253_v36 }
 0x29e   :  { %1637 = vperm.xlu1 %1848, %v76_v4   ;;  %1293 = vmatpush.msrb.mxu3 %v5780_v16  ;;  %v1251_v16 = vsel %vm224_vm2, %v5568_v24, %v5569_v6  ;;  %v2099_v4 = vunpack.i.h.bf16 %v3882_v43  ;;  %v5786_v24 = vunpack.i.h.bf16 %v3886_v46  ;;  %v5787_v6 = vunpack.i.h.bf16 %v5782_v28 }
 0x29f   :  { %1353 = vmatpush.msra.mxu0 %v5781_v17  ;;  %1373 = vmatpush.msra.mxu1 %v1252_v45  ;;  %v5792_v17 = vunpack.i.h.bf16 %v4000_v1  ;;  %v5797_v45 = vunpack.i.l.bf16 %v4137_v53 }
 0x2a0   :  { %v4281_v36 = vpop.permute.xlu1 %2186  ;;  %1294 = vmatpush.msrb.mxu3 %v5783_v61  ;;  %v1250_v43 = vsel %vm224_vm2, %v5787_v6, %v5786_v24  ;;  %v5789_v61 = vunpack.i.h.bf16 %v4131_v26 }
 0x2a1   :  { %1354 = vmatpush.msra.mxu0 %v5784_v59  ;;  %v2272_v63 = vpop.permute.xlu0 %2271  ;;  %1374 = vmatpush.msra.mxu1 %v1251_v16  ;;  %v5788_v16 = vld [vmem:[#allocation17_spill] sm:$0xff] }
 0x2a2   :  { %v2274_v3 = vunpack.i.h.bf16 %v2272_v63  ;;  %v2273_v12 = vunpack.i.l.bf16 %v2272_v63  ;;  %1295 = vmatpush.msrb.mxu3 %v5785_v0  ;;  %v969_v0 = vsel %vm148_vm4, %v2099_v4, %v5789_v61  ;;  %v5790_v63 = vunpack.i.l.bf16 %v4281_v36 }
 0x2a3   :  { %v4305_v59 = vpop.permute.xlu2 %2306  ;;  %1355 = vmatpush.msra.mxu0 %v5788_v16  ;;  %1375 = vmatpush.msra.mxu1 %v1250_v43  ;;  %v5793_v61 = vunpack.i.l.bf16 %v4000_v1 }
 0x2a4   :  { %v1181_v24 = vsel %vm205_vm0, %v5791_v41, %v5790_v63  ;;  %v5576_v6 = vunpack.i.h.bf16 %v4305_v59  ;;  %v4324_v16 = vsel %vm91_vm7, %v5792_v17, %v2274_v3  ;;  %v5795_v41 = vunpack.i.h.bf16 %v4137_v53 }
 0x2a5   :  { %v4330_v43 = vsel %vm91_vm7, %v5793_v61, %v2273_v12  ;;  %1356 = vmatpush.msra.mxu0 %v969_v0  ;;  %1376 = vmatpush.msra.mxu1 %v1181_v24  ;;  %v4343_v17 = vsel %vm91_vm7, %v2273_v12, %v5797_v45  ;;  %v5799_v0 = vunpack.i.l.bf16 %v4131_v26  ;;  %v5801_v61 = vunpack.i.l.bf16 %v4305_v59 }
 0x2a6   :  { %v4337_v63 = vsel %vm91_vm7, %v2274_v3, %v5795_v41  ;;  %5798 = vst [vmem:[#allocation26_spill] sm:$0xff] %v4343_v17  ;;  %v973_v1 = vsel %vm148_vm4, %v5576_v6, %v2099_v4  ;;  %v5800_v3 = vunpack.i.h.bf16 %v4281_v36 }
 0x2a7   :  { %5796 = vst [vmem:[#allocation25_spill] sm:$0xff] %v4337_v63  ;;  %v968_v24 = vsel %vm148_vm4, %v2098_v50, %v5799_v0  ;;  %1296 = vmatpush.msrb.mxu3 %v973_v1  ;;  %v972_v4 = vsel %vm148_vm4, %v5801_v61, %v2098_v50  ;;  %v5579_v0 = vunpack.i.h.bf16 %v3846_v39  ;;  %v5802_v50 = vunpack.i.h.bf16 %v3911_v5 }
 0x2a8   :  { %1357 = vmatpush.msra.mxu0 %v968_v24  ;;  %v1180_v12 = vsel %vm205_vm0, %v5575_v23, %v5800_v3  ;;  %v4359_v45 = vpop.permute.xlu1 %2236  ;;  %v5580_v23 = vunpack.i.h.bf16 %v4181_v58 }
 0x2a9   :  { %1377 = vmatpush.msra.mxu1 %v1180_v12  ;;  %v5577_v26 = vunpack.i.h.bf16 %v4359_v45  ;;  %v5578_v41 = vunpack.i.l.bf16 %v4359_v45  ;;  %1297 = vmatpush.msrb.mxu3 %v972_v4  ;;  %v2282_v1 = vpop.permute.xlu0 %2281 }
 0x2aa   :  { %1358 = vmatpush.msra.mxu0 %v3559_v40  ;;  %v2284_v24 = vunpack.i.h.bf16 %v2282_v1  ;;  %v2283_v3 = vunpack.i.l.bf16 %v2282_v1  ;;  %v5804_v40 = vunpack.i.l.bf16 %v3911_v5  ;;  %v5808_v5 = vunpack.i.h.bf16 %v4067_v29 }
 0x2ab   :  { %v4370_v6 = vpop.permute.xlu2 %2311  ;;  %v4379_v12 = vsel %vm91_vm7, %v5802_v50, %v5577_v26  ;;  %v5807_v50 = vunpack.i.l.bf16 %v4067_v29  ;;  %v5813_v29 = vunpack.i.l.bf16 %v3846_v39 }
 0x2ac   :  { %1359 = vmatpush.msra.mxu0 %v3565_v14  ;;  %5803 = vst [vmem:[#allocation32_spill] sm:$0xff] %v4379_v12  ;;  %v4387_v61 = vsel %vm91_vm7, %v5804_v40, %v5578_v41  ;;  %v5806_v14 = vunpack.i.h.bf16 %v4072_v44  ;;  %v4406_v40 = vsel %vm110_vm5, %v5808_v5, %v2284_v24  ;;  %v5809_v41 = vunpack.i.l.bf16 %v4181_v58 }
 0x2ad   :  { %5805 = vst [vmem:[#allocation29_spill] sm:$0xff] %v4387_v61  ;;  %v4400_v26 = vsel %vm110_vm5, %v5807_v50, %v2283_v3  ;;  %v5812_v50 = vunpack.i.l.bf16 %v4072_v44  ;;  %v5581_v61 = vunpack.i.h.bf16 %v3806_v48 }
 0x2ae   :  { %v897_v1 = vsel %vm129_vm6, %v5579_v0, %v5806_v14  ;;  %v4412_v4 = vsel %vm110_vm5, %v2283_v3, %v5809_v41  ;;  %v4418_v14 = vsel %vm110_vm5, %v2284_v24, %v5580_v23  ;;  %v5815_v3 = vld [vmem:[#allocation69_spill] sm:$0xff]  ;;  %v5821_v23 = vunpack.i.l.bf16 %v3948_v8 }
 0x2af   :  { %1360 = vmatpush.msra.mxu0 %v897_v1  ;;  %5810 = vst [vmem:[#allocation20_spill] sm:$0xff] %v4412_v4  ;;  %v896_v5 = vsel %vm129_vm6, %v5813_v29, %v5812_v50  ;;  %v5814_v1 = vld [vmem:[#allocation65_spill] sm:$0xff]  ;;  %v5582_v17 = vunpack.i.l.bf16 %v5815_v3  ;;  %v5816_v50 = vunpack.i.h.bf16 %v4006_v56 }
 0x2b0   :  { %5811 = vst [vmem:[#allocation16_spill] sm:$0xff] %v4418_v14  ;;  %v2247_v41 = vpop.permute.xlu1 %2246 }
 0x2b1   :  { %1361 = vmatpush.msra.mxu0 %v896_v5  ;;  %v2249_v63 = vunpack.i.h.bf16 %v2247_v41  ;;  %v2248_v24 = vunpack.i.l.bf16 %v2247_v41  ;;  %v2292_v44 = vpop.permute.xlu0 %2291  ;;  %v825_v29 = vsel %vm110_vm5, %v5581_v61, %v5816_v50  ;;  %v5817_v41 = vld [vmem:[#allocation66_spill] sm:$0xff]  ;;  %v5823_v5 = vunpack.i.h.bf16 %v4125_v31 }
 0x2b2   :  { %v2294_v14 = vunpack.i.h.bf16 %v2292_v44  ;;  %v2293_v4 = vunpack.i.l.bf16 %v2292_v44  ;;  %v5819_v44 = vunpack.i.h.bf16 %v3948_v8  ;;  %v5827_v61 = vunpack.i.h.bf16 %v4243_v38 }
 0x2b3   :  { %1362 = vmatpush.msra.mxu0 %v3505_v52  ;;  %v4439_v12 = vpop.permute.xlu2 %2326  ;;  %v5818_v52 = vunpack.i.h.bf16 %v5817_v41  ;;  %v4456_v50 = vsel %vm110_vm5, %v5821_v23, %v2248_v24  ;;  %v5825_v23 = vunpack.i.l.bf16 %v4231_v22 }
 0x2b4   :  { %v4450_v56 = vsel %vm110_vm5, %v5819_v44, %v2249_v63  ;;  %5822 = vst [vmem:[#allocation48_spill] sm:$0xff] %v4456_v50  ;;  %v5826_v44 = vunpack.i.l.bf16 %v5817_v41  ;;  %v5832_v41 = vunpack.i.l.bf16 %v4439_v12 }
 0x2b5   :  { %1363 = vmatpush.msra.mxu0 %v3511_v55  ;;  %v827_v0 = vsel %vm110_vm5, %v2249_v63, %v5818_v52  ;;  %5820 = vst [vmem:[#allocation17_spill] sm:$0xff] %v4450_v56  ;;  %v4464_v52 = vsel %vm129_vm6, %v5823_v5, %v2294_v14  ;;  %v5824_v63 = vunpack.i.l.bf16 %v4125_v31  ;;  %v4486_v31 = vsel %vm129_vm6, %v2294_v14, %v5827_v61  ;;  %v5831_v55 = vld [vmem:[#allocation60_spill] sm:$0xff] }
 0x2b6   :  { %1270 = vmatpush.msrb.mxu2 %v827_v0  ;;  %v1249_v0 = vsel %vm224_vm2, %v5825_v23, %v5582_v17  ;;  %v826_v5 = vsel %vm110_vm5, %v2248_v24, %v5826_v44  ;;  %5828 = vst [vmem:[#allocation65_spill] sm:$0xff] %v4486_v31  ;;  %v5583_v50 = vunpack.i.h.bf16 %v5831_v55  ;;  %v5833_v24 = vunpack.i.h.bf16 %v5814_v1  ;;  %v5841_v17 = vld [vmem:[#allocation57_spill] sm:$0xff] }
 0x2b7   :  { %v4470_v8 = vsel %vm129_vm6, %v5824_v63, %v2293_v4  ;;  %1364 = vmatpush.msra.mxu0 %v825_v29  ;;  %v5829_v29 = vunpack.i.l.bf16 %v4243_v38  ;;  %v5834_v61 = vunpack.i.h.bf16 %v5815_v3  ;;  %v5835_v14 = vunpack.i.h.bf16 %v4231_v22 }
 0x2b8   :  { %1271 = vmatpush.msrb.mxu2 %v826_v5  ;;  %v1179_v23 = vsel %vm205_vm0, %v5833_v24, %v5832_v41  ;;  %v5836_v44 = vunpack.i.h.bf16 %v3762_v18  ;;  %v5838_v41 = vunpack.i.h.bf16 %v4439_v12  ;;  %v5854_v56 = vunpack.i.h.bf16 %v4305_v59 }
 0x2b9   :  { %v4492_v63 = vsel %vm129_vm6, %v2293_v4, %v5829_v29  ;;  %1432 = vmatpush.msrb.mxu0 %v1249_v0  ;;  %1378 = vmatpush.msra.mxu1 %v1179_v23  ;;  %v1248_v4 = vsel %vm224_vm2, %v5835_v14, %v5834_v61  ;;  %v5837_v0 = vunpack.i.h.bf16 %v4137_v53  ;;  %v4513_v29 = vpop.permute.xlu1 %2256  ;;  %v2302_v61 = vpop.permute.xlu0 %2301  ;;  %v5839_v14 = vunpack.i.l.bf16 %v3762_v18 }
 0x2ba   :  { %5830 = vst [vmem:[#allocation69_spill] sm:$0xff] %v4492_v63  ;;  %v1178_v22 = vsel %vm205_vm0, %v5583_v50, %v5838_v41  ;;  %v2259_v24 = vunpack.i.h.bf16 %v4513_v29  ;;  %v2258_v23 = vunpack.i.l.bf16 %v4513_v29  ;;  %v5842_v63 = vld [vmem:[#allocation62_spill] sm:$0xff]  ;;  %v5844_v50 = vunpack.i.h.bf16 %v4359_v45 }
 0x2bb   :  { %v757_v5 = vsel %vm91_vm7, %v5837_v0, %v5836_v44  ;;  %1433 = vmatpush.msrb.mxu0 %v1248_v4  ;;  %1379 = vmatpush.msra.mxu1 %v1178_v22  ;;  %v5840_v4 = vunpack.i.l.bf16 %v4137_v53  ;;  %v2304_v0 = vunpack.i.h.bf16 %v2302_v61  ;;  %v5843_v41 = vunpack.i.h.bf16 %v5842_v63 }
 0x2bc   :  { %1272 = vmatpush.msrb.mxu2 %v757_v5  ;;  %v2303_v5 = vunpack.i.l.bf16 %v2302_v61  ;;  %v5845_v22 = vunpack.i.h.bf16 %v4013_v37  ;;  %v5847_v53 = vunpack.i.l.bf16 %v4013_v37  ;;  %v5852_v37 = vunpack.i.l.bf16 %v5842_v63 }
 0x2bd   :  { %v756_v44 = vsel %vm91_vm7, %v5840_v4, %v5839_v14  ;;  %v755_v29 = vsel %vm91_vm7, %v5844_v50, %v5843_v41  ;;  %v5849_v14 = vunpack.i.h.bf16 %v4167_v9  ;;  %v5850_v50 = vunpack.i.l.bf16 %v4167_v9  ;;  %v5851_v41 = vld [vmem:[#allocation54_spill] sm:$0xff] }
 0x2be   :  { %1273 = vmatpush.msrb.mxu2 %v756_v44  ;;  %v4540_v18 = vsel %vm129_vm6, %v5845_v22, %v2259_v24  ;;  %v4546_v61 = vsel %vm129_vm6, %v5847_v53, %v2258_v23  ;;  %v5853_v53 = vunpack.i.l.bf16 %v4359_v45  ;;  %v5855_v9 = vunpack.i.l.bf16 %v4305_v59  ;;  %v5856_v22 = vld [vmem:[#allocation51_spill] sm:$0xff] }
 0x2bf   :  { %5846 = vst [vmem:[#allocation66_spill] sm:$0xff] %v4540_v18  ;;  %v4552_v4 = vsel %vm148_vm4, %v5849_v14, %v2304_v0  ;;  %v4558_v44 = vsel %vm148_vm4, %v5850_v50, %v2303_v5  ;;  %v4571_v14 = vsel %vm148_vm4, %v2304_v0, %v5854_v56  ;;  %v5857_v45 = vunpack.i.h.bf16 %v5841_v17  ;;  %v5859_v56 = vld [vmem:[#allocation47_spill] sm:$0xff] }
 0x2c0   :  { %5848 = vst [vmem:[#allocation60_spill] sm:$0xff] %v4546_v61  ;;  %1274 = vmatpush.msrb.mxu2 %v755_v29  ;;  %v754_v29 = vsel %vm91_vm7, %v5853_v53, %v5852_v37  ;;  %v4577_v50 = vsel %vm148_vm4, %v2303_v5, %v5855_v9  ;;  %v5858_v61 = vunpack.i.l.bf16 %v5841_v17  ;;  %v5860_v5 = vunpack.i.h.bf16 %v5851_v41 }
 0x2c1   :  { %v2267_v53 = vpop.permute.xlu1 %2266  ;;  %v4587_v31 = vpop.permute.xlu0 %2316 }
 0x2c2   :  { %1275 = vmatpush.msrb.mxu2 %v754_v29  ;;  %v684_v37 = vsel %vm224_vm2, %v5858_v61, %v5857_v45  ;;  %v2269_v18 = vunpack.i.h.bf16 %v2267_v53  ;;  %v2268_v59 = vunpack.i.l.bf16 %v2267_v53  ;;  %v5861_v29 = vunpack.i.l.bf16 %v5851_v41 }
 0x2c3   :  { %v5594_v63 = vunpack.i.h.bf16 %v4587_v31  ;;  %v5586_v17 = vunpack.i.l.bf16 %v4587_v31  ;;  %v5862_v61 = vunpack.i.h.bf16 %v5856_v22  ;;  %v5863_v45 = vunpack.i.l.bf16 %v5856_v22 }
 0x2c4   :  { %1276 = vmatpush.msrb.mxu2 %v684_v37  ;;  %v666_v9 = vsel %vm205_vm0, %v5861_v29, %v5860_v5  ;;  %v5864_v53 = vunpack.i.h.bf16 %v3535_v30  ;;  %v5865_v41 = vunpack.i.h.bf16 %v4078_v49  ;;  %v5866_v29 = vunpack.i.l.bf16 %v4078_v49 }
 0x2c5   :  { %v648_v37 = vsel %vm186_vm1, %v5863_v45, %v5862_v61  ;;  %v5867_v61 = vunpack.i.l.bf16 %v3886_v46 }
 0x2c6   :  { %1277 = vmatpush.msrb.mxu2 %v666_v9  ;;  %v971_v0 = vsel %vm148_vm4, %v2269_v18, %v5864_v53  ;;  %v4611_v5 = vsel %vm148_vm4, %v5865_v41, %v2269_v18  ;;  %v4617_v9 = vsel %vm148_vm4, %v5866_v29, %v2268_v59  ;;  %v5868_v53 = vunpack.i.h.bf16 %v5859_v56 }
 0x2c7   :  { %1298 = vmatpush.msrb.mxu3 %v971_v0  ;;  %v1247_v45 = vsel %vm224_vm2, %v5867_v61, %v5586_v17  ;;  %v5869_v18 = vunpack.i.l.bf16 %v5859_v56  ;;  %v5870_v41 = vunpack.i.l.bf16 %v3535_v30  ;;  %v5871_v0 = vunpack.i.h.bf16 %v3886_v46 }
 0x2c8   :  { %1278 = vmatpush.msrb.mxu2 %v648_v37  ;;  %1434 = vmatpush.msrb.mxu0 %v1247_v45  ;;  %v5872_v61 = vunpack.i.h.bf16 %v3846_v39  ;;  %v5873_v17 = vunpack.i.h.bf16 %v4243_v38  ;;  %v5875_v46 = vunpack.i.l.bf16 %v3846_v39  ;;  %v5878_v39 = vunpack.i.l.bf16 %v3480_v25 }
 0x2c9   :  { %v630_v49 = vsel %vm167_vm3, %v5869_v18, %v5868_v53  ;;  %v970_v37 = vsel %vm148_vm4, %v2268_v59, %v5870_v41  ;;  %v1246_v29 = vsel %vm224_vm2, %v5871_v0, %v5594_v63  ;;  %v4647_v53 = vpop.permute.xlu1 %2321  ;;  %v5874_v59 = vld [vmem:[#allocation12_spill] sm:$0xff]  ;;  %v4650_v45 = vpop.permute.xlu0 %2331  ;;  %v5876_v18 = vunpack.i.l.bf16 %v4243_v38 }
 0x2ca   :  { %1279 = vmatpush.msrb.mxu2 %v630_v49  ;;  %1299 = vmatpush.msrb.mxu3 %v970_v37  ;;  %v901_v30 = vsel %vm129_vm6, %v5873_v17, %v5872_v61  ;;  %v4659_v41 = vld [vmem:[#allocation7 + $0x8] sm:$0xff]  ;;  %v5877_v17 = vunpack.i.h.bf16 %v3480_v25  ;;  %v5590_v0 = vunpack.i.l.bf16 %v3336_v54  ;;  %v5587_v38 = vunpack.i.l.bf16 %v3909_v15 }
 0x2cb   :  { %1435 = vmatpush.msrb.mxu0 %v1246_v29  ;;  %v900_v49 = vsel %vm129_vm6, %v5876_v18, %v5875_v46  ;;  %v5879_v29 = vld [vmem:[#allocation84_spill] sm:$0xff]  ;;  %v5880_v61 = vunpack.i.h.bf16 %v3806_v48  ;;  %v5882_v46 = vld [vmem:[#allocation78_spill] sm:$0xff]  ;;  %v5608_v63 = vunpack.i.l.bf16 %v4370_v6 }
 0x2cc   :  { %1280 = vmatpush.msrb.mxu2 %v5874_v59  ;;  %1300 = vmatpush.msrb.mxu3 %v901_v30  ;;  %v899_v37 = vsel %vm129_vm6, %v2259_v24, %v5877_v17  ;;  %v5881_v24 = vunpack.i.h.bf16 %v4181_v58  ;;  %v4680_v59 = vld [vmem:[#allocation7] sm:$0xff]  ;;  %v5588_v17 = vunpack.i.l.bf16 %v5782_v28 }
 0x2cd   :  { %1365 = vmatmul.f32.vlgmr.msra.gmra.mxu0 %v4659_v41 }
 0x2ce   :  { %1281 = vmatpush.msrb.mxu2 %v3748_v57  ;;  %1301 = vmatpush.msrb.mxu3 %v900_v49  ;;  %v898_v57 = vsel %vm129_vm6, %v2258_v23, %v5878_v39  ;;  %v829_v30 = vsel %vm110_vm5, %v5881_v24, %v5880_v61  ;;  %v5883_v23 = vunpack.i.h.bf16 %v3336_v54  ;;  %v5885_v61 = vld [vmem:[#allocation67_spill] sm:$0xff]  ;;  %v5886_v24 = vunpack.i.l.bf16 %v4281_v36 }
 0x2d0   :  { %1282 = vmatpush.msrb.mxu2 %v3690_v20  ;;  %1302 = vmatpush.msrb.mxu3 %v899_v37  ;;  %v5589_v20 = vunpack.i.l.bf16 %v3420_v33  ;;  %v1257_v48 = vsel %vm224_vm2, %v5590_v0, %v5883_v23  ;;  %v2314_v37 = vunpack.i.h.bf16 %v4370_v6  ;;  %v5887_v23 = vunpack.i.h.bf16 %v3420_v33 }
 0x2d1   :  { %v4683_v25 = vpop.permute.xlu1 %2336  ;;  %v4695_v49 = vpop.permute.xlu0 %2346 }
 0x2d2   :  { %1283 = vmatpush.msrb.mxu2 %v5879_v29  ;;  %1303 = vmatpush.msrb.mxu3 %v898_v57  ;;  %v5591_v58 = vunpack.i.h.bf16 %v4683_v25  ;;  %v5593_v18 = vunpack.i.l.bf16 %v4683_v25  ;;  %v2348_v39 = vunpack.i.l.bf16 %v4695_v49  ;;  %v5884_v57 = vunpack.i.h.bf16 %v3909_v15 }
 0x2d4   :  { %1284 = vmatpush.msrb.mxu2 %v5882_v46  ;;  %1304 = vmatpush.msrb.mxu3 %v829_v30  ;;  %v1256_v29 = vsel %vm224_vm2, %v5587_v38, %v5884_v57  ;;  %v1177_v30 = vsel %vm205_vm0, %v5886_v24, %v5593_v18  ;;  %v5592_v46 = vunpack.i.l.bf16 %v3941_v27  ;;  %v1109_v57 = vsel %vm186_vm1, %v2314_v37, %v2348_v39 }
 0x2d5   :  { %1285 = vmatmul.f32.vlgmr.msrb.gmra.mxu2 %v4680_v59  ;;  %1305 = vmatmul.f32.vlgmr.msrb.gmra.mxu3 %v4659_v41  ;;  %v5889_v24 = vunpack.i.h.bf16 %v4281_v36  ;;  %v5596_v38 = vunpack.i.l.bf16 %v5794_v35 }
 0x2d6   :  { %1312 = vmatpush.msra.mxu2 %v1257_v48  ;;  %1329 = vmatpush.msra.mxu3 %v4033_v2  ;;  %v5595_v2 = vunpack.i.h.bf16 %v4695_v49  ;;  %v1255_v48 = vsel %vm224_vm2, %v5589_v20, %v5887_v23  ;;  %v5890_v23 = vunpack.i.h.bf16 %v5782_v28  ;;  %v4762_v20 = vpop.permute.xlu2 %2341 }
 0x2d7   :  { %1436 = vmatpush.msrb.mxu0 %v1177_v30  ;;  %v1176_v30 = vsel %vm205_vm0, %v5889_v24, %v5591_v58  ;;  %1380 = vmatpush.msra.mxu1 %v1109_v57  ;;  %v5891_v57 = vunpack.i.h.bf16 %v3941_v27  ;;  %v5892_v58 = vunpack.i.h.bf16 %v5794_v35 }
 0x2d8   :  { %1313 = vmatpush.msra.mxu2 %v1256_v29  ;;  %1330 = vmatpush.msra.mxu3 %v5885_v61  ;;  %v2324_v29 = vunpack.i.h.bf16 %v4647_v53  ;;  %v5888_v61 = vld [vmem:[#allocation68_spill] sm:$0xff] }
 0x2d9   :  { %1437 = vmatpush.msrb.mxu0 %v1176_v30  ;;  %v4748_v24 = vpop.permute.xlu1 %2351  ;;  %v1185_v30 = vsel %vm205_vm0, %v5592_v46, %v5891_v57  ;;  %v1184_v57 = vsel %vm205_vm0, %v5596_v38, %v5892_v58  ;;  %v5894_v46 = vunpack.i.l.bf16 %v4439_v12  ;;  %v5896_v38 = vld [vmem:[#allocation64_spill] sm:$0xff] }
 0x2da   :  { %1314 = vmatpush.msra.mxu2 %v1255_v48  ;;  %1331 = vmatpush.msra.mxu3 %v5888_v61  ;;  %v1254_v48 = vsel %vm224_vm2, %v5588_v17, %v5890_v23  ;;  %v1108_v36 = vsel %vm186_vm1, %v2324_v29, %v5595_v2  ;;  %v5598_v61 = vunpack.i.l.bf16 %v5814_v1  ;;  %v2354_v23 = vunpack.i.h.bf16 %v4748_v24 }
 0x2db   :  { %1381 = vmatpush.msra.mxu1 %v1108_v36  ;;  %v5599_v17 = vunpack.i.l.bf16 %v5831_v55  ;;  %v2334_v36 = vunpack.i.h.bf16 %v4650_v45  ;;  %v5895_v2 = vunpack.i.h.bf16 %v5814_v1 }
 0x2dc   :  { %1315 = vmatpush.msra.mxu2 %v1254_v48  ;;  %1332 = vmatpush.msra.mxu3 %v3956_v19  ;;  %v5597_v19 = vunpack.i.l.bf16 %v4748_v24  ;;  %v4759_v48 = vpop.permute.xlu0 %2361 }
 0x2dd   :  { %v2363_v0 = vunpack.i.l.bf16 %v4759_v48  ;;  %v1183_v58 = vsel %vm205_vm0, %v5598_v61, %v5895_v2  ;;  %v5898_v2 = vunpack.i.h.bf16 %v5831_v55 }
 0x2de   :  { %1316 = vmatpush.msra.mxu2 %v1185_v30  ;;  %1333 = vmatpush.msra.mxu3 %v3962_v60  ;;  %v2364_v30 = vunpack.i.h.bf16 %v4759_v48  ;;  %v5893_v60 = vld [vmem:[#allocation63_spill] sm:$0xff]  ;;  %v1175_v18 = vsel %vm205_vm0, %v5894_v46, %v5597_v19  ;;  %v5603_v19 = vunpack.i.l.bf16 %v4647_v53  ;;  %v5923_v48 = vld [vmem:[#allocation112_spill] sm:$0xff] }
 0x2df   :  { %1438 = vmatpush.msrb.mxu0 %v1175_v18  ;;  %v5897_v18 = vunpack.i.h.bf16 %v4439_v12 }
 0x2e0   :  { %1317 = vmatpush.msra.mxu2 %v1184_v57  ;;  %1334 = vmatpush.msra.mxu3 %v5893_v60  ;;  %v1107_v57 = vsel %vm186_vm1, %v2334_v36, %v2363_v0  ;;  %v2344_v60 = vunpack.i.h.bf16 %v4762_v20 }
 0x2e1   :  { %v1174_v46 = vsel %vm205_vm0, %v5897_v18, %v2354_v23  ;;  %1382 = vmatpush.msra.mxu1 %v1107_v57  ;;  %v5602_v18 = vunpack.i.l.bf16 %v4650_v45  ;;  %v4812_v61 = vpop.permute.xlu1 %2366  ;;  %v1113_v57 = vsel %vm186_vm1, %v5608_v63, %v2314_v37 }
 0x2e2   :  { %1318 = vmatpush.msra.mxu2 %v1183_v58  ;;  %1335 = vmatpush.msra.mxu3 %v5896_v38  ;;  %v1182_v58 = vsel %vm205_vm0, %v5599_v17, %v5898_v2  ;;  %v5899_v38 = vld [vmem:[#allocation61_spill] sm:$0xff]  ;;  %v1106_v12 = vsel %vm186_vm1, %v2344_v60, %v2364_v30  ;;  %v2368_v2 = vunpack.i.l.bf16 %v4812_v61  ;;  %v5901_v17 = vld [vmem:[#allocation55_spill] sm:$0xff] }
 0x2e3   :  { %1439 = vmatpush.msrb.mxu0 %v1174_v46  ;;  %1383 = vmatpush.msra.mxu1 %v1106_v12  ;;  %v2369_v46 = vunpack.i.h.bf16 %v4812_v61  ;;  %v1112_v12 = vsel %vm186_vm1, %v5603_v19, %v2324_v29  ;;  %v5902_v29 = vld [vmem:[#allocation52_spill] sm:$0xff]  ;;  %v5973_v19 = vld [vmem:[#allocation129_spill] sm:$0xff] }
 0x2e4   :  { %1319 = vmatpush.msra.mxu2 %v1182_v58  ;;  %1336 = vmatpush.msra.mxu3 %v5899_v38  ;;  %v5900_v58 = vld [vmem:[#allocation58_spill] sm:$0xff]  ;;  %v5601_v38 = vunpack.i.l.bf16 %v4762_v20  ;;  %v1105_v37 = vsel %vm186_vm1, %v2348_v39, %v2368_v2  ;;  %v5600_v39 = vunpack.i.h.bf16 %v3906_v13 }
 0x2e5   :  { %1384 = vmatpush.msra.mxu1 %v4207_v11  ;;  %1440 = vmatpush.msrb.mxu0 %v1105_v37  ;;  %v1111_v11 = vsel %vm186_vm1, %v5602_v18, %v2334_v36  ;;  %v5904_v36 = vld [vmem:[#allocation13_spill] sm:$0xff]  ;;  %v5906_v37 = vunpack.i.h.bf16 %v3289_v62  ;;  %v5972_v18 = vld [vmem:[#allocation14_spill] sm:$0xff] }
 0x2e6   :  { %1320 = vmatpush.msra.mxu2 %v1113_v57  ;;  %1337 = vmatpush.msra.mxu3 %v5900_v58  ;;  %v4853_v58 = vld [vmem:[#allocation7 + $0x10] sm:$0xff] }
 0x2e7   :  { %1449 = vmatpush.msrb.mxu1 %v4084_v42  ;;  %v1110_v42 = vsel %vm186_vm1, %v5601_v38, %v2344_v60  ;;  %v5907_v60 = vunpack.i.l.bf16 %v3289_v62 }
 0x2e8   :  { %1321 = vmatpush.msra.mxu2 %v1112_v12  ;;  %1338 = vmatpush.msra.mxu3 %v5901_v17  ;;  %v5903_v17 = vunpack.i.h.bf16 %v4695_v49  ;;  %v5905_v12 = vunpack.i.h.bf16 %v4173_v47  ;;  %v5908_v47 = vld [vmem:[#allocation42_spill] sm:$0xff] }
 0x2e9   :  { %1450 = vmatpush.msrb.mxu1 %v3732_v10  ;;  %v4856_v49 = vpop.permute.xlu1 %2381 }
 0x2ea   :  { %1322 = vmatpush.msra.mxu2 %v1111_v11  ;;  %1339 = vmatpush.msra.mxu3 %v5902_v29  ;;  %v1104_v57 = vsel %vm186_vm1, %v5903_v17, %v2369_v46  ;;  %v1041_v10 = vsel %vm167_vm3, %v5600_v39, %v5905_v12  ;;  %v612_v11 = vsel %vm148_vm4, %v5907_v60, %v5906_v37  ;;  %v5609_v29 = vunpack.i.h.bf16 %v4856_v49  ;;  %v5912_v12 = vld [vmem:[#allocation116_spill] sm:$0xff] }
 0x2eb   :  { %1441 = vmatpush.msrb.mxu0 %v1104_v57  ;;  %1451 = vmatpush.msrb.mxu1 %v3740_v21  ;;  %v2383_v21 = vunpack.i.l.bf16 %v4856_v49  ;;  %v5909_v17 = vunpack.i.h.bf16 %v5908_v47  ;;  %v5910_v57 = vunpack.i.l.bf16 %v5908_v47  ;;  %v5916_v47 = vld [vmem:[#allocation75_spill] sm:$0xff] }
 0x2ec   :  { %1323 = vmatpush.msra.mxu2 %v1110_v42  ;;  %1340 = vmatpush.msra.mxu3 %v5904_v36  ;;  %v4881_v42 = vpop.permute.xlu2 %2356  ;;  %v5911_v36 = vld [vmem:[#allocation117_spill] sm:$0xff] }
 0x2ed   :  { %1452 = vmatpush.msrb.mxu1 %v4019_v7  ;;  %v594_v62 = vsel %vm129_vm6, %v5910_v57, %v5909_v17  ;;  %v1103_v7 = vsel %vm186_vm1, %v2363_v0, %v2383_v21  ;;  %v1102_v0 = vsel %vm186_vm1, %v2364_v30, %v5609_v29  ;;  %v5917_v17 = vld [vmem:[#allocation89_spill] sm:$0xff]  ;;  %v5918_v57 = vld [vmem:[#allocation35_spill] sm:$0xff] }
 0x2ee   :  { %1324 = vmatpush.msra.mxu2 %v1041_v10  ;;  %1341 = vmatpush.msra.mxu3 %v612_v11  ;;  %v5913_v10 = vld [vmem:[#allocation39_spill] sm:$0xff]  ;;  %v5924_v30 = vld [vmem:[#allocation109_spill] sm:$0xff] }
 0x2ef   :  { %1706 = vmatmul.msk.f32.vlgmr.msra.gmra.mxu2 %vm1265_vm9, %v4853_v58  ;;  %1453 = vmatpush.msrb.mxu1 %v5912_v12  ;;  %v5914_v37 = vunpack.i.h.bf16 %v5913_v10  ;;  %v5915_v60 = vunpack.i.l.bf16 %v5913_v10  ;;  %v5921_v12 = vld [vmem:[#allocation76_spill] sm:$0xff]  ;;  %v5922_v10 = vld [vmem:[#allocation90_spill] sm:$0xff] }
 0x2f0   :  { %1389 = vmatpush.msrb.mxu2 %v5911_v36  ;;  %1342 = vmatpush.msra.mxu3 %v594_v62  ;;  %v5919_v62 = vunpack.i.h.bf16 %v5918_v57  ;;  %v5920_v36 = vunpack.i.l.bf16 %v5918_v57  ;;  %v5930_v57 = vld [vmem:[#allocation106_spill] sm:$0xff] }
 0x2f1   :  { %1442 = vmatpush.msrb.mxu0 %v1103_v7  ;;  %v576_v11 = vsel %vm110_vm5, %v5915_v60, %v5914_v37  ;;  %1454 = vmatpush.msrb.mxu1 %v5917_v17  ;;  %v5925_v37 = vld [vmem:[#allocation113_spill] sm:$0xff]  ;;  %v5929_v17 = vld [vmem:[#allocation70_spill] sm:$0xff] }
 0x2f2   :  { %1390 = vmatpush.msrb.mxu2 %v5916_v47  ;;  %1343 = vmatpush.msra.mxu3 %v576_v11  ;;  %v558_v7 = vsel %vm91_vm7, %v5920_v36, %v5919_v62  ;;  %v5926_v60 = vld [vmem:[#allocation105_spill] sm:$0xff]  ;;  %v5927_v11 = vld [vmem:[#allocation107_spill] sm:$0xff]  ;;  %v5935_v36 = vld [vmem:[#allocation98_spill] sm:$0xff] }
 0x2f3   :  { %1443 = vmatpush.msrb.mxu0 %v1102_v0  ;;  %1455 = vmatpush.msrb.mxu1 %v5922_v10  ;;  %v5928_v0 = vld [vmem:[#allocation114_spill] sm:$0xff]  ;;  %v5933_v62 = vld [vmem:[#allocation71_spill] sm:$0xff] }
 0x2f4   :  { %1391 = vmatpush.msrb.mxu2 %v5921_v12  ;;  %1344 = vmatpush.msra.mxu3 %v558_v7  ;;  %v4922_v47 = vpop.permute.xlu2 %2371  ;;  %v5936_v7 = vld [vmem:[#allocation59_spill] sm:$0xff] }
 0x2f5   :  { %1345 = vmatmul.f32.vlgmr.msra.gmra.mxu3 %v4680_v59  ;;  %1444 = vmatpush.msrb.mxu0 %v4258_v34  ;;  %v5932_v34 = vld [vmem:[#allocation115_spill] sm:$0xff]  ;;  %v5937_v12 = vunpack.i.h.bf16 %v5936_v7  ;;  %v5938_v10 = vunpack.i.l.bf16 %v5936_v7  ;;  %v5950_v7 = vld [vmem:[#allocation53_spill] sm:$0xff] }
 0x2f6   :  { %1392 = vmatpush.msrb.mxu2 %v5923_v48  ;;  %1409 = vmatpush.msrb.mxu3 %v4252_v51  ;;  %v5931_v51 = vld [vmem:[#allocation102_spill] sm:$0xff] }
 0x2f7   :  { %1456 = vmatpush.msrb.mxu1 %v5924_v30  ;;  %1509 = vmatpush.msra.mxu0 %v4400_v26  ;;  %v5934_v26 = vld [vmem:[#allocation30_spill] sm:$0xff]  ;;  %v682_v48 = vsel %vm224_vm2, %v5938_v10, %v5937_v12  ;;  %v5939_v30 = vld [vmem:[#allocation31_spill] sm:$0xff]  ;;  %v5951_v12 = vunpack.i.h.bf16 %v5950_v7  ;;  %v5952_v10 = vunpack.i.l.bf16 %v5950_v7 }
 0x2f8   :  { %1393 = vmatpush.msrb.mxu2 %v5925_v37  ;;  %1410 = vmatpush.msrb.mxu3 %v5926_v60  ;;  %v5940_v37 = vld [vmem:[#allocation15_spill] sm:$0xff]  ;;  %v5941_v60 = vld [vmem:[#allocation56_spill] sm:$0xff] }
 0x2f9   :  { %1457 = vmatpush.msrb.mxu1 %v5927_v11  ;;  %1510 = vmatpush.msra.mxu0 %v5928_v0  ;;  %v5942_v11 = vunpack.i.h.bf16 %v5941_v60 }
 0x2fa   :  { %1394 = vmatpush.msrb.mxu2 %v5929_v17  ;;  %1411 = vmatpush.msrb.mxu3 %v5930_v57  ;;  %v5944_v17 = vld [vmem:[#allocation108_spill] sm:$0xff] }
 0x2fb   :  { %1458 = vmatpush.msrb.mxu1 %v5931_v51  ;;  %1511 = vmatpush.msra.mxu0 %v5932_v34  ;;  %v5606_v57 = vunpack.i.h.bf16 %v5944_v17  ;;  %v5945_v51 = vld [vmem:[#allocation21_spill] sm:$0xff]  ;;  %v5946_v34 = vld [vmem:[#allocation46_spill] sm:$0xff] }
 0x2fc   :  { %1395 = vmatpush.msrb.mxu2 %v5933_v62  ;;  %1412 = vmatpush.msrb.mxu3 %v5934_v26  ;;  %v5947_v62 = vunpack.i.h.bf16 %v5946_v34  ;;  %v5948_v26 = vunpack.i.l.bf16 %v5946_v34  ;;  %v4973_v34 = vpop.permute.xlu2 %2386 }
 0x2fd   :  { %1459 = vmatpush.msrb.mxu1 %v5935_v36  ;;  %1512 = vmatpush.msra.mxu0 %v4324_v16  ;;  %v5943_v16 = vunpack.i.l.bf16 %v5941_v60  ;;  %v5954_v60 = vld [vmem:[#allocation18_spill] sm:$0xff] }
 0x2fe   :  { %1707 = vmatmul.msk.f32.vlgmr.msra.gmra.mxu1 %vm1265_vm9, %v4853_v58  ;;  %1396 = vmatpush.msrb.mxu2 %v682_v48  ;;  %v610_v36 = vsel %vm148_vm4, %v5948_v26, %v5947_v62  ;;  %v646_v48 = vsel %vm186_vm1, %v5952_v10, %v5951_v12  ;;  %v5958_v62 = vld [vmem:[#allocation111_spill] sm:$0xff]  ;;  %v5959_v26 = vld [vmem:[#allocation50_spill] sm:$0xff] }
 0x2ff   :  { %1413 = vmatpush.msrb.mxu3 %v5939_v30  ;;  %1460 = vmatpush.msrb.mxu1 %v5940_v37  ;;  %v664_v0 = vsel %vm205_vm0, %v5943_v16, %v5942_v11  ;;  %v5953_v30 = vld [vmem:[#allocation104_spill] sm:$0xff]  ;;  %v5962_v12 = vld [vmem:[#allocation99_spill] sm:$0xff] }
 0x300   :  { %1513 = vmatpush.msra.mxu0 %v4330_v43  ;;  %1397 = vmatpush.msrb.mxu2 %v664_v0  ;;  %v5949_v43 = vld [vmem:[#allocation110_spill] sm:$0xff]  ;;  %v5605_v37 = vunpack.i.h.bf16 %v5953_v30  ;;  %v5955_v11 = vld [vmem:[#allocation44_spill] sm:$0xff]  ;;  %v5604_v10 = vunpack.i.h.bf16 %v5962_v12 }
 0x301   :  { %1414 = vmatpush.msrb.mxu3 %v5945_v51  ;;  %1461 = vmatpush.msrb.mxu1 %v610_v36  ;;  %v5956_v16 = vunpack.i.h.bf16 %v5955_v11  ;;  %v5957_v0 = vunpack.i.l.bf16 %v5955_v11  ;;  %v5960_v36 = vunpack.i.h.bf16 %v5959_v26  ;;  %v5963_v11 = vld [vmem:[#allocation128_spill] sm:$0xff] }
 0x302   :  { %1514 = vmatpush.msra.mxu0 %v5949_v43  ;;  %1398 = vmatpush.msrb.mxu2 %v646_v48  ;;  %v5961_v43 = vunpack.i.l.bf16 %v5959_v26  ;;  %v2374_v48 = vunpack.i.h.bf16 %v4922_v47  ;;  %v5967_v26 = vunpack.i.l.bf16 %v5944_v17 }
 0x303   :  { %1415 = vmatpush.msrb.mxu3 %v5954_v60  ;;  %v592_v51 = vsel %vm129_vm6, %v5957_v0, %v5956_v16  ;;  %v4984_v60 = vpop.permute.xlu0 %2376  ;;  %v5964_v16 = vld [vmem:[#allocation41_spill] sm:$0xff]  ;;  %1708 = vmatmul.msk.f32.vlgmr.msrb.gmra.mxu0 %vm1265_vm9, %v4853_v58 }
 0x304   :  { %1462 = vmatpush.msrb.mxu1 %v592_v51  ;;  %1515 = vmatpush.msra.mxu0 %v5958_v62  ;;  %v628_v7 = vsel %vm167_vm3, %v5961_v43, %v5960_v36  ;;  %v5965_v0 = vunpack.i.h.bf16 %v5964_v16  ;;  %v5966_v51 = vunpack.i.l.bf16 %v5964_v16  ;;  %v680_v36 = vsel %vm224_vm2, %v5967_v26, %v5606_v57  ;;  %v5968_v43 = vld [vmem:[#allocation38_spill] sm:$0xff]  ;;  %v5971_v16 = vld [vmem:[#allocation95_spill] sm:$0xff] }
 0x305   :  { %1399 = vmatpush.msrb.mxu2 %v628_v7  ;;  %1416 = vmatpush.msrb.mxu3 %v5963_v11  ;;  %v5969_v7 = vunpack.i.h.bf16 %v5968_v43  ;;  %v5970_v11 = vunpack.i.l.bf16 %v5968_v43  ;;  %v5607_v38 = vunpack.i.h.bf16 %v5971_v16  ;;  %v2389_v43 = vunpack.i.h.bf16 %v4973_v34  ;;  %v5985_v57 = vld [vmem:[#allocation123_spill] sm:$0xff] }
 0x306   :  { %v574_v62 = vsel %vm110_vm5, %v5966_v51, %v5965_v0  ;;  %1516 = vmatpush.msra.mxu0 %v680_v36  ;;  %v2358_v0 = vunpack.i.l.bf16 %v4881_v42  ;;  %v2388_v51 = vunpack.i.l.bf16 %v4973_v34  ;;  %v2359_v36 = vunpack.i.h.bf16 %v4881_v42 }
 0x307   :  { %1463 = vmatpush.msrb.mxu1 %v574_v62  ;;  %v556_v39 = vsel %vm91_vm7, %v5970_v11, %v5969_v7  ;;  %1400 = vmatpush.msrb.mxu2 %v5972_v18  ;;  %v5974_v62 = vunpack.i.l.bf16 %v5953_v30  ;;  %v5975_v7 = vld [vmem:[#allocation49_spill] sm:$0xff]  ;;  %v5976_v11 = vld [vmem:[#allocation87_spill] sm:$0xff]  ;;  %v5977_v18 = vunpack.i.l.bf16 %v5962_v12  ;;  %v2373_v42 = vunpack.i.l.bf16 %v4922_v47 }
 0x308   :  { %1417 = vmatpush.msrb.mxu3 %v5973_v19  ;;  %v1024_v19 = vsel %vm167_vm3, %v2358_v0, %v2374_v48  ;;  %v2378_v29 = vunpack.i.l.bf16 %v4984_v60  ;;  %v6007_v47 = vld [vmem:[#allocation81_spill] sm:$0xff] }
 0x309   :  { %v662_v26 = vsel %vm205_vm0, %v5974_v62, %v5605_v37  ;;  %1464 = vmatpush.msrb.mxu1 %v556_v39  ;;  %1401 = vmatpush.msrb.mxu2 %v5975_v7  ;;  %v644_v39 = vsel %vm186_vm1, %v5977_v18, %v5604_v10  ;;  %v5978_v62 = vld [vmem:[#allocation45_spill] sm:$0xff]  ;;  %v1023_v7 = vsel %vm167_vm3, %v2359_v36, %v2388_v51  ;;  %v5984_v37 = vld [vmem:[#allocation40_spill] sm:$0xff] }
 0x30a   :  { %1517 = vmatpush.msra.mxu0 %v662_v26  ;;  %1418 = vmatpush.msrb.mxu3 %v5976_v11  ;;  %v5979_v26 = vld [vmem:[#allocation88_spill] sm:$0xff]  ;;  %v5980_v11 = vunpack.i.l.bf16 %v5971_v16 }
 0x30b   :  { %1529 = vmatpush.msra.mxu1 %v1024_v19  ;;  %1402 = vmatpush.msrb.mxu2 %v5978_v62  ;;  %v5981_v19 = vld [vmem:[#allocation43_spill] sm:$0xff]  ;;  %v1022_v62 = vsel %vm167_vm3, %v2373_v42, %v2389_v43  ;;  %v5050_v10 = vpop.permute.xlu0 %2391 }
 0x30c   :  { %1518 = vmatpush.msra.mxu0 %v644_v39  ;;  %1419 = vmatpush.msrb.mxu3 %v5979_v26  ;;  %v626_v18 = vsel %vm167_vm3, %v5980_v11, %v5607_v38  ;;  %v5982_v39 = vld [vmem:[#allocation122_spill] sm:$0xff]  ;;  %v5983_v26 = vld [vmem:[#allocation36_spill] sm:$0xff]  ;;  %v5989_v38 = vld [vmem:[#allocation93_spill] sm:$0xff] }
 0x30d   :  { %1530 = vmatpush.msra.mxu1 %v1023_v7  ;;  %1403 = vmatpush.msrb.mxu2 %v5981_v19  ;;  %v5986_v7 = vld [vmem:[#allocation132_spill] sm:$0xff]  ;;  %v5988_v19 = vld [vmem:[#allocation73_spill] sm:$0xff] }
 0x30e   :  { %1519 = vmatpush.msra.mxu0 %v626_v18  ;;  %1420 = vmatpush.msrb.mxu3 %v5982_v39  ;;  %v5987_v11 = vunpack.i.l.bf16 %v5986_v7  ;;  %v5059_v39 = vpop.permute.xlu1 %2396 }
 0x30f   :  { %1531 = vmatpush.msra.mxu1 %v1022_v62  ;;  %1404 = vmatpush.msrb.mxu2 %v5984_v37  ;;  %v5990_v62 = vld [vmem:[#allocation82_spill] sm:$0xff] }
 0x310   :  { %1520 = vmatpush.msra.mxu0 %v5983_v26  ;;  %1421 = vmatpush.msrb.mxu3 %v5985_v57  ;;  %v1028_v18 = vsel %vm167_vm3, %v5987_v11, %v2358_v0  ;;  %v5991_v26 = vld [vmem:[#allocation103_spill] sm:$0xff]  ;;  %v5993_v57 = vld [vmem:[#allocation72_spill] sm:$0xff] }
 0x311   :  { %1532 = vmatpush.msra.mxu1 %v5988_v19  ;;  %1469 = vmatpush.msra.mxu2 %v1028_v18  ;;  %v5992_v63 = vunpack.i.h.bf16 %v5991_v26  ;;  %v5994_v0 = vld [vmem:[#allocation91_spill] sm:$0xff]  ;;  %v5996_v18 = vunpack.i.l.bf16 %v5991_v26  ;;  %v6001_v26 = vld [vmem:[#allocation33_spill] sm:$0xff] }
 0x312   :  { %1521 = vmatpush.msra.mxu0 %v5989_v38  ;;  %1422 = vmatpush.msrb.mxu3 %v5990_v62  ;;  %v5995_v11 = vld [vmem:[#allocation83_spill] sm:$0xff]  ;;  %v5998_v62 = vld [vmem:[#allocation85_spill] sm:$0xff] }
 0x313   :  { %v1027_v37 = vsel %vm167_vm3, %v5992_v63, %v2359_v36  ;;  %1533 = vmatpush.msra.mxu1 %v5993_v57  ;;  %v1026_v38 = vsel %vm167_vm3, %v5996_v18, %v2373_v42  ;;  %v5997_v19 = vld [vmem:[#allocation27_spill] sm:$0xff]  ;;  %v5999_v63 = vld [vmem:[#allocation118_spill] sm:$0xff]  ;;  %v2379_v36 = vunpack.i.h.bf16 %v4984_v60  ;;  %1405 = vmatmul.f32.vlgmr.msrb.gmra.mxu2 %v4680_v59  ;;  %v5081_v57 = vpop.permute.xlu2 %2401  ;;  %v6002_v42 = vunpack.i.l.bf16 %v5815_v3 }
 0x314   :  { %1470 = vmatpush.msra.mxu2 %v1027_v37  ;;  %1522 = vmatpush.msra.mxu0 %v5994_v0  ;;  %v6000_v37 = vld [vmem:[#allocation23_spill] sm:$0xff] }
 0x315   :  { %1423 = vmatpush.msrb.mxu3 %v5995_v11  ;;  %1534 = vmatpush.msra.mxu1 %v5997_v19  ;;  %v1245_v0 = vsel %vm224_vm2, %v6002_v42, %v2378_v29  ;;  %v2393_v11 = vunpack.i.l.bf16 %v5050_v10  ;;  %v6003_v18 = vld [vmem:[#allocation79_spill] sm:$0xff]  ;;  %v6004_v19 = vunpack.i.l.bf16 %v3906_v13 }
 0x316   :  { %1471 = vmatpush.msra.mxu2 %v1026_v38  ;;  %1523 = vmatpush.msra.mxu0 %v5998_v62  ;;  %v5093_v38 = vpop.permute.xlu0 %2406 }
 0x317   :  { %1424 = vmatpush.msrb.mxu3 %v5999_v63  ;;  %1535 = vmatpush.msra.mxu1 %v6000_v37  ;;  %v1044_v62 = vsel %vm167_vm3, %v2374_v48, %v6004_v19  ;;  %v2394_v63 = vunpack.i.h.bf16 %v5050_v10  ;;  %v6005_v37 = vld [vmem:[#allocation34_spill] sm:$0xff]  ;;  %v2408_v34 = vunpack.i.l.bf16 %v5093_v38 }
 0x318   :  { %1425 = vmatmul.f32.vlgmr.msrb.gmra.mxu3 %v4659_v41  ;;  %1472 = vmatpush.msra.mxu2 %v6001_v26  ;;  %v6006_v26 = vunpack.i.h.bf16 %v5815_v3  ;;  %v6009_v19 = vld [vmem:[#allocation22_spill] sm:$0xff]  ;;  %v6010_v3 = vunpack.i.l.bf16 %v4587_v31 }
 0x319   :  { %1492 = vmatpush.msra.mxu3 %v1245_v0  ;;  %1524 = vmatpush.msra.mxu0 %v6003_v18  ;;  %v6008_v0 = vunpack.i.h.bf16 %v6007_v47  ;;  %v2398_v18 = vunpack.i.l.bf16 %v5059_v39 }
 0x31a   :  { %1536 = vmatpush.msra.mxu1 %v4552_v4  ;;  %1473 = vmatpush.msra.mxu2 %v6005_v37  ;;  %v1244_v42 = vsel %vm224_vm2, %v6006_v26, %v2379_v36  ;;  %v5112_v4 = vpop.permute.xlu1 %2411  ;;  %v6012_v37 = vunpack.i.l.bf16 %v6007_v47  ;;  %v2399_v26 = vunpack.i.h.bf16 %v5059_v39  ;;  %v6016_v47 = vld [vmem:[#allocation74_spill] sm:$0xff] }
 0x31b   :  { %1589 = vmatpush.msrb.mxu0 %v1044_v62  ;;  %1493 = vmatpush.msra.mxu3 %v1244_v42  ;;  %v1043_v48 = vsel %vm167_vm3, %v2388_v51, %v6008_v0  ;;  %v1243_v62 = vsel %vm224_vm2, %v6010_v3, %v2393_v11  ;;  %v6013_v42 = vld [vmem:[#allocation19_spill] sm:$0xff]  ;;  %v6014_v0 = vunpack.i.h.bf16 %v4587_v31  ;;  %v6018_v3 = vunpack.i.l.bf16 %v4683_v25  ;;  %v5154_v31 = vpop.permute.xlu2 %2416 }
 0x31c   :  { %1537 = vmatpush.msra.mxu1 %v4558_v44  ;;  %1474 = vmatpush.msra.mxu2 %v6009_v19  ;;  %v6011_v44 = vld [vmem:[#allocation124_spill] sm:$0xff]  ;;  %v1042_v51 = vsel %vm167_vm3, %v2389_v43, %v6012_v37  ;;  %v6015_v19 = vld [vmem:[#allocation125_spill] sm:$0xff]  ;;  %v6017_v43 = vld [vmem:[#allocation130_spill] sm:$0xff]  ;;  %v2414_v61 = vunpack.i.h.bf16 %v5112_v4 }
 0x31d   :  { %1590 = vmatpush.msrb.mxu0 %v1043_v48  ;;  %1494 = vmatpush.msra.mxu3 %v1243_v62  ;;  %v1242_v48 = vsel %vm224_vm2, %v6014_v0, %v2394_v63  ;;  %v1173_v62 = vsel %vm205_vm0, %v6018_v3, %v2398_v18  ;;  %v6019_v37 = vld [vmem:[#allocation77_spill] sm:$0xff] }
 0x31e   :  { %1538 = vmatpush.msra.mxu1 %v6011_v44  ;;  %1475 = vmatpush.msra.mxu2 %v6013_v42  ;;  %v2409_v44 = vunpack.i.h.bf16 %v5093_v38  ;;  %v6021_v42 = vunpack.i.h.bf16 %v4683_v25 }
 0x31f   :  { %1591 = vmatpush.msrb.mxu0 %v1042_v51  ;;  %1495 = vmatpush.msra.mxu3 %v1242_v48  ;;  %v6020_v51 = vld [vmem:[#allocation131_spill] sm:$0xff]  ;;  %v5166_v48 = vpop.permute.xlu0 %2421 }
 0x320   :  { %1539 = vmatpush.msra.mxu1 %v6015_v19  ;;  %1476 = vmatpush.msra.mxu2 %v6017_v43  ;;  %v1172_v0 = vsel %vm205_vm0, %v6021_v42, %v2399_v26  ;;  %v6022_v19 = vld [vmem:[#allocation28_spill] sm:$0xff]  ;;  %v6024_v43 = vunpack.i.l.bf16 %v4748_v24  ;;  %v1170_v42 = vsel %vm205_vm0, %v2354_v23, %v2409_v44  ;;  %v2404_v23 = vunpack.i.h.bf16 %v5081_v57 }
 0x321   :  { %1592 = vmatpush.msrb.mxu0 %v6016_v47  ;;  %1496 = vmatpush.msra.mxu3 %v1173_v62  ;;  %v6023_v47 = vld [vmem:[#allocation100_spill] sm:$0xff]  ;;  %v6025_v62 = vld [vmem:[#allocation119_spill] sm:$0xff] }
 0x322   :  { %1540 = vmatpush.msra.mxu1 %v4464_v52  ;;  %1477 = vmatpush.msra.mxu2 %v6020_v51  ;;  %v2418_v52 = vunpack.i.l.bf16 %v5154_v31  ;;  %v1171_v25 = vsel %vm205_vm0, %v6024_v43, %v2408_v34  ;;  %v5178_v3 = vpop.permute.xlu1 %2426  ;;  %v6027_v51 = vld [vmem:[#allocation101_spill] sm:$0xff]  ;;  %v6029_v43 = vld [vmem:[#allocation126_spill] sm:$0xff] }
 0x323   :  { %1593 = vmatpush.msrb.mxu0 %v6019_v37  ;;  %1497 = vmatpush.msra.mxu3 %v1172_v0  ;;  %v6026_v37 = vld [vmem:[#allocation24_spill] sm:$0xff]  ;;  %v2403_v0 = vunpack.i.l.bf16 %v5081_v57 }
 0x324   :  { %1541 = vmatpush.msra.mxu1 %v4470_v8  ;;  %1478 = vmatpush.msra.mxu2 %v6023_v47  ;;  %v2419_v8 = vunpack.i.h.bf16 %v5154_v31  ;;  %v2428_v47 = vunpack.i.l.bf16 %v5178_v3  ;;  %v1101_v24 = vsel %vm186_vm1, %v2368_v2, %v2418_v52  ;;  %v2413_v2 = vunpack.i.l.bf16 %v5112_v4  ;;  %v5240_v4 = vpop.permute.xlu2 %2431 }
 0x325   :  { %1594 = vmatpush.msrb.mxu0 %v6022_v19  ;;  %1498 = vmatpush.msra.mxu3 %v1171_v25  ;;  %v6028_v19 = vld [vmem:[#allocation120_spill] sm:$0xff]  ;;  %v2429_v25 = vunpack.i.h.bf16 %v5178_v3  ;;  %v6070_v31 = vunpack.i.h.bf16 %v5971_v16 }
 0x326   :  { %1542 = vmatpush.msra.mxu1 %v6025_v62  ;;  %1479 = vmatpush.msra.mxu2 %v6027_v51  ;;  %v6030_v62 = vld [vmem:[#allocation127_spill] sm:$0xff]  ;;  %v1239_v60 = vsel %vm224_vm2, %v2393_v11, %v2413_v2  ;;  %v6073_v16 = vld [vmem:[#allocation92_spill] sm:$0xff] }
 0x327   :  { %1595 = vmatpush.msrb.mxu0 %v6026_v37  ;;  %1499 = vmatpush.msra.mxu3 %v1170_v42  ;;  %v6032_v37 = vld [vmem:[#allocation96_spill] sm:$0xff]  ;;  %v2423_v42 = vunpack.i.l.bf16 %v5166_v48 }
 0x328   :  { %1543 = vmatpush.msra.mxu1 %v6028_v19  ;;  %1480 = vmatpush.msra.mxu2 %v6029_v43  ;;  %v6035_v19 = vld [vmem:[#allocation97_spill] sm:$0xff]  ;;  %v6075_v3 = vld [vmem:[#allocation80_spill] sm:$0xff] }
 0x329   :  { %1596 = vmatpush.msrb.mxu0 %v4571_v14  ;;  %1500 = vmatpush.msra.mxu3 %v1101_v24  ;;  %v1100_v14 = vsel %vm186_vm1, %v2369_v46, %v2419_v8  ;;  %v5226_v46 = vpop.permute.xlu0 %1012  ;;  %v1169_v10 = vsel %vm205_vm0, %v2398_v18, %v2423_v42 }
 0x32a   :  { %1544 = vmatpush.msra.mxu1 %v4406_v40  ;;  %1481 = vmatpush.msra.mxu2 %v6030_v62  ;;  %v6031_v40 = vunpack.i.l.bf16 %v3336_v54  ;;  %v6033_v54 = vunpack.i.l.bf16 %v3909_v15  ;;  %v6036_v15 = vunpack.i.l.bf16 %v3420_v33  ;;  %v6040_v62 = vunpack.i.l.bf16 %v5782_v28 }
 0x32b   :  { %1597 = vmatpush.msrb.mxu0 %v4577_v50  ;;  %1465 = vmatmul.f32.vlgmr.msrb.gmra.mxu1 %v4680_v59  ;;  %v1099_v50 = vsel %vm186_vm1, %v2383_v21, %v2428_v47 }
 0x32c   :  { %1501 = vmatpush.msra.mxu3 %v1100_v14  ;;  %v1261_v57 = vsel %vm224_vm2, %v2403_v0, %v6031_v40  ;;  %1482 = vmatpush.msra.mxu2 %v6032_v37  ;;  %v1260_v51 = vsel %vm224_vm2, %v2404_v23, %v6033_v54  ;;  %v1259_v43 = vsel %vm224_vm2, %v2413_v2, %v6036_v15  ;;  %v6039_v14 = vld [vmem:[#allocation121_spill] sm:$0xff]  ;;  %v2424_v40 = vunpack.i.h.bf16 %v5166_v48 }
 0x32d   :  { %1612 = vmatpush.msrb.mxu1 %v1261_v57  ;;  %1598 = vmatpush.msrb.mxu0 %v4611_v5  ;;  %v6034_v5 = vunpack.i.h.bf16 %v4856_v49  ;;  %v6038_v49 = vunpack.i.h.bf16 %v5986_v7  ;;  %v1258_v33 = vsel %vm224_vm2, %v2414_v61, %v6040_v62  ;;  %v1241_v7 = vsel %vm224_vm2, %v2378_v29, %v2403_v0  ;;  %v6041_v57 = vld [vmem:[#allocation20_spill] sm:$0xff]  ;;  %v6043_v54 = vld [vmem:[#allocation69_spill] sm:$0xff]  ;;  %v6045_v0 = vld [vmem:[#allocation66_spill] sm:$0xff] }
 0x32e   :  { %1502 = vmatpush.msra.mxu3 %v1099_v50  ;;  %1483 = vmatpush.msra.mxu2 %v6035_v19  ;;  %v6042_v50 = vunpack.i.l.bf16 %v3941_v27  ;;  %v2433_v37 = vunpack.i.l.bf16 %v5240_v4  ;;  %v1240_v48 = vsel %vm224_vm2, %v2379_v36, %v2404_v23  ;;  %v2434_v27 = vunpack.i.h.bf16 %v5240_v4  ;;  %v6044_v29 = vld [vmem:[#allocation17_spill] sm:$0xff]  ;;  %v6047_v23 = vld [vmem:[#allocation48_spill] sm:$0xff] }
 0x32f   :  { %1613 = vmatpush.msrb.mxu1 %v1260_v51  ;;  %1599 = vmatpush.msrb.mxu0 %v4617_v9  ;;  %v1098_v21 = vsel %vm186_vm1, %v6034_v5, %v2429_v25  ;;  %v6037_v9 = vld [vmem:[#allocation65_spill] sm:$0xff]  ;;  %v1029_v24 = vsel %vm167_vm3, %v6038_v49, %v5226_v46  ;;  %v2437_v51 = vpop.permute.xlu1 %2436  ;;  %v6046_v5 = vunpack.i.l.bf16 %v5794_v35  ;;  %v6048_v4 = vld [vmem:[#allocation60_spill] sm:$0xff]  ;;  %v6049_v19 = vunpack.i.l.bf16 %v5814_v1 }
 0x330   :  { %1503 = vmatpush.msra.mxu3 %v1098_v21  ;;  %1484 = vmatpush.msra.mxu2 %v6039_v14  ;;  %v1189_v28 = vsel %vm205_vm0, %v2423_v42, %v6042_v50  ;;  %v2438_v36 = vunpack.i.l.bf16 %v2437_v51  ;;  %v1238_v15 = vsel %vm224_vm2, %v2394_v63, %v2414_v61  ;;  %v2439_v11 = vunpack.i.h.bf16 %v2437_v51  ;;  %v6050_v2 = vld [vmem:[#allocation25_spill] sm:$0xff]  ;;  %v6053_v61 = vld [vmem:[#allocation26_spill] sm:$0xff]  ;;  %v6055_v42 = vld [vmem:[#allocation32_spill] sm:$0xff] }
 0x331   :  { %1614 = vmatpush.msrb.mxu1 %v1259_v43  ;;  %1600 = vmatpush.msrb.mxu0 %v6037_v9  ;;  %v1188_v21 = vsel %vm205_vm0, %v2424_v40, %v6046_v5  ;;  %v1187_v35 = vsel %vm205_vm0, %v2433_v37, %v6049_v19  ;;  %v2442_v43 = vpop.permute.xlu2 %2441  ;;  %v6051_v9 = vld [vmem:[#allocation16_spill] sm:$0xff]  ;;  %v6052_v49 = vunpack.i.l.bf16 %v5831_v55  ;;  %v1168_v55 = vsel %vm205_vm0, %v2399_v26, %v2424_v40  ;;  %v6057_v26 = vld [vmem:[#allocation29_spill] sm:$0xff] }
 0x332   :  { %1504 = vmatpush.msra.mxu3 %v1029_v24  ;;  %1485 = vmatmul.f32.vlgmr.msra.gmra.mxu2 %v4659_v41  ;;  %v2443_v63 = vunpack.i.l.bf16 %v2442_v43  ;;  %v6054_v24 = vunpack.i.l.bf16 %v4370_v6  ;;  %v2444_v18 = vunpack.i.h.bf16 %v2442_v43  ;;  %v6056_v62 = vunpack.i.l.bf16 %v4647_v53 }
 0x333   :  { %1615 = vmatpush.msrb.mxu1 %v1258_v33  ;;  %1552 = vmatpush.msrb.mxu2 %v1241_v7  ;;  %v1186_v1 = vsel %vm205_vm0, %v2434_v27, %v6052_v49  ;;  %v1167_v39 = vsel %vm205_vm0, %v2408_v34, %v2433_v37  ;;  %v6058_v33 = vunpack.i.l.bf16 %v4650_v45  ;;  %v1166_v53 = vsel %vm205_vm0, %v2409_v44, %v2434_v27  ;;  %v1021_v7 = vpop.permute.xlu0 %1020  ;;  %v6059_v34 = vld [vmem:[#allocation57_spill] sm:$0xff]  ;;  %v6063_v44 = vld [vmem:[#allocation54_spill] sm:$0xff] }
 0x334   :  { %1569 = vmatpush.msrb.mxu3 %v6041_v57  ;;  %1601 = vmatpush.msrb.mxu0 %v6043_v54  ;;  %v1117_v14 = vsel %vm186_vm1, %v2438_v36, %v6054_v24  ;;  %v1116_v6 = vsel %vm186_vm1, %v2439_v11, %v6056_v62  ;;  %v6060_v57 = vunpack.i.l.bf16 %v6059_v34  ;;  %v6061_v50 = vunpack.i.h.bf16 %v5944_v17 }
 0x335   :  { %1616 = vmatpush.msrb.mxu1 %v1189_v28  ;;  %1709 = vmatmul.msk.f32.vlgmr.msra.gmra.mxu3 %vm1265_vm9, %v4853_v58  ;;  %v1115_v40 = vsel %vm186_vm1, %v2443_v63, %v6058_v33  ;;  %v6062_v45 = vunpack.i.l.bf16 %v4762_v20  ;;  %v1097_v38 = vsel %vm186_vm1, %v2418_v52, %v2438_v36  ;;  %v6064_v54 = vunpack.i.l.bf16 %v6063_v44 }
 0x336   :  { %1553 = vmatpush.msrb.mxu2 %v1240_v48  ;;  %1570 = vmatpush.msrb.mxu3 %v6044_v29  ;;  %v685_v28 = vsel %vm224_vm2, %v6061_v50, %v6060_v57  ;;  %v6065_v17 = vunpack.i.h.bf16 %v5953_v30  ;;  %v6066_v20 = vunpack.i.h.bf16 %v3906_v13  ;;  %v1096_v52 = vsel %vm186_vm1, %v2419_v8, %v2439_v11  ;;  %v6071_v8 = vld [vmem:[#allocation37_spill] sm:$0xff] }
 0x337   :  { %1602 = vmatpush.msrb.mxu0 %v6045_v0  ;;  %1617 = vmatpush.msrb.mxu1 %v1188_v21  ;;  %v1114_v37 = vsel %vm186_vm1, %v2444_v18, %v6062_v45  ;;  %v6067_v30 = vunpack.i.l.bf16 %v5856_v22  ;;  %v6068_v27 = vunpack.i.h.bf16 %v5962_v12  ;;  %v1095_v13 = vsel %vm186_vm1, %v2428_v47, %v2443_v63  ;;  %v6074_v0 = vld [vmem:[#allocation86_spill] sm:$0xff] }
 0x338   :  { %1554 = vmatpush.msrb.mxu2 %v1239_v60  ;;  %1571 = vmatpush.msrb.mxu3 %v6047_v23  ;;  %v667_v48 = vsel %vm205_vm0, %v6065_v17, %v6064_v54  ;;  %v1045_v51 = vsel %vm167_vm3, %v1021_v7, %v6066_v20  ;;  %v1094_v12 = vsel %vm186_vm1, %v2429_v25, %v2444_v18  ;;  %v1638_v23 = vpop.permute.xlu1 %1637 }
 0x339   :  { %1603 = vmatpush.msrb.mxu0 %v6048_v4  ;;  %1618 = vmatpush.msrb.mxu1 %v1187_v35  ;;  %v649_v29 = vsel %vm186_vm1, %v6068_v27, %v6067_v30  ;;  %v1025_v47 = vsel %vm167_vm3, %v5226_v46, %v1021_v7  ;;  %v2445_v46 = vld [vmem:[%s5422_s1] sm:$0xff]  ;;  %v2450_v27 = vld [vmem:[%s5422_s1 + $0x28] sm:$0xff] }
 0x33a   :  { %1555 = vmatpush.msrb.mxu2 %v1238_v15  ;;  %1572 = vmatpush.msrb.mxu3 %v6050_v2 }
 0x33b   :  { %1604 = vmatpush.msrb.mxu0 %v6051_v9  ;;  %1619 = vmatpush.msrb.mxu1 %v1186_v1 }
 0x33c   :  { %1556 = vmatpush.msrb.mxu2 %v1169_v10  ;;  %1573 = vmatpush.msrb.mxu3 %v6053_v61 }
 0x33d   :  { %1525 = vmatmul.f32.vlgmr.msra.gmra.mxu0 %v4680_v59  ;;  %1620 = vmatpush.msrb.mxu1 %v1117_v14  ;;  %v2447_v14 = vld [vmem:[%s5422_s1 + $0x10] sm:$0xff] }
 0x33e   :  { %1557 = vmatpush.msrb.mxu2 %v1168_v55  ;;  %1574 = vmatpush.msrb.mxu3 %v6055_v42 }
 0x33f   :  { %1545 = vmatmul.f32.vlgmr.msra.gmra.mxu1 %v4659_v41 }
 0x340   :  { %1621 = vmatpush.msrb.mxu1 %v1116_v6  ;;  %1558 = vmatpush.msrb.mxu2 %v1167_v39 }
 0x341   :  { %1575 = vmatpush.msrb.mxu3 %v6057_v26 }
 0x342   :  { %1622 = vmatpush.msrb.mxu1 %v1115_v40  ;;  %1559 = vmatpush.msrb.mxu2 %v1166_v53  ;;  %v2448_v40 = vld [vmem:[%s5422_s1 + $0x18] sm:$0xff] }
 0x343   :  { %1576 = vmatpush.msrb.mxu3 %v685_v28 }
 0x344   :  { %1623 = vmatpush.msrb.mxu1 %v1114_v37  ;;  %1560 = vmatpush.msrb.mxu2 %v1097_v38  ;;  %v2449_v38 = vld [vmem:[%s5422_s1 + $0x20] sm:$0xff] }
 0x345   :  { %1577 = vmatpush.msrb.mxu3 %v667_v48  ;;  %1605 = vmatmul.f32.vlgmr.msrb.gmra.mxu0 %v4659_v41  ;;  %v6069_v41 = vunpack.i.l.bf16 %v5859_v56  ;;  %v6072_v56 = vld [vmem:[#allocation94_spill] sm:$0xff] }
 0x346   :  { %1624 = vmatpush.msrb.mxu1 %v1045_v51  ;;  %1561 = vmatpush.msrb.mxu2 %v1096_v52 }
 0x347   :  { %1578 = vmatpush.msrb.mxu3 %v649_v29  ;;  %1711 = vmatmul.msk.f32.vlgmr.msrb.gmra.mxu1 %vm1265_vm9, %v4853_v58  ;;  %v631_v22 = vsel %vm167_vm3, %v6070_v31, %v6069_v41 }
 0x348   :  { %1562 = vmatpush.msrb.mxu2 %v1095_v13 }
 0x349   :  { %1579 = vmatpush.msrb.mxu3 %v631_v22 }
 0x34a   :  { %1563 = vmatpush.msrb.mxu2 %v1094_v12 }
 0x34b   :  { %1580 = vmatpush.msrb.mxu3 %v6071_v8 }
 0x34c   :  { %1564 = vmatpush.msrb.mxu2 %v1025_v47 }
 0x34d   :  { %1581 = vmatpush.msrb.mxu3 %v6072_v56  ;;  %1710 = vmatmul.msk.f32.vlgmr.msrb.gmra.mxu2 %vm1265_vm9, %v4853_v58  ;;  %v1366_v58 = vpop.f32.mrf.mxu0 }
 0x34f   :  { %1582 = vmatpush.msrb.mxu3 %v6073_v16 }
 0x351   :  { %1583 = vmatpush.msrb.mxu3 %v6074_v0 }
 0x353   :  { %1584 = vmatpush.msrb.mxu3 %v6075_v3 }
 0x354   :  { %1585 = vmatmul.f32.vlgmr.msrb.gmra.mxu3 %v4680_v59  ;;  %v2446_v59 = vld [vmem:[%s5422_s1 + $0x8] sm:$0xff] }
 0x358   :  { %v1286_v25 = vpop.f32.mrf.mxu2  ;;  %v1306_v5 = vpop.f32.mrf.mxu3 }
 0x359   :  { %v1307_v21 = vadd.f32 %v1306_v5, %v1286_v25 }
 0x372   :  { %v1326_v60 = vpop.f32.mrf.mxu2 }
 0x373   :  { %v1327_v32 = vadd.f32 %v1326_v60, %v1307_v21 }
 0x375   :  { %v1629_v36 = vadd.f32 %v2445_v46, %v1327_v32 }
 0x377   :  { %v1640_v4 = vadd.f32 %v1638_v23, %v1629_v36 }
 0x378   :  { %v1346_v19 = vpop.f32.mrf.mxu3 }
 0x379   :  { %v1646_v35 = vmax.f32 %v1640_v4, 0.0  ;;  %v1367_v15 = vadd.f32 %v1366_v58, %v1346_v19 }
 0x37b   :  { %1652 = vst [vmem:[#allocation8] sm:$0xff] %v1646_v35  ;;  %v1386_v43 = vpop.f32.mrf.mxu1 }
 0x37c   :  { %v1387_v11 = vadd.f32 %v1386_v43, %v1367_v15 }
 0x37e   :  { %v1630_v2 = vadd.f32 %v2446_v59, %v1387_v11 }
 0x380   :  { %v1641_v9 = vadd.f32 %v1638_v23, %v1630_v2  ;;  %v1446_v63 = vpop.f32.mrf.mxu0 }
 0x382   :  { %v1647_v49 = vmax.f32 %v1641_v9, 0.0 }
 0x384   :  { %1653 = vst [vmem:[#allocation8 + $0x8] sm:$0xff] %v1647_v49 }
 0x396   :  { %v1406_v1 = vpop.f32.mrf.mxu2 }
 0x39b   :  { %v1426_v10 = vpop.f32.mrf.mxu3 }
 0x39c   :  { %v1427_v61 = vadd.f32 %v1426_v10, %v1406_v1 }
 0x39e   :  { %v1447_v24 = vadd.f32 %v1446_v63, %v1427_v61 }
 0x3a0   :  { %v1631_v55 = vadd.f32 %v2447_v14, %v1447_v24 }
 0x3a2   :  { %v1642_v18 = vadd.f32 %v1638_v23, %v1631_v55 }
 0x3a4   :  { %v1648_v42 = vmax.f32 %v1642_v18, 0.0 }
 0x3a6   :  { %1654 = vst [vmem:[#allocation8 + $0x10] sm:$0xff] %v1648_v42 }
 0x3a8   :  { %v1466_v62 = vpop.f32.mrf.mxu1 }
 0x3b5   :  { %v1486_v6 = vpop.f32.mrf.mxu2 }
 0x3b6   :  { %v1487_v39 = vadd.f32 %v1486_v6, %v1466_v62 }
 0x3b8   :  { %v1506_v26 = vpop.f32.mrf.mxu3 }
 0x3b9   :  { %v1507_v33 = vadd.f32 %v1506_v26, %v1487_v39 }
 0x3ba   :  { %v1526_v57 = vpop.f32.mrf.mxu0 }
 0x3bb   :  { %v1632_v53 = vadd.f32 %v2448_v40, %v1507_v33 }
 0x3bc   :  { %v1546_v50 = vpop.f32.mrf.mxu1 }
 0x3bd   :  { %v1643_v7 = vadd.f32 %v1638_v23, %v1632_v53  ;;  %v1547_v28 = vadd.f32 %v1546_v50, %v1526_v57 }
 0x3bf   :  { %v1649_v34 = vmax.f32 %v1643_v7, 0.0 }
 0x3c1   :  { %1655 = vst [vmem:[#allocation8 + $0x18] sm:$0xff] %v1649_v34 }
 0x3c2   :  { %v1606_v17 = vpop.f32.mrf.mxu0 }
 0x3c4   :  { %v1626_v51 = vpop.f32.mrf.mxu1 }
 0x3d0   :  { %v1566_v45 = vpop.f32.mrf.mxu2 }
 0x3d1   :  { %v1567_v37 = vadd.f32 %v1566_v45, %v1547_v28 }
 0x3d3   :  { %v1633_v44 = vadd.f32 %v2449_v38, %v1567_v37 }
 0x3d5   :  { %v1644_v54 = vadd.f32 %v1638_v23, %v1633_v44 }
 0x3d7   :  { %v1650_v48 = vmax.f32 %v1644_v54, 0.0  ;;  %v1586_v20 = vpop.f32.mrf.mxu3 }
 0x3d8   :  { %v1607_v52 = vadd.f32 %v1606_v17, %v1586_v20 }
 0x3d9   :  { %1656 = vst [vmem:[#allocation8 + $0x20] sm:$0xff] %v1650_v48 }
 0x3da   :  { %v1627_v30 = vadd.f32 %v1626_v51, %v1607_v52 }
 0x3dc   :  { %v1634_v29 = vadd.f32 %v2450_v27, %v1627_v30 }
 0x3de   :  { %v1645_v13 = vadd.f32 %v1638_v23, %v1634_v29 }
 0x3e0   :  { %v1651_v41 = vmax.f32 %v1645_v13, 0.0 }
 0x3e2   :  { %1657 = vst [vmem:[#allocation8 + $0x28] sm:$0xff] %v1651_v41 }
 0x3e3   :  { %1668 = dma.vmem_to_hbm [thread:$0]  %s1664_s23, 768, %s1666_s26, [#allocation4]  }
 0x3e4   :  { %2551 = dma.done.wait [#allocation4], 768  }
 0x3e5   :  { %2552 = vsyncadd [#allocation4], 4294966528 }
 0x3e6   :  { %1673 = vsyncpa [#allocation3], 1 }
 0x3e7   :  { %1674 = vsyncpa [#allocation6], 1 }
 0x3e8   :  { %1675 = vsyncpa [#allocation4], 1 }

</bundles_post_ra>
